<compile_context>
chip_gen: v5e
topology: v5e:2x2
jax: 0.10.0
libtpu: 0.0.40
codegen_flags: <defaults>
</compile_context>

<pallas_src>
import functools

import jax
import jax.numpy as jnp
import numpy as np
from jax.experimental import pallas as pl
from jax.experimental.pallas import tpu as pltpu


# ---------------- hyper-parameters ("hps") ----------------
class HPS:
    word_emb_dim = 32      # E
    sent_max_len = 16      # L (power of two -> halving max-pool folds)
    output_channel = 8     # C  (channels per conv kernel width)
    min_kernel_size = 1
    max_kernel_size = 4    # 4 kernel widths  ->  4*C == E  (sentEncoder output dim == E)
    n_feature_size = 32    # unused in forward
    hidden_size = 32       # unused in forward
    n_iter = 1


E = HPS.word_emb_dim            # 32
L = HPS.sent_max_len            # 16
C = HPS.output_channel          # 8
MINK = HPS.min_kernel_size      # 1
MAXK = HPS.max_kernel_size      # 4
NUM_K = MAXK - MINK + 1         # 4
F = NUM_K * C                   # 32  sentEncoder feature dim (== E)
F2 = F // 2                     # 16
F4 = F // 4                     # 8
LE = L * E                      # 512  rows of the streamed x^T slab (4 lane groups)
LF = L * F                      # 512  rows of the conv-score slab
VOCAB = 50

N_SENT = 2048                   # sentences per call (batched)
TILE_N = 256                    # sentences per grid step (2 lane groups)
N_TILES = N_SENT // TILE_N      # 8 grid steps (>=4 so v7x's 2 TCs each get a pipeline)


# ---------------- Pallas kernel ----------------
def mlpcnn_kernel(xt_ref, wconv_ref, mb_ref, w1_ref, w2_ref, w3_ref, b_ref, out_ref,
                  *, seq, feat):
    f2, f4 = feat // 2, feat // 4

    # Conv over every kernel width and every time position as ONE dense MXU matmul:
    #   W^T [L*F, L*E] (block-Toeplitz, bf16, resident) @ x^T [L*E, tile_n] (bf16)
    #   -> scores [L*F, tile_n] f32, fully lane dense.
    scores = jnp.dot(wconv_ref[...], xt_ref[...],
                     preferred_element_type=jnp.float32)              # [L*F, tile_n]
    # Conv bias + (-1e30) on windows that would overrun the max length (f32,
    # broadcast of a [L*F, 1] column over the sentence/lane axis).
    scores = scores + mb_ref[...]

    # Masked time max-pool.  Score rows are ordered (t*F + f), so halving folds are
    # sublane-aligned static slices -> plain VPU maxes, no XLU work, no reshapes.
    s = scores
    half = seq
    while half > 1:
        half //= 2
        s = jnp.maximum(s[: half * feat, :], s[half * feat:, :])
    feat_t = s                                                        # [F, tile_n] f32

    # MLP, already in transposed orientation (sentences on the 128-lane axis).
    # bf16 MXU inputs, f32 accumulation; bias add / ReLU in f32.
    b = b_ref[...]                                                    # [F, 1] packed biases
    h1 = jnp.maximum(
        jnp.dot(w1_ref[...], feat_t.astype(jnp.bfloat16),
                preferred_element_type=jnp.float32) + b[0:f2, :], 0.0)           # [F/2, tile_n]
    h2 = jnp.maximum(
        jnp.dot(w2_ref[...], h1.astype(jnp.bfloat16),
                preferred_element_type=jnp.float32) + b[f2:f2 + f4, :], 0.0)      # [F/4, tile_n]
    out = (jnp.dot(w3_ref[...], h2.astype(jnp.bfloat16),
                   preferred_element_type=jnp.float32) + b[f2 + f4:f2 + f4 + 1, :])  # [1, tile_n]
    out_ref[...] = out                                                # lane-dense store


def mlpcnn_pallas(xt, wconv_t, mbcol, w1, w2, w3, bcol, *, tile_n=TILE_N):
    le, n_sent = xt.shape
    assert le == LE and n_sent % tile_n == 0
    assert (L & (L - 1)) == 0, "halving max-pool folds assume sent_max_len is a power of 2"
    n_tiles = n_sent // tile_n
    kern = functools.partial(mlpcnn_kernel, seq=L, feat=F)
    out = pl.pallas_call(
        kern,
        out_shape=jax.ShapeDtypeStruct((1, n_sent), jnp.float32),
        grid=(n_tiles,),
        in_specs=[
            pl.BlockSpec((LE, tile_n), lambda i: (0, i)),   # x^T slab (streamed, lane-dense)
            pl.BlockSpec((LF, LE), lambda i: (0, 0)),       # block-Toeplitz conv weight (resident)
            pl.BlockSpec((LF, 1), lambda i: (0, 0)),        # conv bias + time-mask column
            pl.BlockSpec((F2, F), lambda i: (0, 0)),        # MLP w1 (resident, bf16)
            pl.BlockSpec((F4, F2), lambda i: (0, 0)),       # MLP w2 (resident, bf16)
            pl.BlockSpec((1, F4), lambda i: (0, 0)),        # MLP w3 (resident, bf16)
            pl.BlockSpec((F, 1), lambda i: (0, 0)),         # packed MLP biases (f32)
        ],
        out_specs=pl.BlockSpec((1, tile_n), lambda i: (0, i)),  # lane-dense score row
        compiler_params=pltpu.CompilerParams(
            dimension_semantics=("parallel",)),
    )(xt, wconv_t, mbcol, w1, w2, w3, bcol)
    return out.reshape(n_sent, 1)


# ---------------- parameter / input construction (glue, plain XLA / numpy) ----------------
def sinusoid_table(n_pos, d_hid):
    pos = np.arange(n_pos)[:, None]
    i = np.arange(d_hid)[None, :]
    angle = pos / np.power(10000.0, 2 * (i // 2) / d_hid)
    tab = np.zeros((n_pos, d_hid), np.float32)
    tab[:, 0::2] = np.sin(angle[:, 0::2])
    tab[:, 1::2] = np.cos(angle[:, 1::2])
    tab[0, :] = 0.0  # padding position
    return tab


def init_params(key):
    ks = jax.random.split(key, 16)
    embed_tab = 0.1 * jax.random.normal(ks[0], (VOCAB, E), jnp.float32)
    embed_tab = embed_tab.at[0].set(0.0)                     # padding_idx = 0
    pos_tab = jnp.asarray(sinusoid_table(L + 1, E))

    conv_ws, conv_bs = [], []
    for k, h in enumerate(range(MINK, MAXK + 1)):
        conv_ws.append(0.1 * jax.random.normal(ks[1 + k], (C, h, E), jnp.float32))
        conv_bs.append(0.1 * jax.random.normal(ks[5 + k], (C,), jnp.float32))

    w1 = 0.1 * jax.random.normal(ks[9], (F2, F), jnp.float32)
    b1 = 0.1 * jax.random.normal(ks[10], (F2,), jnp.float32)
    w2 = 0.1 * jax.random.normal(ks[11], (F4, F2), jnp.float32)
    b2 = 0.1 * jax.random.normal(ks[12], (F4,), jnp.float32)
    w3 = 0.1 * jax.random.normal(ks[13], (1, F4), jnp.float32)
    b3 = 0.1 * jax.random.normal(ks[14], (1,), jnp.float32)
    return embed_tab, pos_tab, conv_ws, conv_bs, (w1, b1, w2, b2, w3, b3)


def build_sentence_embeddings(ids, embed_tab, pos_tab):
    word = embed_tab[ids]                                    # [N, L, E]
    lens = (ids != 0).sum(axis=1)
    ar = jnp.arange(L)[None, :]
    pos_ids = jnp.where(ar < lens[:, None], ar + 1, 0)       # 1..len, then 0 (pad)
    return word + pos_tab[pos_ids]                           # [N, L, E] f32


def pack_wbig_t(conv_ws):
    """Block-Toeplitz conv weight, transposed: W^T [L*F, L*E].

    Row (t*F + k*C + c), col (t'*E + e) holds conv_ws[k][c, t'-t, e] when
    0 <= t'-t < kernel-width(k), else 0.  One dense matmul with x^T then yields the
    conv score of every kernel width at every time position; positions whose window
    would overrun L get partial sums that the -1e30 mask removes before the max-pool.
    """
    w_off = np.zeros((MAXK, F, E), np.float32)               # offset j -> [F, E]
    for k, h in enumerate(range(MINK, MAXK + 1)):
        wk = np.asarray(conv_ws[k])                          # [C, h, E]
        for j in range(h):
            w_off[j, k * C:(k + 1) * C, :] = wk[:, j, :]
    wt = np.zeros((LF, LE), np.float32)
    for t in range(L):
        for j in range(MAXK):
            tp = t + j
            if tp < L:
                wt[t * F:(t + 1) * F, tp * E:(tp + 1) * E] = w_off[j]
    return jnp.asarray(wt)


def build_maskbias_col(conv_bs):
    """[L*F, 1] f32: conv bias per (time, feature), -1e30 where the window overruns L."""
    mb = np.zeros((L, F), np.float32)
    for k, h in enumerate(range(MINK, MAXK + 1)):
        mb[:, k * C:(k + 1) * C] = np.asarray(conv_bs[k])[None, :]
        mb[L - h + 1:, k * C:(k + 1) * C] = -1e30             # invalid time positions
    return jnp.asarray(mb.reshape(LF, 1))


def pack_biases(b1, b2, b3):
    b = np.zeros((F, 1), np.float32)
    b[0:F2, 0] = np.asarray(b1)
    b[F2:F2 + F4, 0] = np.asarray(b2)
    b[F2 + F4, 0] = np.asarray(b3)[0]
    return jnp.asarray(b)


# ---------------- pure-JAX reference ----------------
def reference(x, conv_ws, conv_bs, mlp):
    n = x.shape[0]
    hp = jax.lax.Precision.HIGHEST
    feats = []
    for k, h in enumerate(range(MINK, MAXK + 1)):
        w = conv_ws[k].reshape(C, h * E)
        outs = []
        for t in range(L - h + 1):
            win = x[:, t:t + h, :].reshape(n, h * E)
            outs.append(jnp.dot(win, w.T, precision=hp) + conv_bs[k])
        feats.append(jnp.max(jnp.stack(outs, axis=1), axis=1))
    feat = jnp.concatenate(feats, axis=1)
    w1, b1, w2, b2, w3, b3 = mlp
    h1 = jnp.maximum(jnp.dot(feat, w1.T, precision=hp) + b1, 0.0)
    h2 = jnp.maximum(jnp.dot(h1, w2.T, precision=hp) + b2, 0.0)
    return jnp.dot(h2, w3.T, precision=hp) + b3


if __name__ == "__main__":
    key = jax.random.PRNGKey(0)
    k_param, k_ids, k_len = jax.random.split(key, 3)
    embed_tab, pos_tab, conv_ws, conv_bs, mlp = init_params(k_param)
    w1, b1, w2, b2, w3, b3 = mlp

    # news_list: [N_SENT, L] word ids, zero-padded at the end, variable lengths.
    ids = jax.random.randint(k_ids, (N_SENT, L), 1, VOCAB)
    lens = jax.random.randint(k_len, (N_SENT,), 4, L + 1)
    ids = jnp.where(jnp.arange(L)[None, :] < lens[:, None], ids, 0)

    x = build_sentence_embeddings(ids, embed_tab, pos_tab)           # [N, L, E] f32
    # Round all MXU operands through bf16 once so kernel (bf16 inputs, f32 acc)
    # and reference see identical values.
    x_r = x.astype(jnp.bfloat16).astype(jnp.float32)
    conv_ws_r = [w.astype(jnp.bfloat16).astype(jnp.float32) for w in conv_ws]
    w1_r = w1.astype(jnp.bfloat16).astype(jnp.float32)
    w2_r = w2.astype(jnp.bfloat16).astype(jnp.float32)
    w3_r = w3.astype(jnp.bfloat16).astype(jnp.float32)

    xt = x_r.reshape(N_SENT, LE).T.astype(jnp.bfloat16)              # [L*E, N]  bf16
    wconv_t = pack_wbig_t(conv_ws_r).astype(jnp.bfloat16)            # [L*F, L*E] bf16
    mbcol = build_maskbias_col(conv_bs)                              # [L*F, 1]  f32
    bcol = pack_biases(b1, b2, b3)                                   # [F, 1]    f32

    out = mlpcnn_pallas(xt, wconv_t, mbcol,
                        w1_r.astype(jnp.bfloat16),
                        w2_r.astype(jnp.bfloat16),
                        w3_r.astype(jnp.bfloat16), bcol)
    out = jax.block_until_ready(out)

    ref = reference(x_r, conv_ws_r, conv_bs, (w1_r, b1, w2_r, b2, w3_r, b3))
    # Tolerance covers bf16-MXU inputs / f32 accumulation vs f32-HIGHEST reference and
    # bf16 rounding of the MLP activations; structural bugs produce O(1) errors.
    np.testing.assert_allclose(np.asarray(out), np.asarray(ref), rtol=2e-2, atol=2e-2)
    print("KERNEL_OK")
</pallas_src>

<mosaic_0001>
module attributes {stable_mosaic.version = 11 : i64} {
  func.func @mlpcnn_kernel(%arg0: i32, %arg1: memref<512x256xbf16, #tpu.memory_space<vmem>>, %arg2: memref<512x512xbf16, #tpu.memory_space<vmem>>, %arg3: memref<512x1xf32, #tpu.memory_space<vmem>>, %arg4: memref<16x32xbf16, #tpu.memory_space<vmem>>, %arg5: memref<8x16xbf16, #tpu.memory_space<vmem>>, %arg6: memref<1x8xbf16, #tpu.memory_space<vmem>>, %arg7: memref<32x1xf32, #tpu.memory_space<vmem>>, %arg8: memref<1x256xf32, #tpu.memory_space<vmem>>) attributes {dimension_semantics = [#tpu.dimension_semantics<parallel>], iteration_bounds = array<i64: 8>, scalar_prefetch = 0 : i64, scratch_operands = 0 : i64, tpu.core_type = #tpu.core_type<tc>, window_params = [{transform_indices = @transform_0, window_bounds = array<i64: 512, 256>}, {pipeline_mode = #tpu.pipeline_mode<synchronous>, transform_indices = @transform_1, window_bounds = array<i64: 512, 512>}, {pipeline_mode = #tpu.pipeline_mode<synchronous>, transform_indices = @transform_2, window_bounds = array<i64: 512, 1>}, {pipeline_mode = #tpu.pipeline_mode<synchronous>, transform_indices = @transform_3, window_bounds = array<i64: 16, 32>}, {pipeline_mode = #tpu.pipeline_mode<synchronous>, transform_indices = @transform_4, window_bounds = array<i64: 8, 16>}, {pipeline_mode = #tpu.pipeline_mode<synchronous>, transform_indices = @transform_5, window_bounds = array<i64: 1, 8>}, {pipeline_mode = #tpu.pipeline_mode<synchronous>, transform_indices = @transform_6, window_bounds = array<i64: 32, 1>}, {transform_indices = @transform_7, window_bounds = array<i64: 1, 256>}]} {
    %c0 = arith.constant 0 : index
    %c0_0 = arith.constant 0 : index
    %0 = vector.load %arg2[%c0, %c0_0] : memref<512x512xbf16, #tpu.memory_space<vmem>>, vector<512x512xbf16>
    %c0_1 = arith.constant 0 : index
    %c0_2 = arith.constant 0 : index
    %1 = vector.load %arg1[%c0_1, %c0_2] : memref<512x256xbf16, #tpu.memory_space<vmem>>, vector<512x256xbf16>
    %cst = arith.constant dense<0.000000e+00> : vector<512x256xf32>
    %2 = tpu.matmul %0, %1, %cst {dimension_numbers = #tpu.dot_dimension_numbers<[1], [0], [0], [1], [0, 0, 1, 1], [], []>} : vector<512x512xbf16>, vector<512x256xbf16>, vector<512x256xf32> -> vector<512x256xf32>
    %c0_3 = arith.constant 0 : index
    %c0_4 = arith.constant 0 : index
    %3 = vector.load %arg3[%c0_3, %c0_4] : memref<512x1xf32, #tpu.memory_space<vmem>>, vector<512x1xf32>
    %4 = vector.broadcast %3 : vector<512x1xf32> to vector<512x256xf32>
    %5 = arith.addf %2, %4 : vector<512x256xf32>
    %6 = vector.extract_strided_slice %5 {offsets = [0, 0], sizes = [256, 256], strides = [1, 1]} : vector<512x256xf32> to vector<256x256xf32>
    %7 = vector.extract_strided_slice %5 {offsets = [256, 0], sizes = [256, 256], strides = [1, 1]} : vector<512x256xf32> to vector<256x256xf32>
    %8 = arith.maximumf %6, %7 : vector<256x256xf32>
    %9 = vector.extract_strided_slice %8 {offsets = [0, 0], sizes = [128, 256], strides = [1, 1]} : vector<256x256xf32> to vector<128x256xf32>
    %10 = vector.extract_strided_slice %8 {offsets = [128, 0], sizes = [128, 256], strides = [1, 1]} : vector<256x256xf32> to vector<128x256xf32>
    %11 = arith.maximumf %9, %10 : vector<128x256xf32>
    %12 = vector.extract_strided_slice %11 {offsets = [0, 0], sizes = [64, 256], strides = [1, 1]} : vector<128x256xf32> to vector<64x256xf32>
    %13 = vector.extract_strided_slice %11 {offsets = [64, 0], sizes = [64, 256], strides = [1, 1]} : vector<128x256xf32> to vector<64x256xf32>
    %14 = arith.maximumf %12, %13 : vector<64x256xf32>
    %15 = vector.extract_strided_slice %14 {offsets = [0, 0], sizes = [32, 256], strides = [1, 1]} : vector<64x256xf32> to vector<32x256xf32>
    %16 = vector.extract_strided_slice %14 {offsets = [32, 0], sizes = [32, 256], strides = [1, 1]} : vector<64x256xf32> to vector<32x256xf32>
    %17 = arith.maximumf %15, %16 : vector<32x256xf32>
    %c0_5 = arith.constant 0 : index
    %c0_6 = arith.constant 0 : index
    %18 = vector.load %arg7[%c0_5, %c0_6] : memref<32x1xf32, #tpu.memory_space<vmem>>, vector<32x1xf32>
    %c0_7 = arith.constant 0 : index
    %c0_8 = arith.constant 0 : index
    %19 = vector.load %arg4[%c0_7, %c0_8] : memref<16x32xbf16, #tpu.memory_space<vmem>>, vector<16x32xbf16>
    %20 = arith.truncf %17 : vector<32x256xf32> to vector<32x256xbf16>
    %cst_9 = arith.constant dense<0.000000e+00> : vector<16x256xf32>
    %21 = tpu.matmul %19, %20, %cst_9 {dimension_numbers = #tpu.dot_dimension_numbers<[1], [0], [0], [1], [0, 0, 1, 1], [], []>} : vector<16x32xbf16>, vector<32x256xbf16>, vector<16x256xf32> -> vector<16x256xf32>
    %22 = vector.extract_strided_slice %18 {offsets = [0, 0], sizes = [16, 1], strides = [1, 1]} : vector<32x1xf32> to vector<16x1xf32>
    %23 = vector.broadcast %22 : vector<16x1xf32> to vector<16x256xf32>
    %24 = arith.addf %21, %23 : vector<16x256xf32>
    %cst_10 = arith.constant 0.000000e+00 : f32
    %25 = vector.broadcast %cst_10 : f32 to vector<16x256xf32>
    %26 = arith.maximumf %24, %25 : vector<16x256xf32>
    %c0_11 = arith.constant 0 : index
    %c0_12 = arith.constant 0 : index
    %27 = vector.load %arg5[%c0_11, %c0_12] : memref<8x16xbf16, #tpu.memory_space<vmem>>, vector<8x16xbf16>
    %28 = arith.truncf %26 : vector<16x256xf32> to vector<16x256xbf16>
    %cst_13 = arith.constant dense<0.000000e+00> : vector<8x256xf32>
    %29 = tpu.matmul %27, %28, %cst_13 {dimension_numbers = #tpu.dot_dimension_numbers<[1], [0], [0], [1], [0, 0, 1, 1], [], []>} : vector<8x16xbf16>, vector<16x256xbf16>, vector<8x256xf32> -> vector<8x256xf32>
    %30 = vector.extract_strided_slice %18 {offsets = [16, 0], sizes = [8, 1], strides = [1, 1]} : vector<32x1xf32> to vector<8x1xf32>
    %31 = vector.broadcast %30 : vector<8x1xf32> to vector<8x256xf32>
    %32 = arith.addf %29, %31 : vector<8x256xf32>
    %cst_14 = arith.constant 0.000000e+00 : f32
    %33 = vector.broadcast %cst_14 : f32 to vector<8x256xf32>
    %34 = arith.maximumf %32, %33 : vector<8x256xf32>
    %c0_15 = arith.constant 0 : index
    %c0_16 = arith.constant 0 : index
    %35 = vector.load %arg6[%c0_15, %c0_16] : memref<1x8xbf16, #tpu.memory_space<vmem>>, vector<1x8xbf16>
    %36 = arith.truncf %34 : vector<8x256xf32> to vector<8x256xbf16>
    %cst_17 = arith.constant dense<0.000000e+00> : vector<1x256xf32>
    %37 = tpu.matmul %35, %36, %cst_17 {dimension_numbers = #tpu.dot_dimension_numbers<[1], [0], [0], [1], [0, 0, 1, 1], [], []>} : vector<1x8xbf16>, vector<8x256xbf16>, vector<1x256xf32> -> vector<1x256xf32>
    %38 = vector.extract_strided_slice %18 {offsets = [24, 0], sizes = [1, 1], strides = [1, 1]} : vector<32x1xf32> to vector<1x1xf32>
    %39 = vector.broadcast %38 : vector<1x1xf32> to vector<1x256xf32>
    %40 = arith.addf %37, %39 : vector<1x256xf32>
    %c0_18 = arith.constant 0 : index
    %c0_19 = arith.constant 0 : index
    %41 = vector.load %arg8[%c0_18, %c0_19] : memref<1x256xf32, #tpu.memory_space<vmem>>, vector<1x256xf32>
    tpu.vector_store %arg8[%c0_18, %c0_19], %40 {strides = array<i32>} : memref<1x256xf32, #tpu.memory_space<vmem>>, vector<1x256xf32>,
    return
  }
  func.func @transform_0(%arg0: i32) -> (i32, i32) {
    %c0_i32 = arith.constant 0 : i32
    %c0_i32_0 = arith.constant 0 : i32
    return %c0_i32, %arg0 : i32, i32
  }
  func.func @transform_1(%arg0: i32) -> (i32, i32) {
    %c0_i32 = arith.constant 0 : i32
    %c0_i32_0 = arith.constant 0 : i32
    %c0_i32_1 = arith.constant 0 : i32
    return %c0_i32, %c0_i32_0 : i32, i32
  }
  func.func @transform_2(%arg0: i32) -> (i32, i32) {
    %c0_i32 = arith.constant 0 : i32
    %c0_i32_0 = arith.constant 0 : i32
    %c0_i32_1 = arith.constant 0 : i32
    return %c0_i32, %c0_i32_0 : i32, i32
  }
  func.func @transform_3(%arg0: i32) -> (i32, i32) {
    %c0_i32 = arith.constant 0 : i32
    %c0_i32_0 = arith.constant 0 : i32
    %c0_i32_1 = arith.constant 0 : i32
    return %c0_i32, %c0_i32_0 : i32, i32
  }
  func.func @transform_4(%arg0: i32) -> (i32, i32) {
    %c0_i32 = arith.constant 0 : i32
    %c0_i32_0 = arith.constant 0 : i32
    %c0_i32_1 = arith.constant 0 : i32
    return %c0_i32, %c0_i32_0 : i32, i32
  }
  func.func @transform_5(%arg0: i32) -> (i32, i32) {
    %c0_i32 = arith.constant 0 : i32
    %c0_i32_0 = arith.constant 0 : i32
    %c0_i32_1 = arith.constant 0 : i32
    return %c0_i32, %c0_i32_0 : i32, i32
  }
  func.func @transform_6(%arg0: i32) -> (i32, i32) {
    %c0_i32 = arith.constant 0 : i32
    %c0_i32_0 = arith.constant 0 : i32
    %c0_i32_1 = arith.constant 0 : i32
    return %c0_i32, %c0_i32_0 : i32, i32
  }
  func.func @transform_7(%arg0: i32) -> (i32, i32) {
    %c0_i32 = arith.constant 0 : i32
    %c0_i32_0 = arith.constant 0 : i32
    return %c0_i32, %arg0 : i32, i32
  }
}

</mosaic_0001>

<bundles_post_ra>
// kernel: tpu_custom_call.1
= control target key start
LH: loop header
LB: loop body
LE: loop exit
PB: predicated region body
PF: predicated region fallthrough
CT: control target
= control target key end

     0   :  { %s6632_s0 = inlined_call_operand.hbm [shape: bf16[512,2048], index: 0, kind: input, shape index: {}]   ;;  %s6633_s1 = inlined_call_operand.hbm [shape: bf16[512,512], index: 1, kind: input, shape index: {}]   ;;  %s6634_s2 = inlined_call_operand.vmem [shape: f32[512,1], index: 2, kind: input, shape index: {}]   ;;  %s6635_s3 = inlined_call_operand.hbm [shape: bf16[16,32], index: 3, kind: input, shape index: {}]   ;;  %s6636_s4 = inlined_call_operand.hbm [shape: bf16[8,16], index: 4, kind: input, shape index: {}]   ;;  %s6637_s5 = inlined_call_operand.hbm [shape: bf16[1,8], index: 5, kind: input, shape index: {}]   ;;  %s6638_s6 = inlined_call_operand.vmem [shape: f32[32,1], index: 6, kind: input, shape index: {}]   ;;  %s6639_s7 = inlined_call_operand.hbm [shape: f32[1,2048], index: 7, kind: output, shape index: {}]  }
   0x1   :  { %6808 = sst [smem:[#allocation179_spill]] %s6633_s1 }
   0x2   :  { %6809 = sst [smem:[#allocation180_spill]] %s6635_s3 }
   0x3   :  { %12 = vsyncpa [#allocation3], 0 }
   0x4   :  { %14 = vsyncpa [#allocation3 + $0x1], 0 }
   0x5   :  { %15 = vsyncpa [#allocation6], 0 }
   0x6   :  { %16 = vsyncpa [#allocation9], 0 }
   0x7   :  { %17 = vsyncpa [#allocation4], 0 }
   0x8   :  { %19 = vsyncpa [#allocation4 + $0x1], 0  ;;  %s5022_s24 = smov 0   ;;  %s5024_s25 = smov 0  }
   0x9   :  { %s5026_s26 = smov 0   ;;  %s5028_s27 = smov 0  }
   0xa LB: > { %s5043_s28 = sadd.s32 4294967295, %s4968_s27   ;;  %s3653_s29 = sadd.s32 4294967294, %s4968_s27   ;;  %s4968_s27 = sphi %s5028_s27, %s7179_s27   ;;  %s4964_s26 = sphi %s5026_s26, %s7178_s26   ;;  %s4960_s25 = sphi %s5024_s25, %s7177_s25   ;;  %s4956_s24 = sphi %s5022_s24, %s7176_s24  }
   0xb   : > { %p45_p0 = scmp.ne.s32.totalorder %s4960_s25, %s4956_s24  ;;  %p46_p1 = scmp.eq.s32.totalorder %s5043_s28, 0 }
   0xc   : > { %p195_p2 = scmp.eq.s32.totalorder %s5043_s28, 7  ;;  %p201_p3 = scmp.eq.s32.totalorder %s3653_s29, 7 }
   0xd   : > { %p5052_p4 = por %p46_p1, %p45_p0  ;;  %p3654_p5 = scmp.ge.s32.totalorder %s4968_s27, 1 }
   0xe   : > { %p5057_p6 = por %p201_p3, %p45_p0  ;;  %p208_p7 = scmp.lt.s32.totalorder %s4968_s27, 9 }
   0xf   : > { %s6812_s1 = sld [smem:[#allocation179_spill]]  ;;  %s4970_s13 = smov [#allocation5]  }
  0x10   : > { %p5065_p8 = pnand %p3654_p5, %p208_p7  ;;  %s221_s14 = sshll.u32 %s4970_s13, 4  ;;  %s222_s14 = int_to_ptr.vmem [resolvable:$true] %s221_s14 }
  0x11   : > { %s251_s18 = sshll.u32 %s6636_s4, 4  ;;  %s4971_s19 = smov 256   ;;  %s252_s18 = int_to_ptr.hbm [resolvable:$true] %s251_s18 }
  0x12   : > { %p4666_p9 = pneg %p5065_p8  ;;  %s4972_s20 = smov 16  }
  0x13   : > { %s4973_s21 = smov [#allocation8]   ;;  %s6815_s3 = sld [smem:[#allocation180_spill]] }
  0x14   : > { %p5073_p10 = pnand %p4666_p9, %p46_p1  ;;  %s253_s22 = sshll.u32 %s4973_s21, 4  ;;  %s254_s22 = int_to_ptr.vmem [resolvable:$true] %s253_s22 }
  0x15   : > { %s219_s11 = sshll.u32 %s6812_s1, 4  ;;  %s4974_s10 = smov [#allocation7]   ;;  %s220_s11 = int_to_ptr.hbm [resolvable:$true] %s219_s11 }
  0x16   : > { %4669 = dma.hbm_to_vmem [thread:$0]  (!%p5073_p10), %s220_s11, 16384, %s222_s14, [#allocation6], %s4971_s19, %s4971_s19, %s4972_s20  }
  0x17   : > { %4675 = dma.hbm_to_vmem [thread:$0]  (!%p5073_p10), %s252_s18, 64, %s254_s22, [#allocation9]  }
  0x18   : > { %s238_s13 = sshll.u32 %s4974_s10, 4  ;;  %s263_s16 = sshll.u32 %s6637_s5, 4  ;;  %s239_s13 = int_to_ptr.vmem [resolvable:$true] %s238_s13  ;;  %s264_s16 = int_to_ptr.hbm [resolvable:$true] %s263_s16 }
  0x19   : > { %s236_s9 = sshll.u32 %s6815_s3, 4  ;;  %s4975_s17 = smov 64   ;;  %s237_s9 = int_to_ptr.hbm [resolvable:$true] %s236_s9 }
  0x1a   : > { %s4976_s19 = smov 4   ;;  %s4977_s18 = smov [#allocation10]  }
  0x1b   : > { %4672 = dma.hbm_to_vmem [thread:$0]  (!%p5073_p10), %s237_s9, 128, %s239_s13, [#allocation6], %s4975_s17, %s4975_s17, %s4976_s19  }
  0x1c   : > { %s265_s20 = sshll.u32 %s4977_s18, 4  ;;  %s5095_s21 = sadd.s32 1, %s4968_s27   ;;  %s266_s20 = int_to_ptr.vmem [resolvable:$true] %s265_s20 }
  0x1d   : > { %4678 = dma.hbm_to_vmem [thread:$0]  (!%p5073_p10), %s264_s16, 16, %s266_s20, [#allocation9]  }
  0x1e   : > { %s32_s22 = sadd.s32 1, %s4964_s26  ;;  %s29_s23 = ssub.s32 %s4968_s27, %s5095_s21 }
  0x1f   : > { %p39_p11 = scmp.ne.s32.totalorder %s4964_s26, %s4960_s25  ;;  %p30_p12 = scmp.eq.s32.totalorder %s29_s23, 0 }
  0x20   : > { %p40_p13 = scmp.eq.s32.totalorder %s4968_s27, 0  ;;  %p4691_p3 = scmp.lt.s32.totalorder %s4968_s27, 8 }
  0x21   : > { %p5105_p0 = por %p195_p2, %p39_p11  ;;  %s279_s10 = sand.u32 1, %s4964_s26  }
  0x22   : > { %s5111_s9 = scalar_select %p30_p12, %s4964_s26, %s32_s22  }
  0x23   : > { %p41_p5 = por %p40_p13, %p39_p11  ;;  %s3660_s15 = sshll.u32 %s279_s10, 9 }
  0x24   : > { %s4452_s13 = sshll.u32 %s4968_s27, 3  ;;  %s283_s17 = scalar_lea.vmem [#allocation2], %s3660_s15 }
  0x25   : > { %s288_s16 = scalar_lea.hbm %s6632_s0, %s4452_s13  ;;  %s291_s19 = sshll.u32 %s283_s17, 4  ;;  %s292_s19 = int_to_ptr.vmem [resolvable:$true] %s291_s19 }
  0x26   : > { %s289_s18 = sshll.u32 %s288_s16, 4  ;;  %p5118_p2 = pnand %p4691_p3, %p41_p5  ;;  %s290_s18 = int_to_ptr.hbm [resolvable:$true] %s289_s18 }
  0x27   : > { %s280_s22 = scalar_lea.sflag [#allocation3], %s279_s10  ;;  %s4864_s23 = sshra.s32 %s290_s18, 4  ;;  %s4865_s23 = int_to_ptr.hbm [resolvable:$true] %s4864_s23 }
  0x28   : > { %s4866_s1 = scalar_lea.hbm %s4865_s23, 512  ;;  %p4868_p9 = pneg %p5118_p2 }
  0x29   : > { %p4867_p7 = scmp.ne.s32.totalorder %s4865_s23, %s4866_s1  ;;  %s4871_s11 = scalar_lea.hbm %s6632_s0, 4096 }
  0x2a   : > { %p4872_p12 = scmp.lt.s32.totalorder %s4865_s23, %s6632_s0  ;;  %p4873_p13 = scmp.lt.s32.totalorder %s4871_s11, %s4866_s1 }
  0x2b   : > { %p4869_p10 = pnand %p4868_p9, %p4867_p7 }
  0x2c   : > { %p4874_p3 = por %p4873_p13, %p4872_p12 }
  0x2d   : > { %p4870_p11 = pneg %p4869_p10 }
  0x2f   : > { %p4875_p5 = pnand %p4874_p3, %p4870_p11 }
  0x31   : > { %4878 = shalt.err (!%p4875_p5)
}
  0x32   : > { %s4978_s10 = smov 1024   ;;  %s4979_s17 = smov 128  }
  0x33   : > { %s4980_s3 = smov 8   ;;  %303 = sbr.rel (%p5065_p8) target bundleno = 1685 (0x695), region = 48 }
  0x34   : > { %4682 = dma.hbm_to_vmem [thread:$0]  (!%p5118_p2), %s290_s18, 8192, %s292_s19, %s280_s22, %s4978_s10, %s4979_s17, %s4980_s3  }
  0x38   : > { %s5135_s13 = sand.u32 1, %s4960_s25  }
  0x39   : > { %s3664_s23 = sshll.u32 %s5135_s13, 9  ;;  %s306_s1 = scalar_lea.sflag [#allocation3], %s5135_s13 }
  0x3a   : > { %s5139_s15 = scalar_lea.vmem [#allocation2], %s3664_s23 }
  0x3b   : > { %4939 = dma.done.wait (%p5052_p4), %s306_s1, 8192  }
  0x3c   : > { %4941 = vsyncadd (%p5052_p4), %s306_s1, 4294959104 }
  0x3d   : > { %4943 = dma.done.wait (%p46_p1), [#allocation6], 16512  }
  0x3e   : > { %4945 = vsyncadd (%p46_p1), [#allocation6], 4294950784 }
  0x3f   : > { %4947 = dma.done.wait (%p46_p1), [#allocation9], 80  }
  0x40   : > { %4949 = vsyncadd (%p46_p1), [#allocation9], 4294967216  ;;  %v4981_v0 = vmov 0   ;;  %v566_v1 = vld [vmem:[%s6634_s2 + $0x50] sm:$0xff]  ;;  %v4596_v5 = vld [vmem:[%s5139_s15 + $0x74] sm:$0xf0] }
  0x41   : > { %4743 = vset.pattern.permute.xlu2 %v4981_v0  ;;  %4742 = vset.pattern.permute.xlu1 %v4981_v0  ;;  %v562_v2 = vld [vmem:[%s6634_s2 + $0x30] sm:$0xff]  ;;  %v4612_v8 = vld [vmem:[%s5139_s15 + $0xf4] sm:$0xf0]  ;;  %v4232_v15 = vld [vmem:[%s5139_s15 + $0x60] sm:$0xf]  ;;  %vm3397_vm0 = vcmask 261120  }
  0x42   : > { %4741 = vset.pattern.permute.xlu0 %v4981_v0  ;;  %v558_v3 = vld [vmem:[%s6634_s2 + $0x10] sm:$0xff]  ;;  %672 = vperm.xlu2 %4743, %v566_v1   ;;  %v4628_v10 = vld [vmem:[%s5139_s15 + $0x174] sm:$0xf0]  ;;  %v4594_v17 = vld [vmem:[%s5139_s15 + $0x64] sm:$0xf0]  ;;  %vm3441_vm1 = vcmask 130048  }
  0x43   : > { %652 = vperm.xlu1 %4742, %v562_v2   ;;  %v4240_v4 = vld [vmem:[%s5139_s15 + $0x70] sm:$0xf]  ;;  %632 = vperm.xlu0 %4741, %v558_v3   ;;  %v4644_v14 = vld [vmem:[%s5139_s15 + $0x1f4] sm:$0xf0]  ;;  %v4296_v18 = vld [vmem:[%s5139_s15 + $0xe0] sm:$0xf]  ;;  %v4233_v20 = vor.u32 %v4594_v17, %v4232_v15 }
  0x44   : > { %v4304_v6 = vld [vmem:[%s5139_s15 + $0xf0] sm:$0xf]  ;;  %v4241_v7 = vor.u32 %v4596_v5, %v4240_v4  ;;  %v4610_v19 = vld [vmem:[%s5139_s15 + $0xe4] sm:$0xf0]  ;;  %v4360_v22 = vld [vmem:[%s5139_s15 + $0x160] sm:$0xf] }
  0x45   : > { %v4368_v9 = vld [vmem:[%s5139_s15 + $0x170] sm:$0xf]  ;;  %v4305_v11 = vor.u32 %v4612_v8, %v4304_v6  ;;  %v4297_v21 = vor.u32 %v4610_v19, %v4296_v18  ;;  %v4626_v23 = vld [vmem:[%s5139_s15 + $0x164] sm:$0xf0]  ;;  %v4424_v24 = vld [vmem:[%s5139_s15 + $0x1e0] sm:$0xf] }
  0x46   : > { %v4369_v12 = vor.u32 %v4628_v10, %v4368_v9  ;;  %v4432_v13 = vld [vmem:[%s5139_s15 + $0x1f0] sm:$0xf]  ;;  %1900 = vmatpush.bf16.msra.mxu0 %v4241_v7  ;;  %v4361_v25 = vor.u32 %v4626_v23, %v4360_v22  ;;  %v4642_v26 = vld [vmem:[%s5139_s15 + $0x1e4] sm:$0xf0]  ;;  %v567_v27 = vld [vmem:[%s6634_s2 + $0x58] sm:$0xff]  ;;  %vm3485_vm2 = vcmask 1043456  }
  0x47   : > { %v4433_v16 = vor.u32 %v4644_v14, %v4432_v13  ;;  %2069 = vmatpush.bf16.msra.mxu1 %v4305_v11  ;;  %v563_v28 = vld [vmem:[%s6634_s2 + $0x38] sm:$0xff]  ;;  %v4425_v29 = vor.u32 %v4642_v26, %v4424_v24  ;;  %v4224_v31 = vld [vmem:[%s5139_s15 + $0x50] sm:$0xf]  ;;  %v4216_v43 = vld [vmem:[%s5139_s15 + $0x40] sm:$0xf]  ;;  %vm3481_vm3 = vcmask 64512  }
  0x48   : > { %2238 = vmatpush.bf16.msra.mxu2 %v4369_v12  ;;  %v559_v30 = vld [vmem:[%s6634_s2 + $0x18] sm:$0xff]  ;;  %v4288_v34 = vld [vmem:[%s5139_s15 + $0xd0] sm:$0xf]  ;;  %v4590_v44 = vld [vmem:[%s5139_s15 + $0x44] sm:$0xf0]  ;;  %s3669_s16 = sshll.u32 %s5135_s13, 1 }
  0x49   : > { %2407 = vmatpush.bf16.msra.mxu3 %v4433_v16  ;;  %v4592_v32 = vld [vmem:[%s5139_s15 + $0x54] sm:$0xf0]  ;;  %v4352_v36 = vld [vmem:[%s5139_s15 + $0x150] sm:$0xf]  ;;  %v4280_v45 = vld [vmem:[%s5139_s15 + $0xc0] sm:$0xf]  ;;  %v4217_v49 = vor.u32 %v4590_v44, %v4216_v43 }
  0x4a   : > { %1901 = vmatpush.bf16.msra.mxu0 %v4233_v20  ;;  %v4225_v33 = vor.u32 %v4592_v32, %v4224_v31  ;;  %v4608_v35 = vld [vmem:[%s5139_s15 + $0xd4] sm:$0xf0]  ;;  %v4416_v39 = vld [vmem:[%s5139_s15 + $0x1d0] sm:$0xf]  ;;  %677 = vperm.xlu2 %4743, %v567_v27   ;;  %v4606_v46 = vld [vmem:[%s5139_s15 + $0xc4] sm:$0xf0] }
  0x4b   : > { %2070 = vmatpush.bf16.msra.mxu1 %v4297_v21  ;;  %v4289_v37 = vor.u32 %v4608_v35, %v4288_v34  ;;  %v4624_v38 = vld [vmem:[%s5139_s15 + $0x154] sm:$0xf0]  ;;  %657 = vperm.xlu1 %4742, %v563_v28   ;;  %v4344_v47 = vld [vmem:[%s5139_s15 + $0x140] sm:$0xf]  ;;  %v4622_v48 = vld [vmem:[%s5139_s15 + $0x144] sm:$0xf0]  ;;  %v4281_v52 = vor.u32 %v4606_v46, %v4280_v45 }
  0x4c   : > { %2239 = vmatpush.bf16.msra.mxu2 %v4361_v25  ;;  %v4640_v40 = vld [vmem:[%s5139_s15 + $0x1d4] sm:$0xf0]  ;;  %v4353_v41 = vor.u32 %v4624_v38, %v4352_v36  ;;  %637 = vperm.xlu0 %4741, %v559_v30   ;;  %v4408_v50 = vld [vmem:[%s5139_s15 + $0x1c0] sm:$0xf]  ;;  %v4638_v51 = vld [vmem:[%s5139_s15 + $0x1c4] sm:$0xf0]  ;;  %v4345_v53 = vor.u32 %v4622_v48, %v4344_v47 }
  0x4d   : > { %2408 = vmatpush.bf16.msra.mxu3 %v4425_v29  ;;  %v4417_v42 = vor.u32 %v4640_v40, %v4416_v39  ;;  %v574_v54 = vld [vmem:[%s6634_s2 + $0x90] sm:$0xff]  ;;  %v4409_v56 = vor.u32 %v4638_v51, %v4408_v50  ;;  %v4588_v57 = vld [vmem:[%s5139_s15 + $0x34] sm:$0xf0]  ;;  %v4200_v5 = vld [vmem:[%s5139_s15 + $0x20] sm:$0xf]  ;;  %s4449_s10 = sshll.u32 %s5043_s28, 1 }
  0x4e   : > { %1902 = vmatpush.bf16.msra.mxu0 %v4225_v33  ;;  %v4208_v55 = vld [vmem:[%s5139_s15 + $0x30] sm:$0xf]  ;;  %v4604_v59 = vld [vmem:[%s5139_s15 + $0xb4] sm:$0xf0]  ;;  %v4586_v6 = vld [vmem:[%s5139_s15 + $0x24] sm:$0xf0]  ;;  %s3540_s1 = scalar_lea.hbm %s6639_s7, %s4449_s10 }
  0x4f   : > { %2071 = vmatpush.bf16.msra.mxu1 %v4289_v37  ;;  %v4272_v58 = vld [vmem:[%s5139_s15 + $0xb0] sm:$0xf]  ;;  %v4620_v61 = vld [vmem:[%s5139_s15 + $0x134] sm:$0xf0]  ;;  %v4209_v1 = vor.u32 %v4588_v57, %v4208_v55  ;;  %v4264_v7 = vld [vmem:[%s5139_s15 + $0xa0] sm:$0xf]  ;;  %v4201_v14 = vor.u32 %v4586_v6, %v4200_v5 }
  0x50   : > { %2240 = vmatpush.bf16.msra.mxu2 %v4353_v41  ;;  %v4336_v60 = vld [vmem:[%s5139_s15 + $0x130] sm:$0xf]  ;;  %v571_v63 = vld [vmem:[%s6634_s2 + $0x78] sm:$0xff]  ;;  %v4273_v3 = vor.u32 %v4604_v59, %v4272_v58  ;;  %v4602_v9 = vld [vmem:[%s5139_s15 + $0xa4] sm:$0xf0]  ;;  %s3544_s30 = sshll.u32 %s3540_s1, 4  ;;  %s3545_s30 = int_to_ptr.hbm [resolvable:$true] %s3544_s30 }
  0x51   : > { %2409 = vmatpush.bf16.msra.mxu3 %v4417_v42  ;;  %v4400_v62 = vld [vmem:[%s5139_s15 + $0x1b0] sm:$0xf]  ;;  %v4636_v2 = vld [vmem:[%s5139_s15 + $0x1b4] sm:$0xf0]  ;;  %v4337_v4 = vor.u32 %v4620_v61, %v4336_v60  ;;  %v4328_v10 = vld [vmem:[%s5139_s15 + $0x120] sm:$0xf]  ;;  %v4265_v15 = vor.u32 %v4602_v9, %v4264_v7 }
  0x52   : > { %1903 = vmatpush.bf16.msra.mxu0 %v4217_v49  ;;  %v570_v0 = vld [vmem:[%s6634_s2 + $0x70] sm:$0xff]  ;;  %712 = vperm.xlu2 %4743, %v574_v54   ;;  %v4401_v8 = vor.u32 %v4636_v2, %v4400_v62  ;;  %v4618_v11 = vld [vmem:[%s5139_s15 + $0x124] sm:$0xf0]  ;;  %v4392_v12 = vld [vmem:[%s5139_s15 + $0x1a0] sm:$0xf]  ;;  %vm3521_vm4 = vcmask 1040384  }
  0x53   : > { %2072 = vmatpush.bf16.msra.mxu1 %v4281_v52  ;;  %697 = vperm.xlu1 %4742, %v571_v63   ;;  %v4634_v13 = vld [vmem:[%s5139_s15 + $0x1a4] sm:$0xf0]  ;;  %v4329_v16 = vor.u32 %v4618_v11, %v4328_v10  ;;  %v4192_v17 = vld [vmem:[%s5139_s15 + $0x10] sm:$0xf]  ;;  %v4584_v18 = vld [vmem:[%s5139_s15 + $0x14] sm:$0xf0] }
  0x54   : > { %2241 = vmatpush.bf16.msra.mxu2 %v4345_v53  ;;  %692 = vperm.xlu0 %4741, %v570_v0   ;;  %v4256_v19 = vld [vmem:[%s5139_s15 + $0x90] sm:$0xf]  ;;  %v4393_v20 = vor.u32 %v4634_v13, %v4392_v12  ;;  %v4600_v21 = vld [vmem:[%s5139_s15 + $0x94] sm:$0xf0]  ;;  %v4193_v29 = vor.u32 %v4584_v18, %v4192_v17  ;;  %v4184_v32 = vld [vmem:[%s5139_s15] sm:$0xf] }
  0x55   : > { %2410 = vmatpush.bf16.msra.mxu3 %v4409_v56  ;;  %v4320_v22 = vld [vmem:[%s5139_s15 + $0x110] sm:$0xf]  ;;  %v4616_v23 = vld [vmem:[%s5139_s15 + $0x114] sm:$0xf0]  ;;  %v4257_v30 = vor.u32 %v4600_v21, %v4256_v19  ;;  %v4582_v33 = vld [vmem:[%s5139_s15 + $0x4] sm:$0xf0] }
  0x56   : > { %1904 = vmatpush.bf16.msra.mxu0 %v4209_v1  ;;  %v579_v24 = vld [vmem:[%s6634_s2 + $0xb8] sm:$0xff]  ;;  %v4384_v25 = vld [vmem:[%s5139_s15 + $0x190] sm:$0xf]  ;;  %v4321_v31 = vor.u32 %v4616_v23, %v4320_v22  ;;  %v4248_v34 = vld [vmem:[%s5139_s15 + $0x80] sm:$0xf]  ;;  %v4185_v41 = vor.u32 %v4582_v33, %v4184_v32  ;;  %s3530_s28 = scalar_lea.sflag [#allocation4], %s5135_s13 }
  0x57   : > { %2073 = vmatpush.bf16.msra.mxu1 %v4273_v3  ;;  %v4632_v26 = vld [vmem:[%s5139_s15 + $0x194] sm:$0xf0]  ;;  %v578_v27 = vld [vmem:[%s6634_s2 + $0xb0] sm:$0xff]  ;;  %v4598_v36 = vld [vmem:[%s5139_s15 + $0x84] sm:$0xf0]  ;;  %s4908_s12 = sshra.s32 %s3545_s30, 4  ;;  %s4909_s12 = int_to_ptr.hbm [resolvable:$true] %s4908_s12 }
  0x58   : > { %2242 = vmatpush.bf16.msra.mxu2 %v4337_v4  ;;  %v575_v28 = vld [vmem:[%s6634_s2 + $0x98] sm:$0xff]  ;;  %v4385_v35 = vor.u32 %v4632_v26, %v4384_v25  ;;  %v4312_v37 = vld [vmem:[%s5139_s15 + $0x100] sm:$0xf]  ;;  %v4614_v38 = vld [vmem:[%s5139_s15 + $0x104] sm:$0xf0]  ;;  %v4249_v44 = vor.u32 %v4598_v36, %v4248_v34  ;;  %s4910_s19 = scalar_lea.hbm %s4909_s12, 2  ;;  %p4915_p2 = scmp.lt.s32.totalorder %s4909_s12, %s6639_s7 }
  0x59   : > { %2411 = vmatpush.bf16.msra.mxu3 %v4401_v8  ;;  %v4376_v39 = vld [vmem:[%s5139_s15 + $0x180] sm:$0xf]  ;;  %v4630_v40 = vld [vmem:[%s5139_s15 + $0x184] sm:$0xf0]  ;;  %v4455_v43 = vld [vmem:[#allocation5 + $0xc] sm:$0xf0]  ;;  %v4313_v45 = vor.u32 %v4614_v38, %v4312_v37  ;;  %p4911_p1 = scmp.ne.s32.totalorder %s4909_s12, %s4910_s19 }
  0x5a   : > { %1905 = vmatpush.bf16.msra.mxu0 %v4201_v14  ;;  %737 = vperm.xlu2 %4743, %v579_v24   ;;  %v3672_v42 = vld [vmem:[#allocation5] sm:$0xf]  ;;  %v4453_v46 = vld [vmem:[#allocation5 + $0x4] sm:$0xf]  ;;  %v3674_v47 = vld [vmem:[#allocation5 + $0x10] sm:$0xf0]  ;;  %v4377_v49 = vor.u32 %v4630_v40, %v4376_v39 }
  0x5b   : > { %2074 = vmatpush.bf16.msra.mxu1 %v4265_v15  ;;  %732 = vperm.xlu1 %4742, %v578_v27   ;;  %v3680_v48 = vld [vmem:[#allocation5 + $0x8] sm:$0xf]  ;;  %v4456_v50 = vld [vmem:[#allocation5 + $0x14] sm:$0xf0]  ;;  %v4454_v51 = vld [vmem:[#allocation5 + $0xc] sm:$0xf]  ;;  %v5262_v56 = vor.u32 %v4455_v43, %v3672_v42  ;;  %v5264_v57 = vor.u32 %v4453_v46, %v3674_v47  ;;  %p4912_p4 = pnand %p4911_p1, %p5105_p0 }
  0x5c   : > { %2243 = vmatpush.bf16.msra.mxu2 %v4329_v16  ;;  %717 = vperm.xlu0 %4741, %v575_v28   ;;  %v3682_v52 = vld [vmem:[#allocation5 + $0x18] sm:$0xf0]  ;;  %v586_v53 = vld [vmem:[%s6634_s2 + $0xf0] sm:$0xff]  ;;  %v5266_v58 = vor.u32 %v4456_v50, %v3680_v48  ;;  %v3688_v63 = vld [vmem:[#allocation5 + $0x20] sm:$0xf]  ;;  %s4914_s22 = scalar_lea.hbm %s6639_s7, 16 }
  0x5d   : > { %2412 = vmatpush.bf16.msra.mxu3 %v4393_v20  ;;  %v583_v54 = vld [vmem:[%s6634_s2 + $0xd8] sm:$0xff]  ;;  %v582_v55 = vld [vmem:[%s6634_s2 + $0xd0] sm:$0xff]  ;;  %v5268_v59 = vor.u32 %v4454_v51, %v3682_v52  ;;  %v4457_v1 = vld [vmem:[#allocation5 + $0x24] sm:$0xf]  ;;  %p4913_p8 = pneg %p4912_p4  ;;  %p4916_p7 = scmp.lt.s32.totalorder %s4914_s22, %s4910_s19 }
  0x5e   : > { %1906 = vmatpush.bf16.msra.mxu0 %v4193_v29  ;;  %v591_v60 = vld [vmem:[%s6634_s2 + $0x118] sm:$0xff]  ;;  %v590_v61 = vld [vmem:[%s6634_s2 + $0x110] sm:$0xff]  ;;  %v3696_v3 = vld [vmem:[#allocation5 + $0x28] sm:$0xf] }
  0x5f   : > { %2075 = vmatpush.bf16.msra.mxu1 %v4257_v30  ;;  %v587_v62 = vld [vmem:[%s6634_s2 + $0xf8] sm:$0xff]  ;;  %v4459_v0 = vld [vmem:[#allocation5 + $0x2c] sm:$0xf0]  ;;  %v3690_v2 = vld [vmem:[#allocation5 + $0x30] sm:$0xf0]  ;;  %p4917_p9 = por %p4916_p7, %p4915_p2 }
  0x60   : > { %2244 = vmatpush.bf16.msra.mxu2 %v4321_v31  ;;  %v4460_v4 = vld [vmem:[#allocation5 + $0x34] sm:$0xf0]  ;;  %v4458_v5 = vld [vmem:[#allocation5 + $0x2c] sm:$0xf]  ;;  %v3698_v6 = vld [vmem:[#allocation5 + $0x38] sm:$0xf0]  ;;  %v5292_v10 = vor.u32 %v4459_v0, %v3688_v63  ;;  %v5294_v11 = vor.u32 %v4457_v1, %v3690_v2 }
  0x61   : > { %2413 = vmatpush.bf16.msra.mxu3 %v4385_v35  ;;  %v598_v7 = vld [vmem:[%s6634_s2 + $0x150] sm:$0xff]  ;;  %v595_v8 = vld [vmem:[%s6634_s2 + $0x138] sm:$0xff]  ;;  %v5296_v12 = vor.u32 %v4460_v4, %v3696_v3  ;;  %v5298_v13 = vor.u32 %v4458_v5, %v3698_v6  ;;  %v3704_v17 = vld [vmem:[#allocation5 + $0x40] sm:$0xf]  ;;  %p4918_p10 = pnand %p4917_p9, %p4913_p8 }
  0x62   : > { %1907 = vmatpush.bf16.msra.mxu0 %v4185_v41  ;;  %772 = vperm.xlu2 %4743, %v586_v53   ;;  %v594_v9 = vld [vmem:[%s6634_s2 + $0x130] sm:$0xff]  ;;  %v603_v14 = vld [vmem:[%s6634_s2 + $0x178] sm:$0xff]  ;;  %v4461_v19 = vld [vmem:[#allocation5 + $0x44] sm:$0xf] }
  0x63   : > { %2076 = vmatpush.bf16.msra.mxu1 %v4249_v44  ;;  %757 = vperm.xlu1 %4742, %v583_v54   ;;  %6818 = vst [vmem:[#allocation16_spill] sm:$0xff] %v5298_v13  ;;  %v602_v15 = vld [vmem:[%s6634_s2 + $0x170] sm:$0xff]  ;;  %v599_v16 = vld [vmem:[%s6634_s2 + $0x158] sm:$0xff]  ;;  %v3712_v21 = vld [vmem:[#allocation5 + $0x48] sm:$0xf] }
  0x64   : > { %2245 = vmatpush.bf16.msra.mxu2 %v4313_v45  ;;  %752 = vperm.xlu0 %4741, %v582_v55   ;;  %v4463_v18 = vld [vmem:[#allocation5 + $0x4c] sm:$0xf0]  ;;  %v3706_v20 = vld [vmem:[#allocation5 + $0x50] sm:$0xf0]  ;;  %v4464_v22 = vld [vmem:[#allocation5 + $0x54] sm:$0xf0] }
  0x65   : > { %2414 = vmatpush.bf16.msra.mxu3 %v4377_v49  ;;  %1908 = vmatmul.bf16.vlgmr.msra.gmra.mxu0 %v5262_v56  ;;  %v4462_v23 = vld [vmem:[#allocation5 + $0x4c] sm:$0xf]  ;;  %v3714_v24 = vld [vmem:[#allocation5 + $0x58] sm:$0xf0]  ;;  %v610_v25 = vld [vmem:[%s6634_s2 + $0x1b0] sm:$0xff]  ;;  %v5322_v28 = vor.u32 %v4463_v18, %v3704_v17  ;;  %v5324_v29 = vor.u32 %v4461_v19, %v3706_v20  ;;  %v5326_v30 = vor.u32 %v4464_v22, %v3712_v21 }
  0x66   : > { %2077 = vmatmul.bf16.vlgmr.msra.gmra.mxu1 %v5264_v57  ;;  %v607_v26 = vld [vmem:[%s6634_s2 + $0x198] sm:$0xff]  ;;  %v606_v27 = vld [vmem:[%s6634_s2 + $0x190] sm:$0xff]  ;;  %v5328_v31 = vor.u32 %v4462_v23, %v3714_v24  ;;  %v3720_v35 = vld [vmem:[#allocation5 + $0x60] sm:$0xf] }
  0x67   : > { %2246 = vmatmul.bf16.vlgmr.msra.gmra.mxu2 %v5266_v58  ;;  %6819 = vst [vmem:[#allocation17_spill] sm:$0xff] %v5322_v28  ;;  %v615_v32 = vld [vmem:[%s6634_s2 + $0x1d8] sm:$0xff]  ;;  %v614_v33 = vld [vmem:[%s6634_s2 + $0x1d0] sm:$0xff]  ;;  %v4465_v37 = vld [vmem:[#allocation5 + $0x64] sm:$0xf] }
  0x68   : > { %2415 = vmatmul.bf16.vlgmr.msra.gmra.mxu3 %v5268_v59  ;;  %6820 = vst [vmem:[#allocation18_spill] sm:$0xff] %v5324_v29  ;;  %v611_v34 = vld [vmem:[%s6634_s2 + $0x1b8] sm:$0xff]  ;;  %v4467_v36 = vld [vmem:[#allocation5 + $0x6c] sm:$0xf0]  ;;  %v3722_v38 = vld [vmem:[#allocation5 + $0x70] sm:$0xf0] }
  0x69   : > { %6821 = vst [vmem:[#allocation19_spill] sm:$0xff] %v5326_v30  ;;  %v3728_v39 = vld [vmem:[#allocation5 + $0x68] sm:$0xf]  ;;  %v4468_v40 = vld [vmem:[#allocation5 + $0x74] sm:$0xf0]  ;;  %v556_v43 = vld [vmem:[%s6634_s2] sm:$0xff]  ;;  %v5352_v46 = vor.u32 %v4467_v36, %v3720_v35  ;;  %v5354_v47 = vor.u32 %v4465_v37, %v3722_v38 }
  0x6a   : > { %797 = vperm.xlu2 %4743, %v591_v60   ;;  %6822 = vst [vmem:[#allocation20_spill] sm:$0xff] %v5328_v31  ;;  %v4466_v41 = vld [vmem:[#allocation5 + $0x6c] sm:$0xf]  ;;  %v3730_v42 = vld [vmem:[#allocation5 + $0x78] sm:$0xf0]  ;;  %v618_v45 = vld [vmem:[%s6634_s2 + $0x1f0] sm:$0xff]  ;;  %v5356_v48 = vor.u32 %v4468_v40, %v3728_v39 }
  0x6b   : > { %792 = vperm.xlu1 %4742, %v590_v61   ;;  %v619_v44 = vld [vmem:[%s6634_s2 + $0x1f8] sm:$0xff]  ;;  %6823 = vst [vmem:[#allocation21_spill] sm:$0xff] %v5352_v46  ;;  %v5358_v49 = vor.u32 %v4466_v41, %v3730_v42  ;;  %v561_v50 = vld [vmem:[%s6634_s2 + $0x28] sm:$0xff]  ;;  %v560_v51 = vld [vmem:[%s6634_s2 + $0x20] sm:$0xff] }
  0x6c   : > { %777 = vperm.xlu0 %4741, %v587_v62   ;;  %6824 = vst [vmem:[#allocation22_spill] sm:$0xff] %v5354_v47  ;;  %v557_v52 = vld [vmem:[%s6634_s2 + $0x8] sm:$0xff]  ;;  %v3736_v54 = vld [vmem:[#allocation5 + $0x80] sm:$0xf]  ;;  %v4471_v55 = vld [vmem:[#allocation5 + $0x8c] sm:$0xf0] }
  0x6d   : > { %6825 = vst [vmem:[#allocation23_spill] sm:$0xff] %v5356_v48  ;;  %v4469_v60 = vld [vmem:[#allocation5 + $0x84] sm:$0xf]  ;;  %v3738_v61 = vld [vmem:[#allocation5 + $0x90] sm:$0xf0]  ;;  %v5375_v2 = vor.u32 %v4471_v55, %v3736_v54  ;;  %v565_v5 = vld [vmem:[%s6634_s2 + $0x48] sm:$0xff] }
  0x6e   : > { %6826 = vst [vmem:[#allocation24_spill] sm:$0xff] %v5358_v49  ;;  %v3744_v62 = vld [vmem:[#allocation5 + $0x88] sm:$0xf]  ;;  %v4472_v63 = vld [vmem:[#allocation5 + $0x94] sm:$0xf0]  ;;  %v5377_v3 = vor.u32 %v4469_v60, %v3738_v61  ;;  %v564_v4 = vld [vmem:[%s6634_s2 + $0x40] sm:$0xff] }
  0x6f   : > { %v4470_v0 = vld [vmem:[#allocation5 + $0x8c] sm:$0xf]  ;;  %v3746_v1 = vld [vmem:[#allocation5 + $0x98] sm:$0xf0]  ;;  %6827 = vst [vmem:[#allocation25_spill] sm:$0xff] %v5375_v2  ;;  %v5385_v6 = vor.u32 %v4472_v63, %v3744_v62  ;;  %v568_v61 = vld [vmem:[%s6634_s2 + $0x60] sm:$0xff] }
  0x70   : > { %6828 = vst [vmem:[#allocation26_spill] sm:$0xff] %v5377_v3  ;;  %v3754_v17 = vld [vmem:[#allocation5 + $0xb0] sm:$0xf0]  ;;  %v3760_v18 = vld [vmem:[#allocation5 + $0xa8] sm:$0xf] }
  0x71   : > { %6829 = vst [vmem:[#allocation27_spill] sm:$0xff] %v5385_v6  ;;  %v4476_v19 = vld [vmem:[#allocation5 + $0xb4] sm:$0xf0]  ;;  %v4474_v20 = vld [vmem:[#allocation5 + $0xac] sm:$0xf] }
  0x72   : > { %832 = vperm.xlu2 %4743, %v598_v7   ;;  %v5387_v7 = vor.u32 %v4470_v0, %v3746_v1  ;;  %v3762_v21 = vld [vmem:[#allocation5 + $0xb8] sm:$0xf0]  ;;  %v5401_v24 = vor.u32 %v4476_v19, %v3760_v18  ;;  %v3768_v35 = vld [vmem:[#allocation5 + $0xc0] sm:$0xf]  ;;  %v4479_v36 = vld [vmem:[#allocation5 + $0xcc] sm:$0xf0] }
  0x73   : > { %817 = vperm.xlu1 %4742, %v595_v8   ;;  %v4477_v39 = vld [vmem:[#allocation5 + $0xc4] sm:$0xf]  ;;  %v3770_v40 = vld [vmem:[#allocation5 + $0xd0] sm:$0xf0]  ;;  %v3776_v41 = vld [vmem:[#allocation5 + $0xc8] sm:$0xf] }
  0x74   : > { %812 = vperm.xlu0 %4741, %v594_v9   ;;  %6830 = vst [vmem:[#allocation28_spill] sm:$0xff] %v5387_v7  ;;  %v4480_v42 = vld [vmem:[#allocation5 + $0xd4] sm:$0xf0]  ;;  %v3784_v63 = vld [vmem:[#allocation5 + $0xe0] sm:$0xf] }
  0x75   : > { %1913 = vmatmul.bf16.gmra.mxu0 %v5292_v10  ;;  %6834 = vst [vmem:[#allocation32_spill] sm:$0xff] %v5401_v24  ;;  %v4483_v0 = vld [vmem:[#allocation5 + $0xec] sm:$0xf0]  ;;  %v3794_v18 = vld [vmem:[#allocation5 + $0xf8] sm:$0xf0] }
  0x76   : > { %2082 = vmatmul.bf16.gmra.mxu1 %v5294_v11  ;;  %v5451_v19 = vor.u32 %v4483_v0, %v3784_v63  ;;  %v4485_v63 = vld [vmem:[#allocation5 + $0x104] sm:$0xf]  ;;  %v3802_v0 = vld [vmem:[#allocation5 + $0x110] sm:$0xf0] }
  0x77   : > { %2251 = vmatmul.bf16.gmra.mxu2 %v5296_v12 }
  0x78   : > { %2420 = vmatmul.bf16.gmra.mxu3 %v5298_v13  ;;  %6849 = vst [vmem:[#allocation47_spill] sm:$0xff] %v5451_v19 }
  0x7a   : > { %857 = vperm.xlu2 %4743, %v603_v14   ;;  %v3752_v14 = vld [vmem:[#allocation5 + $0xa0] sm:$0xf] }
  0x7b   : > { %852 = vperm.xlu1 %4742, %v602_v15   ;;  %v4475_v15 = vld [vmem:[#allocation5 + $0xac] sm:$0xf0] }
  0x7c   : > { %837 = vperm.xlu0 %4741, %v599_v16   ;;  %v4473_v16 = vld [vmem:[#allocation5 + $0xa4] sm:$0xf]  ;;  %v5397_v22 = vor.u32 %v4475_v15, %v3752_v14  ;;  %v3786_v14 = vld [vmem:[#allocation5 + $0xf0] sm:$0xf0]  ;;  %v3792_v15 = vld [vmem:[#allocation5 + $0xe8] sm:$0xf] }
  0x7d   : > { %v5399_v23 = vor.u32 %v4473_v16, %v3754_v17  ;;  %v4484_v16 = vld [vmem:[#allocation5 + $0xf4] sm:$0xf0]  ;;  %v4482_v17 = vld [vmem:[#allocation5 + $0xec] sm:$0xf] }
  0x7e   : > { %6832 = vst [vmem:[#allocation30_spill] sm:$0xff] %v5397_v22 }
  0x7f   : > { %6833 = vst [vmem:[#allocation31_spill] sm:$0xff] %v5399_v23 }
  0x82   : > { %892 = vperm.xlu2 %4743, %v610_v25   ;;  %v5403_v25 = vor.u32 %v4474_v20, %v3762_v21  ;;  %v5455_v21 = vor.u32 %v4484_v16, %v3792_v15  ;;  %v4486_v15 = vld [vmem:[#allocation5 + $0x10c] sm:$0xf]  ;;  %v3810_v16 = vld [vmem:[#allocation5 + $0x118] sm:$0xf0] }
  0x83   : > { %877 = vperm.xlu1 %4742, %v607_v26  }
  0x84   : > { %872 = vperm.xlu0 %4741, %v606_v27   ;;  %6835 = vst [vmem:[#allocation33_spill] sm:$0xff] %v5403_v25 }
  0x85   : > { %1918 = vmatmul.bf16.gmra.mxu0 %v5322_v28  ;;  %6851 = vst [vmem:[#allocation49_spill] sm:$0xff] %v5455_v21 }
  0x86   : > { %2087 = vmatmul.bf16.gmra.mxu1 %v5324_v29 }
  0x87   : > { %2256 = vmatmul.bf16.gmra.mxu2 %v5326_v30 }
  0x88   : > { %2425 = vmatmul.bf16.gmra.mxu3 %v5328_v31 }
  0x8a   : > { %917 = vperm.xlu2 %4743, %v615_v32  }
  0x8b   : > { %912 = vperm.xlu1 %4742, %v614_v33   ;;  %v569_v33 = vld [vmem:[%s6634_s2 + $0x68] sm:$0xff] }
  0x8c   : > { %897 = vperm.xlu0 %4741, %v611_v34  }
  0x92   : > { %622 = vperm.xlu2 %4743, %v556_v43   ;;  %v4478_v43 = vld [vmem:[#allocation5 + $0xcc] sm:$0xf] }
  0x93   : > { %937 = vperm.xlu1 %4742, %v619_v44   ;;  %v3778_v44 = vld [vmem:[#allocation5 + $0xd8] sm:$0xf0] }
  0x94   : > { %932 = vperm.xlu0 %4741, %v618_v45   ;;  %v5424_v45 = vor.u32 %v4479_v36, %v3768_v35  ;;  %v572_v35 = vld [vmem:[%s6634_s2 + $0x80] sm:$0xff] }
  0x95   : > { %1923 = vmatmul.bf16.gmra.mxu0 %v5352_v46  ;;  %v4498_v46 = vld [vmem:[#allocation5 + $0x16c] sm:$0xf] }
  0x96   : > { %2092 = vmatmul.bf16.gmra.mxu1 %v5354_v47  ;;  %6841 = vst [vmem:[#allocation39_spill] sm:$0xff] %v5424_v45 }
  0x97   : > { %2261 = vmatmul.bf16.gmra.mxu2 %v5356_v48 }
  0x98   : > { %2430 = vmatmul.bf16.gmra.mxu3 %v5358_v49 }
  0x9a   : > { %647 = vperm.xlu2 %4743, %v561_v50   ;;  %v5426_v50 = vor.u32 %v4477_v39, %v3770_v40 }
  0x9b   : > { %642 = vperm.xlu1 %4742, %v560_v51   ;;  %v5428_v51 = vor.u32 %v4480_v42, %v3776_v41  ;;  %v3800_v42 = vld [vmem:[#allocation5 + $0x100] sm:$0xf] }
  0x9c   : > { %627 = vperm.xlu0 %4741, %v557_v52   ;;  %v5373_v53 = vpop.permute.xlu2 %672  ;;  %6842 = vst [vmem:[#allocation40_spill] sm:$0xff] %v5426_v50  ;;  %v5430_v52 = vor.u32 %v4478_v43, %v3778_v44  ;;  %v4487_v43 = vld [vmem:[#allocation5 + $0x10c] sm:$0xf0] }
  0x9d   : > { %6843 = vst [vmem:[#allocation41_spill] sm:$0xff] %v5428_v51 }
  0x9e   : > { %6844 = vst [vmem:[#allocation42_spill] sm:$0xff] %v5430_v52 }
  0xa2   : > { %682 = vperm.xlu2 %4743, %v568_v61  }
  0xa3   : > { %667 = vperm.xlu1 %4742, %v565_v5   ;;  %v4481_v5 = vld [vmem:[#allocation5 + $0xe4] sm:$0xf] }
  0xa4   : > { %662 = vperm.xlu0 %4741, %v564_v4   ;;  %v5391_v8 = vpop.permute.xlu2 %677  ;;  %v5453_v20 = vor.u32 %v4481_v5, %v3786_v14  ;;  %v3808_v5 = vld [vmem:[#allocation5 + $0x108] sm:$0xf]  ;;  %v4488_v14 = vld [vmem:[#allocation5 + $0x114] sm:$0xf0] }
  0xa5   : > { %1928 = vmatmul.bf16.gmra.mxu0 %v5375_v2  ;;  %6831 = vst [vmem:[#allocation29_spill] sm:$0xff] %v5391_v8 }
  0xa6   : > { %2097 = vmatmul.bf16.gmra.mxu1 %v5377_v3  ;;  %6850 = vst [vmem:[#allocation48_spill] sm:$0xff] %v5453_v20 }
  0xa7   : > { %2266 = vmatmul.bf16.gmra.mxu2 %v5385_v6 }
  0xa8   : > { %2435 = vmatmul.bf16.gmra.mxu3 %v5387_v7 }
  0xab   : > { %702 = vperm.xlu1 %4742, %v572_v35  }
  0xac   : > { %v5395_v9 = vpop.permute.xlu2 %712  ;;  %687 = vperm.xlu0 %4741, %v569_v33   ;;  %v5457_v33 = vor.u32 %v4482_v17, %v3794_v18  ;;  %v5478_v17 = vor.u32 %v4487_v43, %v3800_v42  ;;  %v5480_v18 = vor.u32 %v4485_v63, %v3802_v0 }
  0xae   : > { %6852 = vst [vmem:[#allocation50_spill] sm:$0xff] %v5457_v33 }
  0xaf   : > { %6858 = vst [vmem:[#allocation56_spill] sm:$0xff] %v5478_v17 }
  0xb0   : > { %6859 = vst [vmem:[#allocation57_spill] sm:$0xff] %v5480_v18 }
  0xb4   : > { %v5409_v27 = vpop.permute.xlu2 %737 }
  0xb5   : > { %v5405_v26 = vpop.permute.xlu1 %652  ;;  %1933 = vmatmul.bf16.gmra.mxu0 %v5397_v22  ;;  %6836 = vst [vmem:[#allocation34_spill] sm:$0xff] %v5409_v27  ;;  %v5411_v32 = vpop.permute.xlu0 %632 }
  0xb6   : > { %2102 = vmatmul.bf16.gmra.mxu1 %v5399_v23  ;;  %6837 = vst [vmem:[#allocation35_spill] sm:$0xff] %v5411_v32  ;;  %v573_v23 = vld [vmem:[%s6634_s2 + $0x88] sm:$0xff] }
  0xb7   : > { %2271 = vmatmul.bf16.gmra.mxu2 %v5401_v24  ;;  %707 = vperm.xlu2 %4743, %v573_v23  }
  0xb8   : > { %2440 = vmatmul.bf16.gmra.mxu3 %v5403_v25  ;;  %v3826_v25 = vld [vmem:[#allocation5 + $0x138] sm:$0xf0] }
  0xbc   : > { %v5418_v34 = vpop.permute.xlu2 %772 }
  0xbd   : > { %6838 = vst [vmem:[#allocation36_spill] sm:$0xff] %v5418_v34  ;;  %v5420_v37 = vpop.permute.xlu1 %657 }
  0xbe   : > { %6839 = vst [vmem:[#allocation37_spill] sm:$0xff] %v5420_v37  ;;  %v5422_v38 = vpop.permute.xlu0 %637 }
  0xbf   : > { %6840 = vst [vmem:[#allocation38_spill] sm:$0xff] %v5422_v38 }
  0xc4   : > { %v5434_v54 = vpop.permute.xlu2 %797 }
  0xc5   : > { %1938 = vmatmul.bf16.gmra.mxu0 %v5424_v45  ;;  %6845 = vst [vmem:[#allocation43_spill] sm:$0xff] %v5434_v54  ;;  %v5438_v55 = vpop.permute.xlu1 %697  ;;  %v4490_v45 = vld [vmem:[#allocation5 + $0x12c] sm:$0xf] }
  0xc6   : > { %2107 = vmatmul.bf16.gmra.mxu1 %v5426_v50  ;;  %6846 = vst [vmem:[#allocation44_spill] sm:$0xff] %v5438_v55  ;;  %v5440_v60 = vpop.permute.xlu0 %692  ;;  %v4492_v50 = vld [vmem:[#allocation5 + $0x134] sm:$0xf0]  ;;  %v5520_v48 = vor.u32 %v4490_v45, %v3826_v25  ;;  %v577_v25 = vld [vmem:[%s6634_s2 + $0xa8] sm:$0xff] }
  0xc7   : > { %2276 = vmatmul.bf16.gmra.mxu2 %v5428_v51  ;;  %v3824_v51 = vld [vmem:[#allocation5 + $0x128] sm:$0xf]  ;;  %727 = vperm.xlu1 %4742, %v577_v25   ;;  %v4496_v25 = vld [vmem:[#allocation5 + $0x154] sm:$0xf0] }
  0xc8   : > { %2445 = vmatmul.bf16.gmra.mxu3 %v5430_v52  ;;  %v3818_v52 = vld [vmem:[#allocation5 + $0x130] sm:$0xf0]  ;;  %v5518_v49 = vor.u32 %v4492_v50, %v3824_v51  ;;  %6871 = vst [vmem:[#allocation69_spill] sm:$0xff] %v5520_v48 }
  0xca   : > { %6870 = vst [vmem:[#allocation68_spill] sm:$0xff] %v5518_v49 }
  0xcc   : > { %v5445_v62 = vpop.permute.xlu2 %832 }
  0xcd   : > { %6847 = vst [vmem:[#allocation45_spill] sm:$0xff] %v5445_v62  ;;  %v5447_v1 = vpop.permute.xlu1 %732 }
  0xce   : > { %v5449_v4 = vpop.permute.xlu0 %717 }
  0xcf   : > { %6848 = vst [vmem:[#allocation46_spill] sm:$0xff] %v5449_v4 }
  0xd4   : > { %v5464_v36 = vpop.permute.xlu2 %857 }
  0xd5   : > { %1943 = vmatmul.bf16.gmra.mxu0 %v5451_v19  ;;  %6853 = vst [vmem:[#allocation51_spill] sm:$0xff] %v5464_v36  ;;  %v5468_v39 = vpop.permute.xlu1 %757 }
  0xd6   : > { %2112 = vmatmul.bf16.gmra.mxu1 %v5453_v20  ;;  %6854 = vst [vmem:[#allocation52_spill] sm:$0xff] %v5468_v39  ;;  %v5470_v40 = vpop.permute.xlu0 %752  ;;  %v5484_v20 = vor.u32 %v4486_v15, %v3810_v16  ;;  %v3816_v16 = vld [vmem:[#allocation5 + $0x120] sm:$0xf] }
  0xd7   : > { %2281 = vmatmul.bf16.gmra.mxu2 %v5455_v21  ;;  %v5482_v21 = vor.u32 %v4488_v14, %v3808_v5 }
  0xd8   : > { %2450 = vmatmul.bf16.gmra.mxu3 %v5457_v33  ;;  %6861 = vst [vmem:[#allocation59_spill] sm:$0xff] %v5484_v20 }
  0xd9   : > { %6860 = vst [vmem:[#allocation58_spill] sm:$0xff] %v5482_v21 }
  0xdc   : > { %v5472_v41 = vpop.permute.xlu2 %892 }
  0xdd   : > { %6855 = vst [vmem:[#allocation53_spill] sm:$0xff] %v5472_v41  ;;  %v5474_v44 = vpop.permute.xlu1 %792  ;;  %v3858_v41 = vld [vmem:[#allocation5 + $0x178] sm:$0xf0] }
  0xde   : > { %6856 = vst [vmem:[#allocation54_spill] sm:$0xff] %v5474_v44  ;;  %v5476_v61 = vpop.permute.xlu0 %777 }
  0xdf   : > { %6857 = vst [vmem:[#allocation55_spill] sm:$0xff] %v5476_v61 }
  0xe2   : > { %v1909_v35 = vpop.f32.mrf.mxu0 }
  0xe3   : > { %v2078_v33 = vpop.f32.mrf.mxu1 }
  0xe4   : > { %v5488_v19 = vpop.permute.xlu2 %917 }
  0xe5   : > { %1948 = vmatmul.bf16.gmra.mxu0 %v5478_v17  ;;  %6862 = vst [vmem:[#allocation60_spill] sm:$0xff] %v5488_v19  ;;  %v5492_v42 = vpop.permute.xlu1 %817 }
  0xe6   : > { %2117 = vmatmul.bf16.gmra.mxu1 %v5480_v18  ;;  %6863 = vst [vmem:[#allocation61_spill] sm:$0xff] %v5492_v42  ;;  %v5494_v43 = vpop.permute.xlu0 %812  ;;  %v4491_v18 = vld [vmem:[#allocation5 + $0x12c] sm:$0xf0] }
  0xe7   : > { %2286 = vmatmul.bf16.gmra.mxu2 %v5482_v21  ;;  %6864 = vst [vmem:[#allocation62_spill] sm:$0xff] %v5494_v43  ;;  %v4489_v21 = vld [vmem:[#allocation5 + $0x124] sm:$0xf]  ;;  %v5514_v6 = vor.u32 %v4491_v18, %v3816_v16  ;;  %v4495_v16 = vld [vmem:[#allocation5 + $0x14c] sm:$0xf0] }
  0xe8   : > { %2455 = vmatmul.bf16.gmra.mxu3 %v5484_v20  ;;  %v5516_v3 = vor.u32 %v4489_v21, %v3818_v52 }
  0xe9   : > { %6868 = vst [vmem:[#allocation66_spill] sm:$0xff] %v5514_v6 }
  0xea   : > { %v2247_v63 = vpop.f32.mrf.mxu2  ;;  %v5496_v5 = vpop.f32.mrf.mxu0  ;;  %6869 = vst [vmem:[#allocation67_spill] sm:$0xff] %v5516_v3 }
  0xeb   : > { %v2416_v0 = vpop.f32.mrf.mxu3  ;;  %v5498_v14 = vpop.f32.mrf.mxu1 }
  0xec   : > { %v5500_v15 = vpop.permute.xlu2 %622 }
  0xed   : > { %6865 = vst [vmem:[#allocation63_spill] sm:$0xff] %v5500_v15  ;;  %v5502_v17 = vpop.permute.xlu1 %852  ;;  %v1910_v20 = vadd.f32 %v1909_v35, %v5500_v15 }
  0xee   : > { %6866 = vst [vmem:[#allocation64_spill] sm:$0xff] %v5502_v17  ;;  %v5504_v19 = vpop.permute.xlu0 %837 }
  0xef   : > { %6867 = vst [vmem:[#allocation65_spill] sm:$0xff] %v5504_v19  ;;  %v2079_v24 = vadd.f32 %v2078_v33, %v1910_v20  ;;  %v576_v20 = vld [vmem:[%s6634_s2 + $0xa0] sm:$0xff] }
  0xf0   : > { %722 = vperm.xlu0 %4741, %v576_v20  }
  0xf1   : > { %v2248_v35 = vadd.f32 %v2247_v63, %v2079_v24 }
  0xf2   : > { %v5510_v22 = vpop.f32.mrf.mxu2  ;;  %v1914_v15 = vpop.f32.mrf.mxu0 }
  0xf3   : > { %v5512_v7 = vpop.f32.mrf.mxu3  ;;  %v2083_v2 = vpop.f32.mrf.mxu1  ;;  %v1915_v33 = vadd.f32 %v1914_v15, %v5411_v32  ;;  %v5526_v47 = vadd.f32 %v2416_v0, %v2248_v35  ;;  %v3832_v15 = vld [vmem:[#allocation5 + $0x140] sm:$0xf] }
  0xf4   : > { %v5546_v32 = vor.u32 %v4495_v16, %v3832_v15 }
  0xf5   : > { %v2084_v18 = vadd.f32 %v2083_v2, %v1915_v33  ;;  %1953 = vmatmul.bf16.gmra.mxu0 %v5514_v6  ;;  %v5532_v23 = vpop.permute.xlu1 %877  ;;  %v4493_v33 = vld [vmem:[#allocation5 + $0x144] sm:$0xf]  ;;  %v3842_v6 = vld [vmem:[#allocation5 + $0x158] sm:$0xf0] }
  0xf6   : > { %2122 = vmatmul.bf16.gmra.mxu1 %v5516_v3  ;;  %6872 = vst [vmem:[#allocation70_spill] sm:$0xff] %v5532_v23  ;;  %v5534_v24 = vpop.permute.xlu0 %872  ;;  %v4494_v3 = vld [vmem:[#allocation5 + $0x14c] sm:$0xf] }
  0xf7   : > { %2291 = vmatmul.bf16.gmra.mxu2 %v5518_v49  ;;  %6873 = vst [vmem:[#allocation71_spill] sm:$0xff] %v5534_v24  ;;  %v3840_v49 = vld [vmem:[#allocation5 + $0x148] sm:$0xf] }
  0xf8   : > { %2460 = vmatmul.bf16.gmra.mxu3 %v5520_v48  ;;  %v3834_v48 = vld [vmem:[#allocation5 + $0x150] sm:$0xf0]  ;;  %6876 = vst [vmem:[#allocation74_spill] sm:$0xff] %v5546_v32 }
  0xfa   : > { %v2252_v45 = vpop.f32.mrf.mxu2  ;;  %v1916_v51 = vpop.f32.mrf.mxu0 }
  0xfb   : > { %v2421_v50 = vpop.f32.mrf.mxu3  ;;  %v2253_v2 = vadd.f32 %v2252_v45, %v2084_v18  ;;  %v2085_v52 = vpop.f32.mrf.mxu1  ;;  %v1917_v21 = vadd.f32 %v1916_v51, %v5422_v38  ;;  %v5548_v51 = vor.u32 %v4493_v33, %v3834_v48  ;;  %v5552_v38 = vor.u32 %v4494_v3, %v3842_v6 }
  0xfd   : > { %v5540_v63 = vadd.f32 %v2421_v50, %v2253_v2  ;;  %v2086_v0 = vadd.f32 %v2085_v52, %v1917_v21  ;;  %v5542_v35 = vpop.permute.xlu1 %912  ;;  %6877 = vst [vmem:[#allocation75_spill] sm:$0xff] %v5548_v51  ;;  %v5550_v21 = vor.u32 %v4496_v25, %v3840_v49 }
  0xfe   : > { %6874 = vst [vmem:[#allocation72_spill] sm:$0xff] %v5542_v35  ;;  %v5544_v20 = vpop.permute.xlu0 %897 }
  0xff   : > { %6875 = vst [vmem:[#allocation73_spill] sm:$0xff] %v5544_v20  ;;  %v4500_v20 = vld [vmem:[#allocation5 + $0x174] sm:$0xf0] }
 0x100   : > { %6878 = vst [vmem:[#allocation76_spill] sm:$0xff] %v5550_v21 }
 0x101   : > { %6879 = vst [vmem:[#allocation77_spill] sm:$0xff] %v5552_v38 }
 0x102   : > { %v2254_v18 = vpop.f32.mrf.mxu2  ;;  %v1919_v2 = vpop.f32.mrf.mxu0 }
 0x103   : > { %v2423_v45 = vpop.f32.mrf.mxu3  ;;  %v2255_v50 = vadd.f32 %v2254_v18, %v2086_v0  ;;  %v2088_v52 = vpop.f32.mrf.mxu1  ;;  %v3848_v18 = vld [vmem:[#allocation5 + $0x160] sm:$0xf] }
 0x104   : > { %v5564_v0 = vpop.permute.xlu2 %647 }
 0x105   : > { %v5554_v35 = vadd.f32 %v2423_v45, %v2255_v50  ;;  %1958 = vmatmul.bf16.gmra.mxu0 %v5546_v32  ;;  %v5560_v15 = vpop.permute.xlu1 %937  ;;  %6882 = vst [vmem:[#allocation80_spill] sm:$0xff] %v5564_v0  ;;  %v4499_v45 = vld [vmem:[#allocation5 + $0x16c] sm:$0xf0]  ;;  %v3856_v32 = vld [vmem:[#allocation5 + $0x168] sm:$0xf] }
 0x106   : > { %2127 = vmatmul.bf16.gmra.mxu1 %v5548_v51  ;;  %6880 = vst [vmem:[#allocation78_spill] sm:$0xff] %v5560_v15  ;;  %v5562_v48 = vpop.permute.xlu0 %932  ;;  %v3850_v51 = vld [vmem:[#allocation5 + $0x170] sm:$0xf0]  ;;  %v5579_v13 = vor.u32 %v4500_v20, %v3856_v32 }
 0x107   : > { %2296 = vmatmul.bf16.gmra.mxu2 %v5550_v21  ;;  %6881 = vst [vmem:[#allocation79_spill] sm:$0xff] %v5562_v48 }
 0x108   : > { %2465 = vmatmul.bf16.gmra.mxu3 %v5552_v38  ;;  %v4497_v38 = vld [vmem:[#allocation5 + $0x164] sm:$0xf] }
 0x109   : > { %v5577_v30 = vor.u32 %v4497_v38, %v3850_v51 }
 0x10a   : > { %v2257_v49 = vpop.f32.mrf.mxu2  ;;  %v1921_v3 = vpop.f32.mrf.mxu0 }
 0x10b   : > { %v2426_v16 = vpop.f32.mrf.mxu3  ;;  %v2090_v6 = vpop.f32.mrf.mxu1  ;;  %v1922_v33 = vadd.f32 %v1921_v3, %v5564_v0  ;;  %v5575_v0 = vor.u32 %v4499_v45, %v3848_v18  ;;  %v3866_v18 = vld [vmem:[#allocation5 + $0x190] sm:$0xf0]  ;;  %v4504_v45 = vld [vmem:[#allocation5 + $0x194] sm:$0xf0] }
 0x10d   : > { %v2091_v25 = vadd.f32 %v2090_v6, %v1922_v33  ;;  %v5567_v50 = vpop.permute.xlu1 %642 }
 0x10e   : > { %6883 = vst [vmem:[#allocation81_spill] sm:$0xff] %v5567_v50  ;;  %v5569_v21 = vpop.permute.xlu0 %627  ;;  %v1920_v15 = vadd.f32 %v1919_v2, %v5567_v50  ;;  %v5581_v2 = vor.u32 %v4498_v46, %v3858_v41  ;;  %v581_v46 = vld [vmem:[%s6634_s2 + $0xc8] sm:$0xff] }
 0x10f   : > { %v1912_v48 = vadd.f32 %v5496_v5, %v5569_v21  ;;  %747 = vperm.xlu0 %4741, %v581_v46  }
 0x110   : > { %v2089_v31 = vadd.f32 %v2088_v52, %v1920_v15 }
 0x111   : > { %v2081_v3 = vadd.f32 %v5498_v14, %v1912_v48  ;;  %v3864_v48 = vld [vmem:[#allocation5 + $0x180] sm:$0xf] }
 0x112   : > { %v2259_v6 = vpop.f32.mrf.mxu2  ;;  %v1924_v28 = vpop.f32.mrf.mxu0  ;;  %v2258_v5 = vadd.f32 %v2257_v49, %v2089_v31  ;;  %v4503_v49 = vld [vmem:[#allocation5 + $0x18c] sm:$0xf0] }
 0x113   : > { %v2428_v33 = vpop.f32.mrf.mxu3  ;;  %v2260_v29 = vadd.f32 %v2259_v6, %v2091_v25  ;;  %v2093_v23 = vpop.f32.mrf.mxu1  ;;  %v2250_v50 = vadd.f32 %v5510_v22, %v2081_v3  ;;  %v1925_v52 = vadd.f32 %v1924_v28, %v5405_v26  ;;  %v3874_v3 = vld [vmem:[#allocation5 + $0x198] sm:$0xf0] }
 0x114   : > { %v5597_v22 = vadd.f32 %v2426_v16, %v2258_v5  ;;  %v3872_v16 = vld [vmem:[#allocation5 + $0x188] sm:$0xf] }
 0x115   : > { %v5585_v15 = vadd.f32 %v2428_v33, %v2260_v29  ;;  %v2094_v14 = vadd.f32 %v2093_v23, %v1925_v52  ;;  %1963 = vmatmul.bf16.gmra.mxu0 %v5575_v0  ;;  %v5595_v31 = vadd.f32 %v5512_v7, %v2250_v50  ;;  %v4501_v7 = vld [vmem:[#allocation5 + $0x184] sm:$0xf]  ;;  %v4502_v50 = vld [vmem:[#allocation5 + $0x18c] sm:$0xf]  ;;  %v5606_v52 = vor.u32 %v4503_v49, %v3864_v48  ;;  %v3888_v48 = vld [vmem:[#allocation5 + $0x1a8] sm:$0xf] }
 0x116   : > { %2132 = vmatmul.bf16.gmra.mxu1 %v5577_v30  ;;  %v5604_v6 = vpop.permute.xlu0 %662 }
 0x117   : > { %2301 = vmatmul.bf16.gmra.mxu2 %v5579_v13  ;;  %6884 = vst [vmem:[#allocation82_spill] sm:$0xff] %v5604_v6 }
 0x118   : > { %2470 = vmatmul.bf16.gmra.mxu3 %v5581_v2  ;;  %6885 = vst [vmem:[#allocation83_spill] sm:$0xff] %v5606_v52 }
 0x11a   : > { %v2262_v28 = vpop.f32.mrf.mxu2  ;;  %v1926_v38 = vpop.f32.mrf.mxu0 }
 0x11b   : > { %v2431_v29 = vpop.f32.mrf.mxu3  ;;  %v2263_v32 = vadd.f32 %v2262_v28, %v2094_v14  ;;  %v2095_v41 = vpop.f32.mrf.mxu1  ;;  %v1927_v23 = vadd.f32 %v1926_v38, %v5420_v37  ;;  %v5608_v14 = vor.u32 %v4501_v7, %v3866_v18  ;;  %v5612_v38 = vor.u32 %v4502_v50, %v3874_v3  ;;  %v580_v50 = vld [vmem:[%s6634_s2 + $0xc0] sm:$0xff] }
 0x11c   : > { %742 = vperm.xlu2 %4743, %v580_v50  }
 0x11d   : > { %v5600_v20 = vadd.f32 %v2431_v29, %v2263_v32  ;;  %v2096_v51 = vadd.f32 %v2095_v41, %v1927_v23  ;;  %6886 = vst [vmem:[#allocation84_spill] sm:$0xff] %v5608_v14  ;;  %v5610_v32 = vor.u32 %v4504_v45, %v3872_v16 }
 0x11e   : > { %6888 = vst [vmem:[#allocation86_spill] sm:$0xff] %v5612_v38 }
 0x11f   : > { %6887 = vst [vmem:[#allocation85_spill] sm:$0xff] %v5610_v32 }
 0x122   : > { %v2264_v33 = vpop.f32.mrf.mxu2  ;;  %v1929_v28 = vpop.f32.mrf.mxu0 }
 0x123   : > { %v2433_v5 = vpop.f32.mrf.mxu3  ;;  %v2265_v46 = vadd.f32 %v2264_v33, %v2096_v51  ;;  %v2098_v29 = vpop.f32.mrf.mxu1  ;;  %v1930_v41 = vadd.f32 %v1929_v28, %v5604_v6  ;;  %v4507_v28 = vld [vmem:[#allocation5 + $0x1ac] sm:$0xf0] }
 0x124   : > { %v5623_v51 = vpop.permute.xlu1 %667 }
 0x125   : > { %v5615_v23 = vadd.f32 %v2433_v5, %v2265_v46  ;;  %1968 = vmatmul.bf16.gmra.mxu0 %v5606_v52  ;;  %v2099_v25 = vadd.f32 %v2098_v29, %v1930_v41  ;;  %6889 = vst [vmem:[#allocation87_spill] sm:$0xff] %v5623_v51  ;;  %v3880_v46 = vld [vmem:[#allocation5 + $0x1a0] sm:$0xf]  ;;  %v4505_v29 = vld [vmem:[#allocation5 + $0x1a4] sm:$0xf] }
 0x126   : > { %2137 = vmatmul.bf16.gmra.mxu1 %v5608_v14  ;;  %v3882_v41 = vld [vmem:[#allocation5 + $0x1b0] sm:$0xf0]  ;;  %v5631_v52 = vor.u32 %v4507_v28, %v3880_v46 }
 0x127   : > { %2306 = vmatmul.bf16.gmra.mxu2 %v5610_v32  ;;  %v4506_v32 = vld [vmem:[#allocation5 + $0x1ac] sm:$0xf]  ;;  %v5633_v6 = vor.u32 %v4505_v29, %v3882_v41 }
 0x128   : > { %2475 = vmatmul.bf16.gmra.mxu3 %v5612_v38  ;;  %v4508_v38 = vld [vmem:[#allocation5 + $0x1b4] sm:$0xf0]  ;;  %6890 = vst [vmem:[#allocation88_spill] sm:$0xff] %v5631_v52 }
 0x129   : > { %6891 = vst [vmem:[#allocation89_spill] sm:$0xff] %v5633_v6 }
 0x12a   : > { %v2267_v49 = vpop.f32.mrf.mxu2  ;;  %v1931_v16 = vpop.f32.mrf.mxu0 }
 0x12b   : > { %v2436_v7 = vpop.f32.mrf.mxu3  ;;  %v2268_v18 = vadd.f32 %v2267_v49, %v2099_v25  ;;  %v2100_v45 = vpop.f32.mrf.mxu1  ;;  %v1932_v3 = vadd.f32 %v1931_v16, %v5623_v51  ;;  %v3890_v25 = vld [vmem:[#allocation5 + $0x1b8] sm:$0xf0] }
 0x12d   : > { %v5629_v33 = vadd.f32 %v2436_v7, %v2268_v18  ;;  %v2101_v5 = vadd.f32 %v2100_v45, %v1932_v3  ;;  %v5635_v7 = vor.u32 %v4508_v38, %v3888_v48  ;;  %v5637_v18 = vor.u32 %v4506_v32, %v3890_v25  ;;  %v584_v45 = vld [vmem:[%s6634_s2 + $0xe0] sm:$0xff]  ;;  %v3904_v38 = vld [vmem:[#allocation5 + $0x1c8] sm:$0xf] }
 0x12e   : > { %762 = vperm.xlu1 %4742, %v584_v45   ;;  %v3896_v25 = vld [vmem:[#allocation5 + $0x1c0] sm:$0xf]  ;;  %v4509_v45 = vld [vmem:[#allocation5 + $0x1c4] sm:$0xf] }
 0x12f   : > { %6892 = vst [vmem:[#allocation90_spill] sm:$0xff] %v5635_v7 }
 0x130   : > { %6893 = vst [vmem:[#allocation91_spill] sm:$0xff] %v5637_v18 }
 0x132   : > { %v2269_v49 = vpop.f32.mrf.mxu2  ;;  %v1934_v16 = vpop.f32.mrf.mxu0 }
 0x133   : > { %v2438_v14 = vpop.f32.mrf.mxu3  ;;  %v2270_v37 = vadd.f32 %v2269_v49, %v2101_v5  ;;  %v2103_v50 = vpop.f32.mrf.mxu1  ;;  %v1935_v3 = vadd.f32 %v1934_v16, %v5373_v53  ;;  %v4511_v49 = vld [vmem:[#allocation5 + $0x1cc] sm:$0xf0]  ;;  %v6894_v16 = vmax.f32 %v5540_v63, %v5600_v20 }
 0x135   : > { %v5643_v51 = vadd.f32 %v2438_v14, %v2270_v37  ;;  %v2104_v46 = vadd.f32 %v2103_v50, %v1935_v3  ;;  %1973 = vmatmul.bf16.gmra.mxu0 %v5631_v52  ;;  %v3898_v3 = vld [vmem:[#allocation5 + $0x1d0] sm:$0xf0] }
 0x136   : > { %2142 = vmatmul.bf16.gmra.mxu1 %v5633_v6  ;;  %v3906_v6 = vld [vmem:[#allocation5 + $0x1d8] sm:$0xf0] }
 0x137   : > { %2311 = vmatmul.bf16.gmra.mxu2 %v5635_v7  ;;  %v4510_v7 = vld [vmem:[#allocation5 + $0x1cc] sm:$0xf] }
 0x138   : > { %2480 = vmatmul.bf16.gmra.mxu3 %v5637_v18  ;;  %v4512_v18 = vld [vmem:[#allocation5 + $0x1d4] sm:$0xf0]  ;;  %v5665_v20 = vor.u32 %v4510_v7, %v3906_v6 }
 0x139   : > { %v5663_v63 = vor.u32 %v4512_v18, %v3904_v38  ;;  %v5677_v18 = vpop.permute.xlu0 %687 }
 0x13a   : > { %v2272_v32 = vpop.f32.mrf.mxu2  ;;  %v1936_v28 = vpop.f32.mrf.mxu0  ;;  %6899 = vst [vmem:[#allocation96_spill] sm:$0xff] %v5665_v20 }
 0x13b   : > { %v2441_v48 = vpop.f32.mrf.mxu3  ;;  %v2273_v5 = vadd.f32 %v2272_v32, %v2104_v46  ;;  %v2105_v29 = vpop.f32.mrf.mxu1  ;;  %v1937_v37 = vadd.f32 %v1936_v28, %v5391_v8  ;;  %v5659_v28 = vor.u32 %v4511_v49, %v3896_v25  ;;  %6898 = vst [vmem:[#allocation95_spill] sm:$0xff] %v5663_v63  ;;  %v6900_v25 = vmax.f32 %v5554_v35, %v5615_v23  ;;  %v4515_v35 = vld [vmem:[#allocation5 + $0x1ec] sm:$0xf0]  ;;  %v4513_v23 = vld [vmem:[#allocation5 + $0x1e4] sm:$0xf] }
 0x13c   : > { %v5657_v46 = vpop.permute.xlu2 %682  ;;  %6901 = vst [vmem:[#allocation97_spill] sm:$0xff] %v5677_v18 }
 0x13d   : > { %v2442_v14 = vadd.f32 %v2441_v48, %v2273_v5  ;;  %v2106_v41 = vadd.f32 %v2105_v29, %v1937_v37  ;;  %6895 = vst [vmem:[#allocation92_spill] sm:$0xff] %v5657_v46  ;;  %v5661_v48 = vor.u32 %v4509_v45, %v3898_v3 }
 0x13e   : > { %6896 = vst [vmem:[#allocation93_spill] sm:$0xff] %v5659_v28 }
 0x13f   : > { %v5655_v50 = vmax.f32 %v2442_v14, %v6894_v16  ;;  %6897 = vst [vmem:[#allocation94_spill] sm:$0xff] %v5661_v48 }
 0x142   : > { %v2274_v32 = vpop.f32.mrf.mxu2  ;;  %v1939_v29 = vpop.f32.mrf.mxu0 }
 0x143   : > { %v2443_v52 = vpop.f32.mrf.mxu3  ;;  %v2275_v5 = vadd.f32 %v2274_v32, %v2106_v41  ;;  %v2108_v37 = vpop.f32.mrf.mxu1  ;;  %v1940_v14 = vadd.f32 %v1939_v29, %v5657_v46 }
 0x145   : > { %v2444_v16 = vadd.f32 %v2443_v52, %v2275_v5  ;;  %1978 = vmatmul.bf16.gmra.mxu0 %v5659_v28  ;;  %v2109_v8 = vadd.f32 %v2108_v37, %v1940_v14  ;;  %v3912_v5 = vld [vmem:[#allocation5 + $0x1e0] sm:$0xf]  ;;  %v3914_v37 = vld [vmem:[#allocation5 + $0x1f0] sm:$0xf0]  ;;  %v3920_v14 = vld [vmem:[#allocation5 + $0x1e8] sm:$0xf] }
 0x146   : > { %2147 = vmatmul.bf16.gmra.mxu1 %v5661_v48  ;;  %v588_v48 = vld [vmem:[%s6634_s2 + $0x100] sm:$0xff] }
 0x147   : > { %v5673_v49 = vmax.f32 %v2444_v16, %v6900_v25  ;;  %2316 = vmatmul.bf16.gmra.mxu2 %v5663_v63  ;;  %v585_v16 = vld [vmem:[%s6634_s2 + $0xe8] sm:$0xff]  ;;  %782 = vperm.xlu0 %4741, %v588_v48  }
 0x148   : > { %2485 = vmatmul.bf16.gmra.mxu3 %v5665_v20  ;;  %v4514_v25 = vld [vmem:[#allocation5 + $0x1ec] sm:$0xf]  ;;  %767 = vperm.xlu2 %4743, %v585_v16  }
 0x14a   : > { %v2277_v6 = vpop.f32.mrf.mxu2  ;;  %v1941_v52 = vpop.f32.mrf.mxu0 }
 0x14b   : > { %v2446_v7 = vpop.f32.mrf.mxu3  ;;  %v2278_v38 = vadd.f32 %v2277_v6, %v2109_v8  ;;  %v2110_v41 = vpop.f32.mrf.mxu1  ;;  %v1942_v45 = vadd.f32 %v1941_v52, %v5677_v18  ;;  %v4516_v8 = vld [vmem:[#allocation5 + $0x1f4] sm:$0xf0]  ;;  %v3922_v6 = vld [vmem:[#allocation5 + $0x1f8] sm:$0xf0] }
 0x14c   : > { %v5691_v29 = vor.u32 %v4516_v8, %v3920_v14  ;;  %v5693_v63 = vor.u32 %v4514_v25, %v3922_v6  ;;  %v4519_v8 = vld [vmem:[#allocation5 + $0x20c] sm:$0xf0]  ;;  %v4517_v6 = vld [vmem:[#allocation5 + $0x204] sm:$0xf] }
 0x14d   : > { %v5680_v3 = vadd.f32 %v2446_v7, %v2278_v38  ;;  %v2111_v32 = vadd.f32 %v2110_v41, %v1942_v45  ;;  %v5687_v38 = vor.u32 %v4515_v35, %v3912_v5  ;;  %v5689_v41 = vor.u32 %v4513_v23, %v3914_v37 }
 0x14e   : > { %6903 = vst [vmem:[#allocation99_spill] sm:$0xff] %v5691_v29 }
 0x14f   : > { %6902 = vst [vmem:[#allocation98_spill] sm:$0xff] %v5689_v41 }
 0x150   : > { %6904 = vst [vmem:[#allocation100_spill] sm:$0xff] %v5693_v63 }
 0x152   : > { %v2279_v52 = vpop.f32.mrf.mxu2  ;;  %v1944_v18 = vpop.f32.mrf.mxu0 }
 0x153   : > { %v2448_v7 = vpop.f32.mrf.mxu3  ;;  %v2280_v45 = vadd.f32 %v2279_v52, %v2111_v32  ;;  %v2113_v20 = vpop.f32.mrf.mxu1  ;;  %v1945_v28 = vadd.f32 %v1944_v18, %v5440_v60  ;;  %v6905_v32 = vmax.f32 %v5585_v15, %v5643_v51  ;;  %v589_v18 = vld [vmem:[%s6634_s2 + $0x108] sm:$0xff]  ;;  %v3928_v51 = vld [vmem:[#allocation5 + $0x200] sm:$0xf]  ;;  %v3930_v52 = vld [vmem:[#allocation5 + $0x210] sm:$0xf0] }
 0x154   : > { %787 = vperm.xlu1 %4742, %v589_v18   ;;  %v5716_v18 = vpop.permute.xlu1 %702 }
 0x155   : > { %v2449_v16 = vadd.f32 %v2448_v7, %v2280_v45  ;;  %v2114_v46 = vadd.f32 %v2113_v20, %v1945_v28  ;;  %1983 = vmatmul.bf16.gmra.mxu0 %v5687_v38  ;;  %v3936_v7 = vld [vmem:[#allocation5 + $0x208] sm:$0xf]  ;;  %v4520_v45 = vld [vmem:[#allocation5 + $0x214] sm:$0xf0]  ;;  %6906 = vst [vmem:[#allocation101_spill] sm:$0xff] %v5716_v18 }
 0x156   : > { %2152 = vmatmul.bf16.gmra.mxu1 %v5689_v41 }
 0x157   : > { %v5704_v5 = vmax.f32 %v2449_v16, %v6905_v32  ;;  %2321 = vmatmul.bf16.gmra.mxu2 %v5691_v29  ;;  %v4518_v16 = vld [vmem:[#allocation5 + $0x20c] sm:$0xf]  ;;  %v3938_v32 = vld [vmem:[#allocation5 + $0x218] sm:$0xf0] }
 0x158   : > { %2490 = vmatmul.bf16.gmra.mxu3 %v5693_v63  ;;  %v5718_v63 = vor.u32 %v4519_v8, %v3928_v51  ;;  %v5724_v25 = vor.u32 %v4518_v16, %v3938_v32  ;;  %v3946_v51 = vld [vmem:[#allocation5 + $0x230] sm:$0xf0] }
 0x15a   : > { %v2282_v48 = vpop.f32.mrf.mxu2  ;;  %v1946_v35 = vpop.f32.mrf.mxu0  ;;  %6907 = vst [vmem:[#allocation102_spill] sm:$0xff] %v5718_v63 }
 0x15b   : > { %v2451_v28 = vpop.f32.mrf.mxu3  ;;  %v2283_v20 = vadd.f32 %v2282_v48, %v2114_v46  ;;  %v2115_v23 = vpop.f32.mrf.mxu1  ;;  %v1947_v37 = vadd.f32 %v1946_v35, %v5438_v55  ;;  %6910 = vst [vmem:[#allocation105_spill] sm:$0xff] %v5724_v25 }
 0x15d   : > { %v5712_v14 = vadd.f32 %v2451_v28, %v2283_v20  ;;  %v2116_v15 = vadd.f32 %v2115_v23, %v1947_v37  ;;  %v5720_v28 = vor.u32 %v4517_v6, %v3930_v52  ;;  %v5722_v37 = vor.u32 %v4520_v45, %v3936_v7 }
 0x15f   : > { %6908 = vst [vmem:[#allocation103_spill] sm:$0xff] %v5720_v28 }
 0x160   : > { %6909 = vst [vmem:[#allocation104_spill] sm:$0xff] %v5722_v37 }
 0x162   : > { %v2284_v46 = vpop.f32.mrf.mxu2  ;;  %v1949_v35 = vpop.f32.mrf.mxu0 }
 0x163   : > { %v2453_v48 = vpop.f32.mrf.mxu3  ;;  %v2285_v20 = vadd.f32 %v2284_v46, %v2116_v15  ;;  %v2118_v23 = vpop.f32.mrf.mxu1  ;;  %v1950_v55 = vadd.f32 %v1949_v35, %v5716_v18 }
 0x164   : > { %v5735_v15 = vpop.permute.xlu2 %707 }
 0x165   : > { %v5727_v29 = vadd.f32 %v2453_v48, %v2285_v20  ;;  %1988 = vmatmul.bf16.gmra.mxu0 %v5718_v63  ;;  %v2119_v41 = vadd.f32 %v2118_v23, %v1950_v55  ;;  %v3944_v48 = vld [vmem:[#allocation5 + $0x220] sm:$0xf]  ;;  %v4523_v55 = vld [vmem:[#allocation5 + $0x22c] sm:$0xf0]  ;;  %v6911_v20 = vmax.f32 %v5629_v33, %v5680_v3  ;;  %v4521_v23 = vld [vmem:[#allocation5 + $0x224] sm:$0xf] }
 0x166   : > { %2157 = vmatmul.bf16.gmra.mxu1 %v5720_v28  ;;  %v4522_v28 = vld [vmem:[#allocation5 + $0x22c] sm:$0xf]  ;;  %v3954_v63 = vld [vmem:[#allocation5 + $0x238] sm:$0xf0]  ;;  %v5743_v18 = vor.u32 %v4523_v55, %v3944_v48 }
 0x167   : > { %2326 = vmatmul.bf16.gmra.mxu2 %v5722_v37  ;;  %v4524_v37 = vld [vmem:[#allocation5 + $0x234] sm:$0xf0]  ;;  %v5749_v33 = vor.u32 %v4522_v28, %v3954_v63  ;;  %v593_v63 = vld [vmem:[%s6634_s2 + $0x128] sm:$0xff] }
 0x168   : > { %2495 = vmatmul.bf16.gmra.mxu3 %v5724_v25  ;;  %v3952_v25 = vld [vmem:[#allocation5 + $0x228] sm:$0xf]  ;;  %6912 = vst [vmem:[#allocation106_spill] sm:$0xff] %v5743_v18  ;;  %807 = vperm.xlu0 %4741, %v593_v63   ;;  %v4528_v63 = vld [vmem:[#allocation5 + $0x254] sm:$0xf0] }
 0x169   : > { %6915 = vst [vmem:[#allocation109_spill] sm:$0xff] %v5749_v33 }
 0x16a   : > { %v2287_v8 = vpop.f32.mrf.mxu2  ;;  %v1951_v7 = vpop.f32.mrf.mxu0 }
 0x16b   : > { %v2456_v6 = vpop.f32.mrf.mxu3  ;;  %v2288_v52 = vadd.f32 %v2287_v8, %v2119_v41  ;;  %v2120_v45 = vpop.f32.mrf.mxu1  ;;  %v1952_v16 = vadd.f32 %v1951_v7, %v5735_v15  ;;  %v5745_v7 = vor.u32 %v4521_v23, %v3946_v51  ;;  %v3962_v51 = vld [vmem:[#allocation5 + $0x250] sm:$0xf0] }
 0x16d   : > { %v2457_v32 = vadd.f32 %v2456_v6, %v2288_v52  ;;  %v2121_v46 = vadd.f32 %v2120_v45, %v1952_v16  ;;  %6913 = vst [vmem:[#allocation107_spill] sm:$0xff] %v5745_v7  ;;  %v5747_v16 = vor.u32 %v4524_v37, %v3952_v25 }
 0x16f   : > { %v5741_v35 = vmax.f32 %v2457_v32, %v6911_v20  ;;  %6914 = vst [vmem:[#allocation108_spill] sm:$0xff] %v5747_v16 }
 0x172   : > { %v2289_v41 = vpop.f32.mrf.mxu2  ;;  %v1954_v52 = vpop.f32.mrf.mxu0 }
 0x173   : > { %v2458_v8 = vpop.f32.mrf.mxu3  ;;  %v2290_v6 = vadd.f32 %v2289_v41, %v2121_v46  ;;  %v2123_v45 = vpop.f32.mrf.mxu1  ;;  %v1955_v3 = vadd.f32 %v1954_v52, %v5395_v9  ;;  %v6916_v52 = vmax.f32 %v5712_v14, %v5655_v50 }
 0x175   : > { %v5752_v32 = vadd.f32 %v2458_v8, %v2290_v6  ;;  %v2124_v20 = vadd.f32 %v2123_v45, %v1955_v3  ;;  %1993 = vmatmul.bf16.gmra.mxu0 %v5743_v18  ;;  %v3960_v8 = vld [vmem:[#allocation5 + $0x240] sm:$0xf]  ;;  %v4527_v6 = vld [vmem:[#allocation5 + $0x24c] sm:$0xf0]  ;;  %v4525_v3 = vld [vmem:[#allocation5 + $0x244] sm:$0xf] }
 0x176   : > { %2162 = vmatmul.bf16.gmra.mxu1 %v5745_v7  ;;  %v3970_v7 = vld [vmem:[#allocation5 + $0x258] sm:$0xf0] }
 0x177   : > { %2331 = vmatmul.bf16.gmra.mxu2 %v5747_v16  ;;  %v4526_v16 = vld [vmem:[#allocation5 + $0x24c] sm:$0xf] }
 0x178   : > { %2500 = vmatmul.bf16.gmra.mxu3 %v5749_v33  ;;  %v3968_v33 = vld [vmem:[#allocation5 + $0x248] sm:$0xf]  ;;  %v5777_v14 = vor.u32 %v4526_v16, %v3970_v7 }
 0x179   : > { %v5775_v50 = vor.u32 %v4528_v63, %v3968_v33  ;;  %v5789_v33 = vpop.permute.xlu1 %727 }
 0x17a   : > { %v2292_v25 = vpop.f32.mrf.mxu2  ;;  %v1956_v46 = vpop.f32.mrf.mxu0  ;;  %6921 = vst [vmem:[#allocation114_spill] sm:$0xff] %v5777_v14 }
 0x17b   : > { %v2461_v28 = vpop.f32.mrf.mxu3  ;;  %v2293_v37 = vadd.f32 %v2292_v25, %v2124_v20  ;;  %v2125_v48 = vpop.f32.mrf.mxu1  ;;  %v1957_v55 = vadd.f32 %v1956_v46, %v5449_v4  ;;  %v5771_v46 = vor.u32 %v4527_v6, %v3960_v8  ;;  %6920 = vst [vmem:[#allocation113_spill] sm:$0xff] %v5775_v50  ;;  %v6922_v8 = vmax.f32 %v5727_v29, %v5673_v49 }
 0x17c   : > { %v5769_v20 = vpop.permute.xlu0 %722  ;;  %6923 = vst [vmem:[#allocation115_spill] sm:$0xff] %v5789_v33 }
 0x17d   : > { %v2462_v23 = vadd.f32 %v2461_v28, %v2293_v37  ;;  %v2126_v41 = vadd.f32 %v2125_v48, %v1957_v55  ;;  %6917 = vst [vmem:[#allocation110_spill] sm:$0xff] %v5769_v20  ;;  %v5773_v28 = vor.u32 %v4525_v3, %v3962_v51  ;;  %v592_v3 = vld [vmem:[%s6634_s2 + $0x120] sm:$0xff] }
 0x17e   : > { %6918 = vst [vmem:[#allocation111_spill] sm:$0xff] %v5771_v46  ;;  %802 = vperm.xlu2 %4743, %v592_v3  }
 0x17f   : > { %v5767_v45 = vmax.f32 %v2462_v23, %v6916_v52  ;;  %6919 = vst [vmem:[#allocation112_spill] sm:$0xff] %v5773_v28 }
 0x182   : > { %v2294_v25 = vpop.f32.mrf.mxu2  ;;  %v1959_v48 = vpop.f32.mrf.mxu0 }
 0x183   : > { %v2463_v18 = vpop.f32.mrf.mxu3  ;;  %v2295_v37 = vadd.f32 %v2294_v25, %v2126_v41  ;;  %v2128_v55 = vpop.f32.mrf.mxu1  ;;  %v1960_v23 = vadd.f32 %v1959_v48, %v5769_v20  ;;  %v3976_v25 = vld [vmem:[#allocation5 + $0x260] sm:$0xf] }
 0x184   : > { %v596_v48 = vld [vmem:[%s6634_s2 + $0x140] sm:$0xff] }
 0x185   : > { %v2464_v52 = vadd.f32 %v2463_v18, %v2295_v37  ;;  %1998 = vmatmul.bf16.gmra.mxu0 %v5771_v46  ;;  %v2129_v4 = vadd.f32 %v2128_v55, %v1960_v23  ;;  %v4531_v37 = vld [vmem:[#allocation5 + $0x26c] sm:$0xf0]  ;;  %v4529_v55 = vld [vmem:[#allocation5 + $0x264] sm:$0xf]  ;;  %v3978_v23 = vld [vmem:[#allocation5 + $0x270] sm:$0xf0]  ;;  %822 = vperm.xlu1 %4742, %v596_v48  }
 0x186   : > { %2167 = vmatmul.bf16.gmra.mxu1 %v5773_v28  ;;  %v5799_v28 = vor.u32 %v4531_v37, %v3976_v25 }
 0x187   : > { %v5785_v51 = vmax.f32 %v2464_v52, %v6922_v8  ;;  %2336 = vmatmul.bf16.gmra.mxu2 %v5775_v50  ;;  %v4532_v52 = vld [vmem:[#allocation5 + $0x274] sm:$0xf0]  ;;  %v4530_v8 = vld [vmem:[#allocation5 + $0x26c] sm:$0xf] }
 0x188   : > { %2505 = vmatmul.bf16.gmra.mxu3 %v5777_v14 }
 0x18a   : > { %v2297_v7 = vpop.f32.mrf.mxu2  ;;  %v1961_v18 = vpop.f32.mrf.mxu0 }
 0x18b   : > { %v2466_v16 = vpop.f32.mrf.mxu3  ;;  %v2298_v41 = vadd.f32 %v2297_v7, %v2129_v4  ;;  %v2130_v6 = vpop.f32.mrf.mxu1  ;;  %v1962_v63 = vadd.f32 %v1961_v18, %v5789_v33  ;;  %v3984_v4 = vld [vmem:[#allocation5 + $0x268] sm:$0xf]  ;;  %v3986_v7 = vld [vmem:[#allocation5 + $0x278] sm:$0xf0]  ;;  %v5801_v18 = vor.u32 %v4529_v55, %v3978_v23 }
 0x18c   : > { %v5803_v3 = vor.u32 %v4532_v52, %v3984_v4  ;;  %v3992_v52 = vld [vmem:[#allocation5 + $0x280] sm:$0xf] }
 0x18d   : > { %v5795_v49 = vadd.f32 %v2466_v16, %v2298_v41  ;;  %v2131_v29 = vadd.f32 %v2130_v6, %v1962_v63  ;;  %6924 = vst [vmem:[#allocation116_spill] sm:$0xff] %v5801_v18  ;;  %v5805_v63 = vor.u32 %v4530_v8, %v3986_v7  ;;  %v4535_v8 = vld [vmem:[#allocation5 + $0x28c] sm:$0xf0]  ;;  %v4000_v7 = vld [vmem:[#allocation5 + $0x288] sm:$0xf] }
 0x18e   : > { %6925 = vst [vmem:[#allocation117_spill] sm:$0xff] %v5803_v3 }
 0x18f   : > { %6926 = vst [vmem:[#allocation118_spill] sm:$0xff] %v5805_v63 }
 0x192   : > { %v2299_v14 = vpop.f32.mrf.mxu2  ;;  %v1964_v41 = vpop.f32.mrf.mxu0 }
 0x193   : > { %v2468_v50 = vpop.f32.mrf.mxu3  ;;  %v2300_v16 = vadd.f32 %v2299_v14, %v2131_v29  ;;  %v2133_v6 = vpop.f32.mrf.mxu1  ;;  %v1965_v33 = vadd.f32 %v1964_v41, %v5447_v1  ;;  %v6927_v14 = vmax.f32 %v5752_v32, %v5704_v5  ;;  %v4533_v32 = vld [vmem:[#allocation5 + $0x284] sm:$0xf]  ;;  %v4534_v41 = vld [vmem:[#allocation5 + $0x28c] sm:$0xf] }
 0x195   : > { %v2469_v46 = vadd.f32 %v2468_v50, %v2300_v16  ;;  %v2134_v20 = vadd.f32 %v2133_v6, %v1965_v33  ;;  %2003 = vmatmul.bf16.gmra.mxu0 %v5799_v28  ;;  %v4536_v16 = vld [vmem:[#allocation5 + $0x294] sm:$0xf0]  ;;  %v4002_v6 = vld [vmem:[#allocation5 + $0x298] sm:$0xf0] }
 0x196   : > { %2172 = vmatmul.bf16.gmra.mxu1 %v5801_v18  ;;  %v5833_v5 = vor.u32 %v4534_v41, %v4002_v6 }
 0x197   : > { %v5816_v29 = vmax.f32 %v2469_v46, %v6927_v14  ;;  %2341 = vmatmul.bf16.gmra.mxu2 %v5803_v3  ;;  %v3994_v46 = vld [vmem:[#allocation5 + $0x290] sm:$0xf0]  ;;  %v5825_v14 = vpop.permute.xlu2 %742 }
 0x198   : > { %2510 = vmatmul.bf16.gmra.mxu3 %v5805_v63  ;;  %v5827_v63 = vor.u32 %v4535_v8, %v3992_v52  ;;  %6931 = vst [vmem:[#allocation122_spill] sm:$0xff] %v5833_v5  ;;  %v4010_v52 = vld [vmem:[#allocation5 + $0x2b0] sm:$0xf0] }
 0x19a   : > { %v2302_v25 = vpop.f32.mrf.mxu2  ;;  %v1966_v23 = vpop.f32.mrf.mxu0  ;;  %6928 = vst [vmem:[#allocation119_spill] sm:$0xff] %v5827_v63 }
 0x19b   : > { %v2471_v37 = vpop.f32.mrf.mxu3  ;;  %v2303_v55 = vadd.f32 %v2302_v25, %v2134_v20  ;;  %v2135_v48 = vpop.f32.mrf.mxu1  ;;  %v1967_v50 = vadd.f32 %v1966_v23, %v5409_v27 }
 0x19d   : > { %v5821_v33 = vadd.f32 %v2471_v37, %v2303_v55  ;;  %v2136_v4 = vadd.f32 %v2135_v48, %v1967_v50  ;;  %v5829_v37 = vor.u32 %v4533_v32, %v3994_v46  ;;  %v5831_v50 = vor.u32 %v4536_v16, %v4000_v7 }
 0x19f   : > { %6929 = vst [vmem:[#allocation120_spill] sm:$0xff] %v5829_v37 }
 0x1a0   : > { %6930 = vst [vmem:[#allocation121_spill] sm:$0xff] %v5831_v50 }
 0x1a2   : > { %v2304_v20 = vpop.f32.mrf.mxu2  ;;  %v1969_v23 = vpop.f32.mrf.mxu0 }
 0x1a3   : > { %v2473_v25 = vpop.f32.mrf.mxu3  ;;  %v2305_v55 = vadd.f32 %v2304_v20, %v2136_v4  ;;  %v2138_v48 = vpop.f32.mrf.mxu1  ;;  %v1970_v27 = vadd.f32 %v1969_v23, %v5825_v14  ;;  %v6933_v23 = vmax.f32 %v5795_v49, %v5741_v35 }
 0x1a4   : > { %v5844_v4 = vpop.permute.xlu0 %747 }
 0x1a5   : > { %v5836_v3 = vadd.f32 %v2473_v25, %v2305_v55  ;;  %2008 = vmatmul.bf16.gmra.mxu0 %v5827_v63  ;;  %v2139_v18 = vadd.f32 %v2138_v48, %v1970_v27  ;;  %6932 = vst [vmem:[#allocation123_spill] sm:$0xff] %v5844_v4  ;;  %v4008_v25 = vld [vmem:[#allocation5 + $0x2a0] sm:$0xf]  ;;  %v4539_v27 = vld [vmem:[#allocation5 + $0x2ac] sm:$0xf0] }
 0x1a6   : > { %2177 = vmatmul.bf16.gmra.mxu1 %v5829_v37  ;;  %v4537_v55 = vld [vmem:[#allocation5 + $0x2a4] sm:$0xf]  ;;  %v4018_v37 = vld [vmem:[#allocation5 + $0x2b8] sm:$0xf0] }
 0x1a7   : > { %2346 = vmatmul.bf16.gmra.mxu2 %v5831_v50  ;;  %v4538_v50 = vld [vmem:[#allocation5 + $0x2ac] sm:$0xf] }
 0x1a8   : > { %2515 = vmatmul.bf16.gmra.mxu3 %v5833_v5  ;;  %v4016_v5 = vld [vmem:[#allocation5 + $0x2a8] sm:$0xf] }
 0x1aa   : > { %v2307_v8 = vpop.f32.mrf.mxu2  ;;  %v1971_v7 = vpop.f32.mrf.mxu0 }
 0x1ab   : > { %v2476_v32 = vpop.f32.mrf.mxu3  ;;  %v2308_v46 = vadd.f32 %v2307_v8, %v2139_v18  ;;  %v2140_v16 = vpop.f32.mrf.mxu1  ;;  %v1972_v41 = vadd.f32 %v1971_v7, %v5844_v4  ;;  %v597_v18 = vld [vmem:[%s6634_s2 + $0x148] sm:$0xff]  ;;  %v4540_v8 = vld [vmem:[#allocation5 + $0x2b4] sm:$0xf0]  ;;  %v5855_v7 = vor.u32 %v4539_v27, %v4008_v25  ;;  %v600_v4 = vld [vmem:[%s6634_s2 + $0x160] sm:$0xff] }
 0x1ac   : > { %827 = vperm.xlu2 %4743, %v597_v18   ;;  %842 = vperm.xlu0 %4741, %v600_v4  }
 0x1ad   : > { %v2477_v6 = vadd.f32 %v2476_v32, %v2308_v46  ;;  %v2141_v20 = vadd.f32 %v2140_v16, %v1972_v41  ;;  %6934 = vst [vmem:[#allocation124_spill] sm:$0xff] %v5855_v7  ;;  %v5857_v16 = vor.u32 %v4537_v55, %v4010_v52 }
 0x1af   : > { %v5850_v48 = vmax.f32 %v2477_v6, %v6933_v23  ;;  %6935 = vst [vmem:[#allocation125_spill] sm:$0xff] %v5857_v16  ;;  %v5859_v6 = vor.u32 %v4540_v8, %v4016_v5  ;;  %v5861_v23 = vor.u32 %v4538_v50, %v4018_v37  ;;  %v601_v37 = vld [vmem:[%s6634_s2 + $0x168] sm:$0xff]  ;;  %v4026_v5 = vld [vmem:[#allocation5 + $0x2d0] sm:$0xf0] }
 0x1b0   : > { %847 = vperm.xlu1 %4742, %v601_v37   ;;  %v4544_v37 = vld [vmem:[#allocation5 + $0x2d4] sm:$0xf0] }
 0x1b1   : > { %6936 = vst [vmem:[#allocation126_spill] sm:$0xff] %v5859_v6 }
 0x1b2   : > { %v2309_v32 = vpop.f32.mrf.mxu2  ;;  %v1974_v35 = vpop.f32.mrf.mxu0  ;;  %6937 = vst [vmem:[#allocation127_spill] sm:$0xff] %v5861_v23 }
 0x1b3   : > { %v2478_v46 = vpop.f32.mrf.mxu3  ;;  %v2310_v41 = vadd.f32 %v2309_v32, %v2141_v20  ;;  %v2143_v49 = vpop.f32.mrf.mxu1  ;;  %v1975_v63 = vadd.f32 %v1974_v35, %v5470_v40  ;;  %v4024_v32 = vld [vmem:[#allocation5 + $0x2c0] sm:$0xf] }
 0x1b5   : > { %v5867_v18 = vadd.f32 %v2478_v46, %v2310_v41  ;;  %v2144_v25 = vadd.f32 %v2143_v49, %v1975_v63  ;;  %2013 = vmatmul.bf16.gmra.mxu0 %v5855_v7  ;;  %v4543_v46 = vld [vmem:[#allocation5 + $0x2cc] sm:$0xf0]  ;;  %v6938_v41 = vmax.f32 %v5821_v33, %v5767_v45  ;;  %v4541_v49 = vld [vmem:[#allocation5 + $0x2c4] sm:$0xf] }
 0x1b6   : > { %2182 = vmatmul.bf16.gmra.mxu1 %v5857_v16  ;;  %v4034_v16 = vld [vmem:[#allocation5 + $0x2d8] sm:$0xf0] }
 0x1b7   : > { %2351 = vmatmul.bf16.gmra.mxu2 %v5859_v6  ;;  %v4542_v6 = vld [vmem:[#allocation5 + $0x2cc] sm:$0xf] }
 0x1b8   : > { %2520 = vmatmul.bf16.gmra.mxu3 %v5861_v23  ;;  %v4032_v23 = vld [vmem:[#allocation5 + $0x2c8] sm:$0xf]  ;;  %v5892_v33 = vor.u32 %v4542_v6, %v4034_v16 }
 0x1b9   : > { %v5890_v45 = vor.u32 %v4544_v37, %v4032_v23  ;;  %v5904_v23 = vpop.permute.xlu2 %767 }
 0x1ba   : > { %v2312_v50 = vpop.f32.mrf.mxu2  ;;  %v1976_v63 = vpop.f32.mrf.mxu0  ;;  %6943 = vst [vmem:[#allocation132_spill] sm:$0xff] %v5892_v33 }
 0x1bb   : > { %v2481_v52 = vpop.f32.mrf.mxu3  ;;  %v2313_v4 = vadd.f32 %v2312_v50, %v2144_v25  ;;  %v2145_v20 = vpop.f32.mrf.mxu1  ;;  %v1977_v27 = vadd.f32 %v1976_v63, %v5468_v39  ;;  %v5886_v63 = vor.u32 %v4543_v46, %v4024_v32  ;;  %6942 = vst [vmem:[#allocation131_spill] sm:$0xff] %v5890_v45  ;;  %v6944_v32 = vmax.f32 %v5836_v3, %v5785_v51  ;;  %v4547_v51 = vld [vmem:[#allocation5 + $0x2ec] sm:$0xf0] }
 0x1bc   : > { %v5884_v25 = vpop.permute.xlu1 %762  ;;  %6945 = vst [vmem:[#allocation133_spill] sm:$0xff] %v5904_v23 }
 0x1bd   : > { %v2482_v55 = vadd.f32 %v2481_v52, %v2313_v4  ;;  %v2146_v8 = vadd.f32 %v2145_v20, %v1977_v27  ;;  %6939 = vst [vmem:[#allocation128_spill] sm:$0xff] %v5884_v25  ;;  %v5888_v52 = vor.u32 %v4541_v49, %v4026_v5 }
 0x1be   : > { %6940 = vst [vmem:[#allocation129_spill] sm:$0xff] %v5886_v63 }
 0x1bf   : > { %v5882_v35 = vmax.f32 %v2482_v55, %v6938_v41  ;;  %6941 = vst [vmem:[#allocation130_spill] sm:$0xff] %v5888_v52 }
 0x1c2   : > { %v2314_v50 = vpop.f32.mrf.mxu2  ;;  %v1979_v20 = vpop.f32.mrf.mxu0 }
 0x1c3   : > { %v2483_v7 = vpop.f32.mrf.mxu3  ;;  %v2315_v4 = vadd.f32 %v2314_v50, %v2146_v8  ;;  %v2148_v27 = vpop.f32.mrf.mxu1  ;;  %v1980_v55 = vadd.f32 %v1979_v20, %v5884_v25  ;;  %v4545_v20 = vld [vmem:[#allocation5 + $0x2e4] sm:$0xf] }
 0x1c4   : > { %v4637_v25 = vld [vmem:[%s5139_s15 + $0x1c4] sm:$0xf] }
 0x1c5   : > { %v2484_v41 = vadd.f32 %v2483_v7, %v2315_v4  ;;  %2018 = vmatmul.bf16.gmra.mxu0 %v5886_v63  ;;  %v2149_v39 = vadd.f32 %v2148_v27, %v1980_v55  ;;  %v4040_v4 = vld [vmem:[#allocation5 + $0x2e0] sm:$0xf]  ;;  %v4042_v27 = vld [vmem:[#allocation5 + $0x2f0] sm:$0xf0]  ;;  %v4048_v55 = vld [vmem:[#allocation5 + $0x2e8] sm:$0xf] }
 0x1c6   : > { %2187 = vmatmul.bf16.gmra.mxu1 %v5888_v52  ;;  %v5913_v52 = vor.u32 %v4545_v20, %v4042_v27 }
 0x1c7   : > { %v5900_v5 = vmax.f32 %v2484_v41, %v6944_v32  ;;  %2356 = vmatmul.bf16.gmra.mxu2 %v5890_v45  ;;  %v4548_v41 = vld [vmem:[#allocation5 + $0x2f4] sm:$0xf0]  ;;  %v4546_v32 = vld [vmem:[#allocation5 + $0x2ec] sm:$0xf] }
 0x1c8   : > { %2525 = vmatmul.bf16.gmra.mxu3 %v5892_v33  ;;  %v4050_v33 = vld [vmem:[#allocation5 + $0x2f8] sm:$0xf0]  ;;  %6947 = vst [vmem:[#allocation135_spill] sm:$0xff] %v5913_v52 }
 0x1ca   : > { %v2317_v16 = vpop.f32.mrf.mxu2  ;;  %v1981_v7 = vpop.f32.mrf.mxu0 }
 0x1cb   : > { %v2486_v6 = vpop.f32.mrf.mxu3  ;;  %v2318_v8 = vadd.f32 %v2317_v16, %v2149_v39  ;;  %v2150_v46 = vpop.f32.mrf.mxu1  ;;  %v1982_v49 = vadd.f32 %v1981_v7, %v5904_v23  ;;  %v5911_v16 = vor.u32 %v4547_v51, %v4040_v4  ;;  %v6950_v4 = vmax.f32 %v5867_v18, %v5816_v29  ;;  %v4056_v18 = vld [vmem:[#allocation5 + $0x300] sm:$0xf] }
 0x1cd   : > { %v5907_v37 = vadd.f32 %v2486_v6, %v2318_v8  ;;  %v2151_v50 = vadd.f32 %v2150_v46, %v1982_v49  ;;  %6946 = vst [vmem:[#allocation134_spill] sm:$0xff] %v5911_v16  ;;  %v5915_v46 = vor.u32 %v4548_v41, %v4048_v55  ;;  %v5917_v49 = vor.u32 %v4546_v32, %v4050_v33 }
 0x1cf   : > { %6948 = vst [vmem:[#allocation136_spill] sm:$0xff] %v5915_v46 }
 0x1d0   : > { %6949 = vst [vmem:[#allocation137_spill] sm:$0xff] %v5917_v49 }
 0x1d2   : > { %v2319_v45 = vpop.f32.mrf.mxu2  ;;  %v1984_v8 = vpop.f32.mrf.mxu0 }
 0x1d3   : > { %v2488_v39 = vpop.f32.mrf.mxu3  ;;  %v2320_v6 = vadd.f32 %v2319_v45, %v2151_v50  ;;  %v2153_v7 = vpop.f32.mrf.mxu1  ;;  %v1985_v3 = vadd.f32 %v1984_v8, %v5418_v34  ;;  %v605_v45 = vld [vmem:[%s6634_s2 + $0x188] sm:$0xff] }
 0x1d4   : > { %867 = vperm.xlu0 %4741, %v605_v45   ;;  %v4064_v8 = vld [vmem:[#allocation5 + $0x308] sm:$0xf]  ;;  %v5937_v45 = vpop.permute.xlu0 %782 }
 0x1d5   : > { %v2489_v23 = vadd.f32 %v2488_v39, %v2320_v6  ;;  %v2154_v63 = vadd.f32 %v2153_v7, %v1985_v3  ;;  %2023 = vmatmul.bf16.gmra.mxu0 %v5911_v16  ;;  %v4549_v39 = vld [vmem:[#allocation5 + $0x304] sm:$0xf]  ;;  %v4058_v6 = vld [vmem:[#allocation5 + $0x310] sm:$0xf0]  ;;  %v4552_v7 = vld [vmem:[#allocation5 + $0x314] sm:$0xf0] }
 0x1d6   : > { %2192 = vmatmul.bf16.gmra.mxu1 %v5913_v52  ;;  %6951 = vst [vmem:[#allocation138_spill] sm:$0xff] %v5937_v45 }
 0x1d7   : > { %v5925_v51 = vmax.f32 %v2489_v23, %v6950_v4  ;;  %2361 = vmatmul.bf16.gmra.mxu2 %v5915_v46  ;;  %v4551_v23 = vld [vmem:[#allocation5 + $0x30c] sm:$0xf0]  ;;  %v4550_v4 = vld [vmem:[#allocation5 + $0x30c] sm:$0xf] }
 0x1d8   : > { %2530 = vmatmul.bf16.gmra.mxu3 %v5917_v49  ;;  %v4066_v49 = vld [vmem:[#allocation5 + $0x318] sm:$0xf0]  ;;  %v5939_v46 = vor.u32 %v4551_v23, %v4056_v18  ;;  %v4074_v18 = vld [vmem:[#allocation5 + $0x330] sm:$0xf0] }
 0x1d9   : > { %v5945_v32 = vor.u32 %v4550_v4, %v4066_v49 }
 0x1da   : > { %v2322_v33 = vpop.f32.mrf.mxu2  ;;  %v1986_v20 = vpop.f32.mrf.mxu0  ;;  %6952 = vst [vmem:[#allocation139_spill] sm:$0xff] %v5939_v46 }
 0x1db   : > { %v2491_v50 = vpop.f32.mrf.mxu3  ;;  %v2323_v3 = vadd.f32 %v2322_v33, %v2154_v63  ;;  %v2155_v27 = vpop.f32.mrf.mxu1  ;;  %v1987_v55 = vadd.f32 %v1986_v20, %v5476_v61  ;;  %6955 = vst [vmem:[#allocation142_spill] sm:$0xff] %v5945_v32 }
 0x1dd   : > { %v5933_v41 = vadd.f32 %v2491_v50, %v2323_v3  ;;  %v2156_v29 = vadd.f32 %v2155_v27, %v1987_v55  ;;  %v5941_v50 = vor.u32 %v4549_v39, %v4058_v6  ;;  %v5943_v55 = vor.u32 %v4552_v7, %v4064_v8  ;;  %v604_v7 = vld [vmem:[%s6634_s2 + $0x180] sm:$0xff] }
 0x1de   : > { %862 = vperm.xlu2 %4743, %v604_v7  }
 0x1df   : > { %6953 = vst [vmem:[#allocation140_spill] sm:$0xff] %v5941_v50 }
 0x1e0   : > { %6954 = vst [vmem:[#allocation141_spill] sm:$0xff] %v5943_v55 }
 0x1e2   : > { %v2324_v63 = vpop.f32.mrf.mxu2  ;;  %v1989_v20 = vpop.f32.mrf.mxu0 }
 0x1e3   : > { %v2493_v33 = vpop.f32.mrf.mxu3  ;;  %v2325_v3 = vadd.f32 %v2324_v63, %v2156_v29  ;;  %v2158_v27 = vpop.f32.mrf.mxu1  ;;  %v1990_v61 = vadd.f32 %v1989_v20, %v5937_v45 }
 0x1e4   : > { %v5956_v29 = vpop.permute.xlu1 %787 }
 0x1e5   : > { %v5948_v52 = vadd.f32 %v2493_v33, %v2325_v3  ;;  %2028 = vmatmul.bf16.gmra.mxu0 %v5939_v46  ;;  %v2159_v16 = vadd.f32 %v2158_v27, %v1990_v61  ;;  %6956 = vst [vmem:[#allocation143_spill] sm:$0xff] %v5956_v29  ;;  %v4072_v33 = vld [vmem:[#allocation5 + $0x320] sm:$0xf]  ;;  %v4555_v3 = vld [vmem:[#allocation5 + $0x32c] sm:$0xf0] }
 0x1e6   : > { %2197 = vmatmul.bf16.gmra.mxu1 %v5941_v50  ;;  %v4553_v27 = vld [vmem:[#allocation5 + $0x324] sm:$0xf]  ;;  %v6957_v50 = vmax.f32 %v5907_v37, %v5850_v48  ;;  %v5968_v7 = vor.u32 %v4555_v3, %v4072_v33 }
 0x1e7   : > { %2366 = vmatmul.bf16.gmra.mxu2 %v5943_v55  ;;  %v4556_v55 = vld [vmem:[#allocation5 + $0x334] sm:$0xf0] }
 0x1e8   : > { %2535 = vmatmul.bf16.gmra.mxu3 %v5945_v32  ;;  %v4080_v32 = vld [vmem:[#allocation5 + $0x328] sm:$0xf]  ;;  %6958 = vst [vmem:[#allocation144_spill] sm:$0xff] %v5968_v7 }
 0x1ea   : > { %v2327_v49 = vpop.f32.mrf.mxu2  ;;  %v1991_v6 = vpop.f32.mrf.mxu0 }
 0x1eb   : > { %v2496_v23 = vpop.f32.mrf.mxu3  ;;  %v2328_v39 = vadd.f32 %v2327_v49, %v2159_v16  ;;  %v2160_v8 = vpop.f32.mrf.mxu1  ;;  %v1992_v61 = vadd.f32 %v1991_v6, %v5956_v29  ;;  %v4554_v16 = vld [vmem:[#allocation5 + $0x32c] sm:$0xf]  ;;  %v4082_v49 = vld [vmem:[#allocation5 + $0x338] sm:$0xf0]  ;;  %v608_v29 = vld [vmem:[%s6634_s2 + $0x1a0] sm:$0xff] }
 0x1ec   : > { %882 = vperm.xlu1 %4742, %v608_v29  }
 0x1ed   : > { %v2497_v4 = vadd.f32 %v2496_v23, %v2328_v39  ;;  %v2161_v63 = vadd.f32 %v2160_v8, %v1992_v61  ;;  %v5970_v23 = vor.u32 %v4553_v27, %v4074_v18  ;;  %v5972_v61 = vor.u32 %v4556_v55, %v4080_v32 }
 0x1ef   : > { %v3252_v20 = vmax.f32 %v5526_v47, %v2497_v4  ;;  %6959 = vst [vmem:[#allocation145_spill] sm:$0xff] %v5970_v23  ;;  %v5974_v4 = vor.u32 %v4554_v16, %v4082_v49  ;;  %v4088_v16 = vld [vmem:[#allocation5 + $0x340] sm:$0xf]  ;;  %v4559_v49 = vld [vmem:[#allocation5 + $0x34c] sm:$0xf0] }
 0x1f0   : > { %6960 = vst [vmem:[#allocation146_spill] sm:$0xff] %v5972_v61 }
 0x1f1   : > { %v5966_v46 = vmax.f32 %v3252_v20, %v6957_v50  ;;  %6961 = vst [vmem:[#allocation147_spill] sm:$0xff] %v5974_v4 }
 0x1f2   : > { %v2329_v45 = vpop.f32.mrf.mxu2  ;;  %v1994_v8 = vpop.f32.mrf.mxu0 }
 0x1f3   : > { %v2498_v6 = vpop.f32.mrf.mxu3  ;;  %v2330_v39 = vadd.f32 %v2329_v45, %v2161_v63  ;;  %v2163_v47 = vpop.f32.mrf.mxu1  ;;  %v1995_v48 = vadd.f32 %v1994_v8, %v5474_v44  ;;  %v4090_v8 = vld [vmem:[#allocation5 + $0x350] sm:$0xf0] }
 0x1f5   : > { %v2499_v37 = vadd.f32 %v2498_v6, %v2330_v39  ;;  %v2164_v50 = vadd.f32 %v2163_v47, %v1995_v48  ;;  %2033 = vmatmul.bf16.gmra.mxu0 %v5968_v7  ;;  %v4557_v39 = vld [vmem:[#allocation5 + $0x344] sm:$0xf]  ;;  %v4560_v47 = vld [vmem:[#allocation5 + $0x354] sm:$0xf0]  ;;  %v4558_v48 = vld [vmem:[#allocation5 + $0x34c] sm:$0xf] }
 0x1f6   : > { %2202 = vmatmul.bf16.gmra.mxu1 %v5970_v23  ;;  %v4605_v23 = vld [vmem:[%s5139_s15 + $0xc4] sm:$0xf] }
 0x1f7   : > { %v3254_v45 = vmax.f32 %v5595_v31, %v2499_v37  ;;  %2371 = vmatmul.bf16.gmra.mxu2 %v5972_v61  ;;  %v6962_v31 = vmax.f32 %v5933_v41, %v5882_v35  ;;  %v4098_v37 = vld [vmem:[#allocation5 + $0x358] sm:$0xf0] }
 0x1f8   : > { %2540 = vmatmul.bf16.gmra.mxu3 %v5974_v4  ;;  %v6002_v41 = vor.u32 %v4558_v48, %v4098_v37  ;;  %v4418_v61 = vld [vmem:[%s5139_s15 + $0x1d8] sm:$0xf0] }
 0x1f9   : > { %v5986_v32 = vmax.f32 %v3254_v45, %v5925_v51  ;;  %v4096_v51 = vld [vmem:[#allocation5 + $0x348] sm:$0xf] }
 0x1fa   : > { %v2332_v55 = vpop.f32.mrf.mxu2  ;;  %v1996_v33 = vpop.f32.mrf.mxu0  ;;  %v6000_v35 = vor.u32 %v4560_v47, %v4096_v51  ;;  %6967 = vst [vmem:[#allocation152_spill] sm:$0xff] %v6002_v41 }
 0x1fb   : > { %v2501_v18 = vpop.f32.mrf.mxu3  ;;  %v2333_v63 = vadd.f32 %v2332_v55, %v2164_v50  ;;  %v2165_v29 = vpop.f32.mrf.mxu1  ;;  %v1997_v3 = vadd.f32 %v1996_v33, %v5434_v54  ;;  %v5996_v33 = vor.u32 %v4559_v49, %v4088_v16  ;;  %v6968_v16 = vmax.f32 %v5948_v52, %v5900_v5  ;;  %v4561_v52 = vld [vmem:[#allocation5 + $0x364] sm:$0xf] }
 0x1fc   : > { %v5994_v50 = vpop.permute.xlu2 %802  ;;  %6966 = vst [vmem:[#allocation151_spill] sm:$0xff] %v6000_v35 }
 0x1fd   : > { %v2502_v20 = vadd.f32 %v2501_v18, %v2333_v63  ;;  %v2166_v27 = vadd.f32 %v2165_v29, %v1997_v3  ;;  %6963 = vst [vmem:[#allocation148_spill] sm:$0xff] %v5994_v50  ;;  %v5998_v18 = vor.u32 %v4557_v39, %v4090_v8 }
 0x1fe   : > { %6964 = vst [vmem:[#allocation149_spill] sm:$0xff] %v5996_v33 }
 0x1ff   : > { %v5992_v6 = vmax.f32 %v2502_v20, %v6962_v31  ;;  %6965 = vst [vmem:[#allocation150_spill] sm:$0xff] %v5998_v18 }
 0x202   : > { %v2334_v45 = vpop.f32.mrf.mxu2  ;;  %v1999_v29 = vpop.f32.mrf.mxu0 }
 0x203   : > { %v2503_v55 = vpop.f32.mrf.mxu3  ;;  %v2335_v63 = vadd.f32 %v2334_v45, %v2166_v27  ;;  %v2168_v3 = vpop.f32.mrf.mxu1  ;;  %v2000_v20 = vadd.f32 %v1999_v29, %v5994_v50  ;;  %v4563_v29 = vld [vmem:[#allocation5 + $0x36c] sm:$0xf0]  ;;  %v4426_v50 = vld [vmem:[%s5139_s15 + $0x1e8] sm:$0xf0] }
 0x204   : > { %v6014_v27 = vpop.permute.xlu0 %807 }
 0x205   : > { %v2504_v31 = vadd.f32 %v2503_v55, %v2335_v63  ;;  %2038 = vmatmul.bf16.gmra.mxu0 %v5996_v33  ;;  %v2169_v54 = vadd.f32 %v2168_v3, %v2000_v20  ;;  %6969 = vst [vmem:[#allocation153_spill] sm:$0xff] %v6014_v27  ;;  %v4104_v63 = vld [vmem:[#allocation5 + $0x360] sm:$0xf]  ;;  %v4106_v3 = vld [vmem:[#allocation5 + $0x370] sm:$0xf0] }
 0x206   : > { %2207 = vmatmul.bf16.gmra.mxu1 %v5998_v18  ;;  %v4112_v20 = vld [vmem:[#allocation5 + $0x368] sm:$0xf]  ;;  %v4641_v33 = vld [vmem:[%s5139_s15 + $0x1e4] sm:$0xf] }
 0x207   : > { %v6010_v49 = vmax.f32 %v2504_v31, %v6968_v16  ;;  %2376 = vmatmul.bf16.gmra.mxu2 %v6000_v35  ;;  %v609_v31 = vld [vmem:[%s6634_s2 + $0x1a8] sm:$0xff]  ;;  %v4564_v16 = vld [vmem:[#allocation5 + $0x374] sm:$0xf0] }
 0x208   : > { %2545 = vmatmul.bf16.gmra.mxu3 %v6002_v41  ;;  %v4562_v41 = vld [vmem:[#allocation5 + $0x36c] sm:$0xf]  ;;  %887 = vperm.xlu2 %4743, %v609_v31   ;;  %v612_v31 = vld [vmem:[%s6634_s2 + $0x1c0] sm:$0xff] }
 0x209   : > { %902 = vperm.xlu0 %4741, %v612_v31   ;;  %v4565_v31 = vld [vmem:[#allocation5 + $0x384] sm:$0xf] }
 0x20a   : > { %v2337_v39 = vpop.f32.mrf.mxu2  ;;  %v2001_v47 = vpop.f32.mrf.mxu0 }
 0x20b   : > { %v2506_v8 = vpop.f32.mrf.mxu3  ;;  %v2338_v51 = vadd.f32 %v2337_v39, %v2169_v54  ;;  %v2170_v48 = vpop.f32.mrf.mxu1  ;;  %v2002_v37 = vadd.f32 %v2001_v47, %v6014_v27  ;;  %v4114_v54 = vld [vmem:[#allocation5 + $0x378] sm:$0xf0]  ;;  %v6024_v47 = vor.u32 %v4563_v29, %v4104_v63  ;;  %v6028_v27 = vor.u32 %v4564_v16, %v4112_v20 }
 0x20c   : > { %v6030_v35 = vor.u32 %v4562_v41, %v4114_v54  ;;  %v613_v41 = vld [vmem:[%s6634_s2 + $0x1c8] sm:$0xff] }
 0x20d   : > { %v2507_v45 = vadd.f32 %v2506_v8, %v2338_v51  ;;  %v2171_v55 = vadd.f32 %v2170_v48, %v2002_v37  ;;  %6970 = vst [vmem:[#allocation154_spill] sm:$0xff] %v6024_v47  ;;  %v6026_v48 = vor.u32 %v4561_v52, %v4106_v3  ;;  %907 = vperm.xlu1 %4742, %v613_v41   ;;  %v4566_v41 = vld [vmem:[#allocation5 + $0x38c] sm:$0xf] }
 0x20e   : > { %6972 = vst [vmem:[#allocation156_spill] sm:$0xff] %v6028_v27 }
 0x20f   : > { %v3260_v5 = vmax.f32 %v5597_v22, %v2507_v45  ;;  %6971 = vst [vmem:[#allocation155_spill] sm:$0xff] %v6026_v48 }
 0x210   : > { %6973 = vst [vmem:[#allocation157_spill] sm:$0xff] %v6030_v35 }
 0x211   : > { %v6022_v39 = vmax.f32 %v3260_v5, %v5966_v46 }
 0x212   : > { %v2339_v8 = vpop.f32.mrf.mxu2  ;;  %v2004_v37 = vpop.f32.mrf.mxu0 }
 0x213   : > { %v2508_v51 = vpop.f32.mrf.mxu3  ;;  %v2340_v22 = vadd.f32 %v2339_v8, %v2171_v55  ;;  %v2173_v45 = vpop.f32.mrf.mxu1  ;;  %v2005_v46 = vadd.f32 %v2004_v37, %v5494_v43  ;;  %v4567_v37 = vld [vmem:[#allocation5 + $0x38c] sm:$0xf0]  ;;  %v4128_v55 = vld [vmem:[#allocation5 + $0x388] sm:$0xf] }
 0x215   : > { %v6036_v5 = vadd.f32 %v2508_v51, %v2340_v22  ;;  %v2174_v63 = vadd.f32 %v2173_v45, %v2005_v46  ;;  %2043 = vmatmul.bf16.gmra.mxu0 %v6024_v47  ;;  %v4120_v22 = vld [vmem:[#allocation5 + $0x380] sm:$0xf]  ;;  %v4122_v46 = vld [vmem:[#allocation5 + $0x390] sm:$0xf0] }
 0x216   : > { %2212 = vmatmul.bf16.gmra.mxu1 %v6026_v48 }
 0x217   : > { %2381 = vmatmul.bf16.gmra.mxu2 %v6028_v27  ;;  %v4130_v27 = vld [vmem:[#allocation5 + $0x398] sm:$0xf0] }
 0x218   : > { %2550 = vmatmul.bf16.gmra.mxu3 %v6030_v35  ;;  %v4568_v35 = vld [vmem:[#allocation5 + $0x394] sm:$0xf0] }
 0x219   : > { %v6058_v45 = vor.u32 %v4568_v35, %v4128_v55  ;;  %v4611_v55 = vld [vmem:[%s5139_s15 + $0xf4] sm:$0xf]  ;;  %v4234_v35 = vld [vmem:[%s5139_s15 + $0x68] sm:$0xf0] }
 0x21a   : > { %v2342_v29 = vpop.f32.mrf.mxu2  ;;  %v2006_v20 = vpop.f32.mrf.mxu0 }
 0x21b   : > { %v2511_v52 = vpop.f32.mrf.mxu3  ;;  %v2343_v3 = vadd.f32 %v2342_v29, %v2174_v63  ;;  %v2175_v16 = vpop.f32.mrf.mxu1  ;;  %v2007_v54 = vadd.f32 %v2006_v20, %v5492_v42  ;;  %v6054_v20 = vor.u32 %v4567_v37, %v4120_v22  ;;  %6977 = vst [vmem:[#allocation161_spill] sm:$0xff] %v6058_v45  ;;  %v6060_v42 = vor.u32 %v4566_v41, %v4130_v27  ;;  %v4595_v22 = vld [vmem:[%s5139_s15 + $0x74] sm:$0xf]  ;;  %v4242_v27 = vld [vmem:[%s5139_s15 + $0x78] sm:$0xf0] }
 0x21c   : > { %v6052_v63 = vpop.permute.xlu1 %822  ;;  %v4245_v37 = vor.u32 %v4595_v22, %v4242_v27  ;;  %v4643_v41 = vld [vmem:[%s5139_s15 + $0x1f4] sm:$0xf] }
 0x21d   : > { %v6048_v8 = vadd.f32 %v2511_v52, %v2343_v3  ;;  %v2176_v51 = vadd.f32 %v2175_v16, %v2007_v54  ;;  %6974 = vst [vmem:[#allocation158_spill] sm:$0xff] %v6052_v63  ;;  %v6056_v52 = vor.u32 %v4565_v31, %v4122_v46  ;;  %v4627_v46 = vld [vmem:[%s5139_s15 + $0x174] sm:$0xf] }
 0x21e   : > { %6975 = vst [vmem:[#allocation159_spill] sm:$0xff] %v6054_v20  ;;  %2576 = vmatpush.bf16.msrb.mxu0 %v4245_v37  ;;  %v4429_v37 = vor.u32 %v4641_v33, %v4426_v50  ;;  %v4354_v50 = vld [vmem:[%s5139_s15 + $0x158] sm:$0xf0] }
 0x21f   : > { %6976 = vst [vmem:[#allocation160_spill] sm:$0xff] %v6056_v52 }
 0x220   : > { %6978 = vst [vmem:[#allocation162_spill] sm:$0xff] %v6060_v42 }
 0x222   : > { %v2344_v29 = vpop.f32.mrf.mxu2  ;;  %v2009_v16 = vpop.f32.mrf.mxu0 }
 0x223   : > { %v2513_v48 = vpop.f32.mrf.mxu3  ;;  %v2345_v3 = vadd.f32 %v2344_v29, %v2176_v51  ;;  %v2178_v54 = vpop.f32.mrf.mxu1  ;;  %v2010_v47 = vadd.f32 %v2009_v16, %v6052_v63  ;;  %v4434_v16 = vld [vmem:[%s5139_s15 + $0x1f8] sm:$0xf0] }
 0x224   : > { %v6078_v29 = vpop.permute.xlu2 %827  ;;  %v4437_v22 = vor.u32 %v4643_v41, %v4434_v16  ;;  %v4569_v41 = vld [vmem:[#allocation5 + $0x3a4] sm:$0xf]  ;;  %v4138_v16 = vld [vmem:[#allocation5 + $0x3b0] sm:$0xf0] }
 0x225   : > { %v6063_v43 = vadd.f32 %v2513_v48, %v2345_v3  ;;  %2048 = vmatmul.bf16.gmra.mxu0 %v6054_v20  ;;  %v2179_v51 = vadd.f32 %v2178_v54, %v2010_v47  ;;  %v4306_v48 = vld [vmem:[%s5139_s15 + $0xf8] sm:$0xf0]  ;;  %6979 = vst [vmem:[#allocation163_spill] sm:$0xff] %v6078_v29  ;;  %v4593_v54 = vld [vmem:[%s5139_s15 + $0x64] sm:$0xf] }
 0x226   : > { %2217 = vmatmul.bf16.gmra.mxu1 %v6056_v52  ;;  %v4309_v31 = vor.u32 %v4611_v55, %v4306_v48  ;;  %v4370_v47 = vld [vmem:[%s5139_s15 + $0x178] sm:$0xf0]  ;;  %v4237_v27 = vor.u32 %v4593_v54, %v4234_v35  ;;  %v4609_v55 = vld [vmem:[%s5139_s15 + $0xe4] sm:$0xf]  ;;  %v4298_v48 = vld [vmem:[%s5139_s15 + $0xe8] sm:$0xf0]  ;;  %3083 = vmatpush.bf16.msrb.mxu3 %v4437_v22 }
 0x227   : > { %2386 = vmatmul.bf16.gmra.mxu2 %v6058_v45  ;;  %v4373_v3 = vor.u32 %v4627_v46, %v4370_v47  ;;  %v4625_v52 = vld [vmem:[%s5139_s15 + $0x164] sm:$0xf]  ;;  %v4301_v46 = vor.u32 %v4609_v55, %v4298_v48  ;;  %v4362_v47 = vld [vmem:[%s5139_s15 + $0x168] sm:$0xf0]  ;;  %v4226_v54 = vld [vmem:[%s5139_s15 + $0x58] sm:$0xf0] }
 0x228   : > { %2555 = vmatmul.bf16.gmra.mxu3 %v6060_v42  ;;  %2745 = vmatpush.bf16.msrb.mxu1 %v4309_v31  ;;  %v4365_v35 = vor.u32 %v4625_v52, %v4362_v47  ;;  %v4607_v55 = vld [vmem:[%s5139_s15 + $0xd4] sm:$0xf]  ;;  %v4290_v22 = vld [vmem:[%s5139_s15 + $0xd8] sm:$0xf0] }
 0x229   : > { %2914 = vmatpush.bf16.msrb.mxu2 %v4373_v3  ;;  %v4591_v3 = vld [vmem:[%s5139_s15 + $0x54] sm:$0xf]  ;;  %2577 = vmatpush.bf16.msrb.mxu0 %v4237_v27  ;;  %v4146_v27 = vld [vmem:[#allocation5 + $0x3b8] sm:$0xf0] }
 0x22a   : > { %v2347_v42 = vpop.f32.mrf.mxu2  ;;  %v2011_v63 = vpop.f32.mrf.mxu0  ;;  %v4623_v52 = vld [vmem:[%s5139_s15 + $0x154] sm:$0xf]  ;;  %3084 = vmatpush.bf16.msrb.mxu3 %v4429_v37 }
 0x22b   : > { %v2516_v45 = vpop.f32.mrf.mxu3  ;;  %v2348_v20 = vadd.f32 %v2347_v42, %v2179_v51  ;;  %v2180_v18 = vpop.f32.mrf.mxu1  ;;  %v2012_v4 = vadd.f32 %v2011_v63, %v6078_v29  ;;  %v4136_v42 = vld [vmem:[#allocation5 + $0x3a0] sm:$0xf]  ;;  %v4571_v51 = vld [vmem:[#allocation5 + $0x3ac] sm:$0xf0]  ;;  %v4229_v63 = vor.u32 %v4591_v3, %v4226_v54  ;;  %v4357_v47 = vor.u32 %v4623_v52, %v4354_v50  ;;  %v4639_v29 = vld [vmem:[%s5139_s15 + $0x1d4] sm:$0xf] }
 0x22c   : > { %2746 = vmatpush.bf16.msrb.mxu1 %v4301_v46  ;;  %v4421_v46 = vor.u32 %v4639_v29, %v4418_v61  ;;  %v4589_v3 = vld [vmem:[%s5139_s15 + $0x44] sm:$0xf]  ;;  %v4218_v54 = vld [vmem:[%s5139_s15 + $0x48] sm:$0xf0] }
 0x22d   : > { %v6090_v31 = vadd.f32 %v2516_v45, %v2348_v20  ;;  %v2181_v48 = vadd.f32 %v2180_v18, %v2012_v4  ;;  %v4144_v45 = vld [vmem:[#allocation5 + $0x3a8] sm:$0xf]  ;;  %2915 = vmatpush.bf16.msrb.mxu2 %v4365_v35  ;;  %v4293_v20 = vor.u32 %v4607_v55, %v4290_v22  ;;  %v4572_v4 = vld [vmem:[#allocation5 + $0x3b4] sm:$0xf0]  ;;  %v4570_v18 = vld [vmem:[#allocation5 + $0x3ac] sm:$0xf]  ;;  %v6105_v35 = vor.u32 %v4571_v51, %v4136_v42 }
 0x22e   : > { %v6107_v55 = vor.u32 %v4569_v41, %v4138_v16  ;;  %2578 = vmatpush.bf16.msrb.mxu0 %v4229_v63  ;;  %v4282_v22 = vld [vmem:[%s5139_s15 + $0xc8] sm:$0xf0]  ;;  %v4621_v52 = vld [vmem:[%s5139_s15 + $0x144] sm:$0xf]  ;;  %v6112_v61 = vor.u32 %v4572_v4, %v4144_v45  ;;  %v6114_v29 = vor.u32 %v4570_v18, %v4146_v27  ;;  %3085 = vmatpush.bf16.msrb.mxu3 %v4421_v46  ;;  %v4619_v18 = vld [vmem:[%s5139_s15 + $0x134] sm:$0xf] }
 0x22f   : > { %6980 = vst [vmem:[#allocation164_spill] sm:$0xff] %v6105_v35  ;;  %v4346_v50 = vld [vmem:[%s5139_s15 + $0x148] sm:$0xf0]  ;;  %v4221_v41 = vor.u32 %v4589_v3, %v4218_v54  ;;  %v4285_v16 = vor.u32 %v4605_v23, %v4282_v22  ;;  %v4274_v23 = vld [vmem:[%s5139_s15 + $0xb8] sm:$0xf0] }
 0x230   : > { %6981 = vst [vmem:[#allocation165_spill] sm:$0xff] %v6107_v55  ;;  %2747 = vmatpush.bf16.msrb.mxu1 %v4293_v20  ;;  %v4410_v42 = vld [vmem:[%s5139_s15 + $0x1c8] sm:$0xf0]  ;;  %v4587_v20 = vld [vmem:[%s5139_s15 + $0x34] sm:$0xf] }
 0x231   : > { %6982 = vst [vmem:[#allocation166_spill] sm:$0xff] %v6112_v61  ;;  %2916 = vmatpush.bf16.msrb.mxu2 %v4357_v47  ;;  %v6984_v47 = vmax.f32 %v6036_v5, %v5986_v32  ;;  %v4338_v32 = vld [vmem:[%s5139_s15 + $0x138] sm:$0xf0]  ;;  %v4635_v5 = vld [vmem:[%s5139_s15 + $0x1b4] sm:$0xf]  ;;  %v617_v3 = vld [vmem:[%s6634_s2 + $0x1e8] sm:$0xff] }
 0x232   : > { %v2349_v7 = vpop.f32.mrf.mxu2  ;;  %v2014_v34 = vpop.f32.mrf.mxu0  ;;  %6983 = vst [vmem:[#allocation167_spill] sm:$0xff] %v6114_v29  ;;  %2579 = vmatpush.bf16.msrb.mxu0 %v4221_v41  ;;  %v4341_v27 = vor.u32 %v4619_v18, %v4338_v32  ;;  %v4402_v46 = vld [vmem:[%s5139_s15 + $0x1b8] sm:$0xf0]  ;;  %v4585_v54 = vld [vmem:[%s5139_s15 + $0x24] sm:$0xf]  ;;  %927 = vperm.xlu0 %4741, %v617_v3  }
 0x233   : > { %v2518_v33 = vpop.f32.mrf.mxu3  ;;  %v2350_v44 = vadd.f32 %v2349_v7, %v2181_v48  ;;  %v2183_v37 = vpop.f32.mrf.mxu1  ;;  %v2015_v51 = vadd.f32 %v2014_v34, %v5445_v62  ;;  %v4349_v7 = vor.u32 %v4621_v52, %v4346_v50  ;;  %v4413_v48 = vor.u32 %v4637_v25, %v4410_v42  ;;  %v4603_v25 = vld [vmem:[%s5139_s15 + $0xb4] sm:$0xf]  ;;  %v4601_v42 = vld [vmem:[%s5139_s15 + $0xa4] sm:$0xf]  ;;  %v4575_v32 = vld [vmem:[#allocation5 + $0x3cc] sm:$0xf0] }
 0x234   : > { %2748 = vmatpush.bf16.msrb.mxu1 %v4285_v16  ;;  %v4277_v4 = vor.u32 %v4603_v25, %v4274_v23  ;;  %v4405_v50 = vor.u32 %v4635_v5, %v4402_v46  ;;  %v4394_v23 = vld [vmem:[%s5139_s15 + $0x1a8] sm:$0xf0]  ;;  %v4573_v5 = vld [vmem:[#allocation5 + $0x3c4] sm:$0xf]  ;;  %v4154_v46 = vld [vmem:[#allocation5 + $0x3d0] sm:$0xf0] }
 0x235   : > { %v2519_v63 = vadd.f32 %v2518_v33, %v2350_v44  ;;  %v2184_v45 = vadd.f32 %v2183_v37, %v2015_v51  ;;  %2053 = vmatmul.bf16.gmra.mxu0 %v6105_v35  ;;  %v4210_v44 = vld [vmem:[%s5139_s15 + $0x38] sm:$0xf0]  ;;  %2917 = vmatpush.bf16.msrb.mxu2 %v4349_v7  ;;  %v4202_v37 = vld [vmem:[%s5139_s15 + $0x28] sm:$0xf0]  ;;  %v4617_v7 = vld [vmem:[%s5139_s15 + $0x124] sm:$0xf] }
 0x236   : > { %2222 = vmatmul.bf16.gmra.mxu1 %v6107_v55  ;;  %v4213_v33 = vor.u32 %v4587_v20, %v4210_v44  ;;  %3086 = vmatpush.bf16.msrb.mxu3 %v4413_v48  ;;  %v4266_v51 = vld [vmem:[%s5139_s15 + $0xa8] sm:$0xf0]  ;;  %v4633_v20 = vld [vmem:[%s5139_s15 + $0x1a4] sm:$0xf]  ;;  %v4205_v44 = vor.u32 %v4585_v54, %v4202_v37  ;;  %v4258_v37 = vld [vmem:[%s5139_s15 + $0x98] sm:$0xf0] }
 0x237   : > { %v6125_v34 = vmax.f32 %v2519_v63, %v6984_v47  ;;  %2391 = vmatmul.bf16.gmra.mxu2 %v6112_v61  ;;  %v4330_v48 = vld [vmem:[%s5139_s15 + $0x128] sm:$0xf0]  ;;  %v4269_v25 = vor.u32 %v4601_v42, %v4266_v51  ;;  %v4615_v42 = vld [vmem:[%s5139_s15 + $0x114] sm:$0xf]  ;;  %v4322_v51 = vld [vmem:[%s5139_s15 + $0x118] sm:$0xf0] }
 0x238   : > { %2560 = vmatmul.bf16.gmra.mxu3 %v6114_v29  ;;  %2580 = vmatpush.bf16.msrb.mxu0 %v4213_v33  ;;  %v4333_v3 = vor.u32 %v4617_v7, %v4330_v48  ;;  %v4583_v33 = vld [vmem:[%s5139_s15 + $0x14] sm:$0xf]  ;;  %v4574_v7 = vld [vmem:[#allocation5 + $0x3cc] sm:$0xf]  ;;  %v4162_v48 = vld [vmem:[#allocation5 + $0x3d8] sm:$0xf0] }
 0x239   : > { %2749 = vmatpush.bf16.msrb.mxu1 %v4277_v4  ;;  %2918 = vmatpush.bf16.msrb.mxu2 %v4341_v27  ;;  %v4599_v4 = vld [vmem:[%s5139_s15 + $0x94] sm:$0xf]  ;;  %v4386_v27 = vld [vmem:[%s5139_s15 + $0x198] sm:$0xf0] }
 0x23a   : > { %v2352_v22 = vpop.f32.mrf.mxu2  ;;  %v2016_v16 = vpop.f32.mrf.mxu0  ;;  %3087 = vmatpush.bf16.msrb.mxu3 %v4405_v50  ;;  %v4631_v29 = vld [vmem:[%s5139_s15 + $0x194] sm:$0xf]  ;;  %v4576_v50 = vld [vmem:[#allocation5 + $0x3d4] sm:$0xf0] }
 0x23b   : > { %v2521_v52 = vpop.f32.mrf.mxu3  ;;  %v2353_v41 = vadd.f32 %v2352_v22, %v2184_v45  ;;  %v2185_v63 = vpop.f32.mrf.mxu1  ;;  %v2017_v47 = vadd.f32 %v2016_v16, %v5504_v19  ;;  %v4152_v45 = vld [vmem:[#allocation5 + $0x3c0] sm:$0xf]  ;;  %v4397_v22 = vor.u32 %v4633_v20, %v4394_v23  ;;  %v4194_v16 = vld [vmem:[%s5139_s15 + $0x18] sm:$0xf0]  ;;  %v4160_v19 = vld [vmem:[#allocation5 + $0x3c8] sm:$0xf]  ;;  %v4261_v20 = vor.u32 %v4599_v4, %v4258_v37 }
 0x23c   : > { %2581 = vmatpush.bf16.msrb.mxu0 %v4205_v44  ;;  %v4581_v23 = vld [vmem:[%s5139_s15 + $0x4] sm:$0xf]  ;;  %v6166_v44 = vor.u32 %v4575_v32, %v4152_v45  ;;  %v4314_v4 = vld [vmem:[%s5139_s15 + $0x108] sm:$0xf0] }
 0x23d   : > { %v2522_v18 = vadd.f32 %v2521_v52, %v2353_v41  ;;  %v2186_v54 = vadd.f32 %v2185_v63, %v2017_v47  ;;  %v6985_v52 = vmax.f32 %v6048_v8, %v5992_v6  ;;  %2750 = vmatpush.bf16.msrb.mxu1 %v4269_v25  ;;  %v4197_v63 = vor.u32 %v4583_v33, %v4194_v16  ;;  %v6161_v47 = vpop.permute.xlu0 %842  ;;  %v4250_v33 = vld [vmem:[%s5139_s15 + $0x88] sm:$0xf0]  ;;  %v4613_v16 = vld [vmem:[%s5139_s15 + $0x104] sm:$0xf] }
 0x23e   : > { %2919 = vmatpush.bf16.msrb.mxu2 %v4333_v3  ;;  %3088 = vmatpush.bf16.msrb.mxu3 %v4397_v22  ;;  %v4325_v6 = vor.u32 %v4615_v42, %v4322_v51  ;;  %v4389_v8 = vor.u32 %v4631_v29, %v4386_v27  ;;  %6986 = vst [vmem:[#allocation168_spill] sm:$0xff] %v6166_v44  ;;  %v4629_v42 = vld [vmem:[%s5139_s15 + $0x184] sm:$0xf]  ;;  %v4378_v51 = vld [vmem:[%s5139_s15 + $0x188] sm:$0xf0] }
 0x23f   : > { %v6157_v41 = vmax.f32 %v2522_v18, %v6985_v52  ;;  %v4186_v18 = vld [vmem:[%s5139_s15 + $0x8] sm:$0xf0]  ;;  %v4597_v52 = vld [vmem:[%s5139_s15 + $0x84] sm:$0xf]  ;;  %v6168_v25 = vor.u32 %v4573_v5, %v4154_v46  ;;  %v6173_v22 = vor.u32 %v4576_v50, %v4160_v19  ;;  %v6175_v29 = vor.u32 %v4574_v7, %v4162_v48  ;;  %s360_s15 = scalar_lea.vmem [#allocation11], %s3669_s16 }
 0x240   : > { %2582 = vmatpush.bf16.msrb.mxu0 %v4197_v63  ;;  %v4189_v45 = vor.u32 %v4581_v23, %v4186_v18  ;;  %v4253_v32 = vor.u32 %v4597_v52, %v4250_v33  ;;  %v4317_v46 = vor.u32 %v4613_v16, %v4314_v4  ;;  %v4381_v62 = vor.u32 %v4629_v42, %v4378_v51  ;;  %v4579_v23 = vld [vmem:[#allocation5 + $0x3ec] sm:$0xf0]  ;;  %v4577_v52 = vld [vmem:[#allocation5 + $0x3e4] sm:$0xf]  ;;  %v4170_v33 = vld [vmem:[#allocation5 + $0x3f0] sm:$0xf0] }
 0x241   : > { %6987 = vst [vmem:[#allocation169_spill] sm:$0xff] %v6168_v25  ;;  %2751 = vmatpush.bf16.msrb.mxu1 %v4261_v20  ;;  %v6992_v18 = vmax.f32 %v6090_v31, %v6022_v39  ;;  %v4176_v16 = vld [vmem:[#allocation5 + $0x3e8] sm:$0xf]  ;;  %v4580_v4 = vld [vmem:[#allocation5 + $0x3f4] sm:$0xf0]  ;;  %s3542_s3 = sshll.u32 %s360_s15, 4  ;;  %s3543_s3 = int_to_ptr.vmem [resolvable:$true] %s3542_s3 }
 0x242   : > { %v2354_v61 = vpop.f32.mrf.mxu2  ;;  %v2019_v35 = vpop.f32.mrf.mxu0  ;;  %6988 = vst [vmem:[#allocation170_spill] sm:$0xff] %v6173_v22  ;;  %2920 = vmatpush.bf16.msrb.mxu2 %v4325_v6  ;;  %3089 = vmatpush.bf16.msrb.mxu3 %v4389_v8  ;;  %v4168_v8 = vld [vmem:[#allocation5 + $0x3e0] sm:$0xf] }
 0x243   : > { %v2523_v55 = vpop.f32.mrf.mxu3  ;;  %v2355_v37 = vadd.f32 %v2354_v61, %v2186_v54  ;;  %v2188_v3 = vpop.f32.mrf.mxu1  ;;  %6989 = vst [vmem:[#allocation171_spill] sm:$0xff] %v6175_v29  ;;  %v2020_v27 = vadd.f32 %v2019_v35, %v6161_v47  ;;  %v6990_v61 = vmax.f32 %v6063_v43, %v6010_v49  ;;  %v616_v43 = vld [vmem:[%s6634_s2 + $0x1e0] sm:$0xff] }
 0x244   : > { %2583 = vmatpush.bf16.msrb.mxu0 %v4189_v45  ;;  %v6189_v35 = vpop.permute.xlu1 %847  ;;  %922 = vperm.xlu2 %4743, %v616_v43   ;;  %v6202_v45 = vor.u32 %v4577_v52, %v4170_v33 }
 0x245   : > { %v2524_v5 = vadd.f32 %v2523_v55, %v2355_v37  ;;  %2058 = vmatmul.bf16.gmra.mxu0 %v6166_v44  ;;  %v2189_v19 = vadd.f32 %v2188_v3, %v2020_v27  ;;  %2752 = vmatpush.bf16.msrb.mxu1 %v4253_v32  ;;  %6991 = vst [vmem:[#allocation172_spill] sm:$0xff] %v6189_v35  ;;  %v4578_v37 = vld [vmem:[#allocation5 + $0x3ec] sm:$0xf]  ;;  %v4178_v3 = vld [vmem:[#allocation5 + $0x3f8] sm:$0xf0] }
 0x246   : > { %2227 = vmatmul.bf16.gmra.mxu1 %v6168_v25  ;;  %2921 = vmatpush.bf16.msrb.mxu2 %v4317_v46  ;;  %v6200_v27 = vor.u32 %v4579_v23, %v4168_v8  ;;  %6994 = vst [vmem:[#allocation174_spill] sm:$0xff] %v6202_v45  ;;  %v6206_v39 = vor.u32 %v4578_v37, %v4178_v3  ;;  %v7027_v44 = vld [vmem:[#allocation73_spill] sm:$0xff] }
 0x247   : > { %v6185_v54 = vmax.f32 %v2524_v5, %v6990_v61  ;;  %2396 = vmatmul.bf16.gmra.mxu2 %v6173_v22  ;;  %3090 = vmatpush.bf16.msrb.mxu3 %v4381_v62 }
 0x248   : > { %2565 = vmatmul.bf16.gmra.mxu3 %v6175_v29  ;;  %6993 = vst [vmem:[#allocation173_spill] sm:$0xff] %v6200_v27 }
 0x249   : > { %6996 = vst [vmem:[#allocation176_spill] sm:$0xff] %v6206_v39 }
 0x24a   : > { %v2357_v55 = vpop.f32.mrf.mxu2  ;;  %v2021_v48 = vpop.f32.mrf.mxu0 }
 0x24b   : > { %v2526_v50 = vpop.f32.mrf.mxu3  ;;  %v2358_v7 = vadd.f32 %v2357_v55, %v2189_v19  ;;  %v2190_v63 = vpop.f32.mrf.mxu1  ;;  %v2022_v49 = vadd.f32 %v2021_v48, %v6189_v35  ;;  %v6204_v19 = vor.u32 %v4580_v4, %v4176_v16 }
 0x24d   : > { %v2527_v20 = vadd.f32 %v2526_v50, %v2358_v7  ;;  %v2191_v6 = vadd.f32 %v2190_v63, %v2022_v49  ;;  %6995 = vst [vmem:[#allocation175_spill] sm:$0xff] %v6204_v19 }
 0x24f   : > { %v6198_v62 = vmax.f32 %v2527_v20, %v6992_v18  ;;  %v6216_v18 = vpop.permute.xlu2 %862 }
 0x250   : > { %6997 = vst [vmem:[#allocation177_spill] sm:$0xff] %v6216_v18 }
 0x252   : > { %v2359_v42 = vpop.f32.mrf.mxu2  ;;  %v2024_v5 = vpop.f32.mrf.mxu0 }
 0x253   : > { %v2528_v51 = vpop.f32.mrf.mxu3  ;;  %v2360_v32 = vadd.f32 %v2359_v42, %v2191_v6  ;;  %v2193_v46 = vpop.f32.mrf.mxu1  ;;  %v2025_v31 = vadd.f32 %v2024_v5, %v5502_v17 }
 0x255   : > { %v2529_v61 = vadd.f32 %v2528_v51, %v2360_v32  ;;  %v2194_v55 = vadd.f32 %v2193_v46, %v2025_v31  ;;  %2063 = vmatmul.bf16.gmra.mxu0 %v6200_v27 }
 0x256   : > { %2232 = vmatmul.bf16.gmra.mxu1 %v6202_v45 }
 0x257   : > { %v3350_v50 = vmax.f32 %v2529_v61, %v6125_v34  ;;  %2401 = vmatmul.bf16.gmra.mxu2 %v6204_v19 }
 0x258   : > { %2570 = vmatmul.bf16.gmra.mxu3 %v6206_v39 }
 0x25a   : > { %v2362_v7 = vpop.f32.mrf.mxu2  ;;  %v2026_v43 = vpop.f32.mrf.mxu0 }
 0x25b   : > { %v2531_v48 = vpop.f32.mrf.mxu3  ;;  %v2363_v63 = vadd.f32 %v2362_v7, %v2194_v55  ;;  %v2195_v49 = vpop.f32.mrf.mxu1  ;;  %v2027_v20 = vadd.f32 %v2026_v43, %v5464_v36  ;;  %v7026_v36 = vld [vmem:[#allocation42_spill] sm:$0xff] }
 0x25d   : > { %v2532_v6 = vadd.f32 %v2531_v48, %v2363_v63  ;;  %v2196_v8 = vadd.f32 %v2195_v49, %v2027_v20 }
 0x25f   : > { %v3352_v23 = vmax.f32 %v2532_v6, %v6157_v41  ;;  %v6224_v41 = vpop.permute.xlu0 %867 }
 0x260   : > { %6998 = vst [vmem:[#allocation178_spill] sm:$0xff] %v6224_v41 }
 0x262   : > { %v2364_v52 = vpop.f32.mrf.mxu2  ;;  %v2029_v16 = vpop.f32.mrf.mxu0 }
 0x263   : > { %v2533_v33 = vpop.f32.mrf.mxu3  ;;  %v2365_v34 = vadd.f32 %v2364_v52, %v2196_v8  ;;  %v2198_v4 = vpop.f32.mrf.mxu1  ;;  %v2030_v37 = vadd.f32 %v2029_v16, %v6216_v18  ;;  %v6999_v8 = vld [vmem:[#allocation16_spill] sm:$0xff]  ;;  %v7025_v18 = vld [vmem:[#allocation41_spill] sm:$0xff] }
 0x265   : > { %v2534_v3 = vadd.f32 %v2533_v33, %v2365_v34  ;;  %2584 = vmatmul.bf16.vlgmr.msrb.gmra.mxu0 %v5262_v56  ;;  %v2199_v42 = vadd.f32 %v2198_v4, %v2030_v37  ;;  %v7000_v4 = vld [vmem:[#allocation70_spill] sm:$0xff] }
 0x266   : > { %2753 = vmatmul.bf16.vlgmr.msrb.gmra.mxu1 %v5264_v57 }
 0x267   : > { %v3354_v51 = vmax.f32 %v2534_v3, %v6185_v54  ;;  %2922 = vmatmul.bf16.vlgmr.msrb.gmra.mxu2 %v5266_v58 }
 0x268   : > { %3091 = vmatmul.bf16.vlgmr.msrb.gmra.mxu3 %v5268_v59 }
 0x26a   : > { %v2367_v32 = vpop.f32.mrf.mxu2  ;;  %v2031_v31 = vpop.f32.mrf.mxu0 }
 0x26b   : > { %v2536_v5 = vpop.f32.mrf.mxu3  ;;  %v2368_v46 = vadd.f32 %v2367_v32, %v2199_v42  ;;  %v2200_v61 = vpop.f32.mrf.mxu1  ;;  %v2032_v55 = vadd.f32 %v2031_v31, %v6224_v41 }
 0x26d   : > { %v2537_v7 = vadd.f32 %v2536_v5, %v2368_v46  ;;  %v2201_v56 = vadd.f32 %v2200_v61, %v2032_v55  ;;  %v7002_v55 = vld [vmem:[#allocation17_spill] sm:$0xff] }
 0x26f   : > { %v3308_v57 = vmax.f32 %v2537_v7, %v6198_v62  ;;  %v7003_v7 = vld [vmem:[#allocation18_spill] sm:$0xff] }
 0x272   : > { %v2369_v48 = vpop.f32.mrf.mxu2  ;;  %v2034_v43 = vpop.f32.mrf.mxu0 }
 0x273   : > { %v2538_v63 = vpop.f32.mrf.mxu3  ;;  %v2370_v54 = vadd.f32 %v2369_v48, %v2201_v56  ;;  %v2203_v58 = vpop.f32.mrf.mxu1  ;;  %v2035_v59 = vadd.f32 %v2034_v43, %v5534_v24 }
 0x275   : > { %v2539_v49 = vadd.f32 %v2538_v63, %v2370_v54  ;;  %v2204_v20 = vadd.f32 %v2203_v58, %v2035_v59  ;;  %2589 = vmatmul.bf16.gmra.mxu0 %v5292_v10  ;;  %v6238_v10 = vpop.permute.xlu1 %882  ;;  %v7004_v63 = vld [vmem:[#allocation19_spill] sm:$0xff]  ;;  %v6247_v54 = vpop.permute.xlu2 %887 }
 0x276   : > { %2758 = vmatmul.bf16.gmra.mxu1 %v5294_v11  ;;  %7001 = vst [vmem:[#allocation16_spill] sm:$0xff] %v6238_v10 }
 0x277   : > { %v6231_v6 = vmax.f32 %v2539_v49, %v3350_v50  ;;  %2927 = vmatmul.bf16.gmra.mxu2 %v5296_v12  ;;  %7006 = vst [vmem:[#allocation17_spill] sm:$0xff] %v6247_v54 }
 0x278   : > { %3096 = vmatmul.bf16.gmra.mxu3 %v6999_v8 }
 0x27a   : > { %v2372_v62 = vpop.f32.mrf.mxu2  ;;  %v2036_v34 = vpop.f32.mrf.mxu0 }
 0x27b   : > { %v2541_v52 = vpop.f32.mrf.mxu3  ;;  %v2373_v33 = vadd.f32 %v2372_v62, %v2204_v20  ;;  %v2205_v16 = vpop.f32.mrf.mxu1  ;;  %v2037_v37 = vadd.f32 %v2036_v34, %v7000_v4 }
 0x27d   : > { %v2542_v3 = vadd.f32 %v2541_v52, %v2373_v33  ;;  %v2206_v42 = vadd.f32 %v2205_v16, %v2037_v37 }
 0x27f   : > { %v6236_v32 = vmax.f32 %v2542_v3, %v3352_v23  ;;  %v7005_v23 = vld [vmem:[#allocation20_spill] sm:$0xff]  ;;  %v6285_v4 = vpop.permute.xlu1 %907 }
 0x280   : > { %7021 = vst [vmem:[#allocation19_spill] sm:$0xff] %v6285_v4 }
 0x282   : > { %v2374_v11 = vpop.f32.mrf.mxu2  ;;  %v2039_v46 = vpop.f32.mrf.mxu0 }
 0x283   : > { %v2543_v50 = vpop.f32.mrf.mxu3  ;;  %v2375_v5 = vadd.f32 %v2374_v11, %v2206_v42  ;;  %v2208_v12 = vpop.f32.mrf.mxu1  ;;  %v2040_v31 = vadd.f32 %v2039_v46, %v6238_v10  ;;  %v7007_v42 = vld [vmem:[#allocation53_spill] sm:$0xff] }
 0x284   : > { %v7008_v46 = vld [vmem:[#allocation21_spill] sm:$0xff] }
 0x285   : > { %v2544_v61 = vadd.f32 %v2543_v50, %v2375_v5  ;;  %2594 = vmatmul.bf16.gmra.mxu0 %v7002_v55  ;;  %v2209_v56 = vadd.f32 %v2208_v12, %v2040_v31  ;;  %v7009_v12 = vld [vmem:[#allocation22_spill] sm:$0xff] }
 0x286   : > { %2763 = vmatmul.bf16.gmra.mxu1 %v7003_v7 }
 0x287   : > { %v6243_v48 = vmax.f32 %v2544_v61, %v3354_v51  ;;  %2932 = vmatmul.bf16.gmra.mxu2 %v7004_v63  ;;  %v7010_v61 = vld [vmem:[#allocation23_spill] sm:$0xff] }
 0x288   : > { %3101 = vmatmul.bf16.gmra.mxu3 %v7005_v23 }
 0x28a   : > { %v2377_v43 = vpop.f32.mrf.mxu2  ;;  %v2041_v49 = vpop.f32.mrf.mxu0 }
 0x28b   : > { %v2546_v58 = vpop.f32.mrf.mxu3  ;;  %v2378_v59 = vadd.f32 %v2377_v43, %v2209_v56  ;;  %v2210_v20 = vpop.f32.mrf.mxu1  ;;  %v2042_v8 = vadd.f32 %v2041_v49, %v6247_v54 }
 0x28d   : > { %v2547_v62 = vadd.f32 %v2546_v58, %v2378_v59  ;;  %v2211_v52 = vadd.f32 %v2210_v20, %v2042_v8  ;;  %v6283_v58 = vpop.permute.xlu0 %902 }
 0x28e   : > { %7020 = vst [vmem:[#allocation18_spill] sm:$0xff] %v6283_v58 }
 0x28f   : > { %v6250_v33 = vmax.f32 %v2547_v62, %v3308_v57  ;;  %v7011_v57 = vld [vmem:[#allocation24_spill] sm:$0xff]  ;;  %v7012_v62 = vld [vmem:[#allocation25_spill] sm:$0xff] }
 0x292   : > { %v2379_v34 = vpop.f32.mrf.mxu2  ;;  %v2044_v37 = vpop.f32.mrf.mxu0 }
 0x293   : > { %v2548_v51 = vpop.f32.mrf.mxu3  ;;  %v2380_v16 = vadd.f32 %v2379_v34, %v2211_v52  ;;  %v2213_v3 = vpop.f32.mrf.mxu1  ;;  %v2045_v11 = vadd.f32 %v2044_v37, %v7007_v42  ;;  %v7013_v52 = vld [vmem:[#allocation26_spill] sm:$0xff]  ;;  %v7014_v34 = vld [vmem:[#allocation27_spill] sm:$0xff] }
 0x295   : > { %v6253_v50 = vadd.f32 %v2548_v51, %v2380_v16  ;;  %v2214_v5 = vadd.f32 %v2213_v3, %v2045_v11  ;;  %2599 = vmatmul.bf16.gmra.mxu0 %v7008_v46  ;;  %v7015_v51 = vld [vmem:[#allocation28_spill] sm:$0xff] }
 0x296   : > { %2768 = vmatmul.bf16.gmra.mxu1 %v7009_v12 }
 0x297   : > { %2937 = vmatmul.bf16.gmra.mxu2 %v7010_v61 }
 0x298   : > { %3106 = vmatmul.bf16.gmra.mxu3 %v7011_v57  ;;  %v7016_v57 = vld [vmem:[#allocation30_spill] sm:$0xff] }
 0x29a   : > { %v2382_v55 = vpop.f32.mrf.mxu2  ;;  %v6261_v63 = vpop.f32.mrf.mxu0 }
 0x29b   : > { %v2551_v7 = vpop.f32.mrf.mxu3  ;;  %v2383_v56 = vadd.f32 %v2382_v55, %v2214_v5  ;;  %v6263_v23 = vpop.f32.mrf.mxu1  ;;  %v7017_v55 = vld [vmem:[#allocation31_spill] sm:$0xff] }
 0x29d   : > { %v6265_v43 = vadd.f32 %v2551_v7, %v2383_v56  ;;  %v7018_v7 = vld [vmem:[#allocation32_spill] sm:$0xff]  ;;  %v7019_v56 = vld [vmem:[#allocation33_spill] sm:$0xff] }
 0x2a2   : > { %v6269_v59 = vpop.f32.mrf.mxu2  ;;  %v2049_v20 = vpop.f32.mrf.mxu0 }
 0x2a3   : > { %v6271_v49 = vpop.f32.mrf.mxu3  ;;  %v2218_v8 = vpop.f32.mrf.mxu1 }
 0x2a4   : > { %v6296_v19 = vpop.permute.xlu0 %927 }
 0x2a5   : > { %2604 = vmatmul.bf16.gmra.mxu0 %v7012_v62 }
 0x2a6   : > { %2773 = vmatmul.bf16.gmra.mxu1 %v7013_v52 }
 0x2a7   : > { %2942 = vmatmul.bf16.gmra.mxu2 %v7014_v34 }
 0x2a8   : > { %3111 = vmatmul.bf16.gmra.mxu3 %v7015_v51 }
 0x2aa   : > { %v2387_v16 = vpop.f32.mrf.mxu2  ;;  %v2051_v3 = vpop.f32.mrf.mxu0 }
 0x2ab   : > { %v2556_v37 = vpop.f32.mrf.mxu3  ;;  %v2220_v11 = vpop.f32.mrf.mxu1  ;;  %v2052_v24 = vadd.f32 %v2051_v3, %v6285_v4 }
 0x2ad   : > { %v2221_v17 = vadd.f32 %v2220_v11, %v2052_v24  ;;  %v2047_v24 = vadd.f32 %v6261_v63, %v7027_v44  ;;  %v7034_v63 = vld [vmem:[#allocation49_spill] sm:$0xff] }
 0x2b2   : > { %v2389_v5 = vpop.f32.mrf.mxu2  ;;  %v2054_v12 = vpop.f32.mrf.mxu0 }
 0x2b3   : > { %v2558_v46 = vpop.f32.mrf.mxu3  ;;  %v2223_v61 = vpop.f32.mrf.mxu1  ;;  %v2390_v29 = vadd.f32 %v2389_v5, %v2221_v17  ;;  %v7028_v17 = vmax.f32 %v6253_v50, %v6231_v6  ;;  %v7033_v5 = vld [vmem:[#allocation79_spill] sm:$0xff]  ;;  %v2216_v6 = vadd.f32 %v6263_v23, %v2047_v24 }
 0x2b5   : > { %2609 = vmatmul.bf16.gmra.mxu0 %v7016_v57  ;;  %v6287_v57 = vpop.permute.xlu2 %922 }
 0x2b6   : > { %2778 = vmatmul.bf16.gmra.mxu1 %v7017_v55  ;;  %7022 = vst [vmem:[#allocation20_spill] sm:$0xff] %v6287_v57  ;;  %v2050_v55 = vadd.f32 %v2049_v20, %v6283_v58 }
 0x2b7   : > { %2947 = vmatmul.bf16.gmra.mxu2 %v7018_v7  ;;  %v7023_v7 = vld [vmem:[#allocation39_spill] sm:$0xff] }
 0x2b8   : > { %3116 = vmatmul.bf16.gmra.mxu3 %v7019_v56  ;;  %v7024_v56 = vld [vmem:[#allocation40_spill] sm:$0xff]  ;;  %v2219_v39 = vadd.f32 %v2218_v8, %v2050_v55 }
 0x2ba   : > { %v2392_v62 = vpop.f32.mrf.mxu2  ;;  %v2056_v34 = vpop.f32.mrf.mxu0 }
 0x2bb   : > { %v6281_v52 = vpop.f32.mrf.mxu3  ;;  %v2225_v51 = vpop.f32.mrf.mxu1 }
 0x2c2   : > { %v2394_v31 = vpop.f32.mrf.mxu2  ;;  %v2059_v54 = vpop.f32.mrf.mxu0 }
 0x2c3   : > { %v2563_v42 = vpop.f32.mrf.mxu3  ;;  %v2228_v10 = vpop.f32.mrf.mxu1  ;;  %v2060_v41 = vadd.f32 %v2059_v54, %v6287_v57  ;;  %v2559_v54 = vadd.f32 %v2558_v46, %v2390_v29  ;;  %v7030_v29 = vld [vmem:[#allocation60_spill] sm:$0xff] }
 0x2c5   : > { %2614 = vmatmul.bf16.gmra.mxu0 %v7023_v7  ;;  %v2229_v35 = vadd.f32 %v2228_v10, %v2060_v41  ;;  %v2388_v7 = vadd.f32 %v2387_v16, %v2219_v39  ;;  %v3358_v39 = vmax.f32 %v2559_v54, %v7028_v17  ;;  %v7029_v10 = vld [vmem:[#allocation72_spill] sm:$0xff]  ;;  %v7031_v16 = vld [vmem:[#allocation47_spill] sm:$0xff] }
 0x2c6   : > { %2783 = vmatmul.bf16.gmra.mxu1 %v7024_v56 }
 0x2c7   : > { %2952 = vmatmul.bf16.gmra.mxu2 %v7025_v18  ;;  %v2557_v4 = vadd.f32 %v2556_v37, %v2388_v7 }
 0x2c8   : > { %3121 = vmatmul.bf16.gmra.mxu3 %v7026_v36 }
 0x2c9   : > { %v3356_v41 = vmax.f32 %v2557_v4, %v6250_v33  ;;  %v7035_v4 = vld [vmem:[#allocation50_spill] sm:$0xff] }
 0x2ca   : > { %v2397_v45 = vpop.f32.mrf.mxu2  ;;  %v2061_v20 = vpop.f32.mrf.mxu0 }
 0x2cb   : > { %v2566_v27 = vpop.f32.mrf.mxu3  ;;  %v2230_v58 = vpop.f32.mrf.mxu1  ;;  %v2062_v56 = vadd.f32 %v2061_v20, %v6296_v19  ;;  %v2398_v3 = vadd.f32 %v2397_v45, %v2229_v35  ;;  %v2055_v35 = vadd.f32 %v2054_v12, %v7029_v10 }
 0x2cd   : > { %v2231_v57 = vadd.f32 %v2230_v58, %v2062_v56  ;;  %v2567_v36 = vadd.f32 %v2566_v27, %v2398_v3  ;;  %v2057_v58 = vadd.f32 %v2056_v34, %v7030_v29  ;;  %v7032_v27 = vld [vmem:[#allocation48_spill] sm:$0xff]  ;;  %v2224_v33 = vadd.f32 %v2223_v61, %v2055_v35 }
 0x2ce   : > { %v2385_v34 = vadd.f32 %v6269_v59, %v2216_v6 }
 0x2cf   : > { %v3364_v37 = vmax.f32 %v2567_v36, %v3356_v41  ;;  %v2393_v3 = vadd.f32 %v2392_v62, %v2224_v33 }
 0x2d1   : > { %v2562_v41 = vadd.f32 %v6281_v52, %v2393_v3  ;;  %v7039_v52 = vld [vmem:[#allocation56_spill] sm:$0xff] }
 0x2d2   : > { %v2399_v18 = vpop.f32.mrf.mxu2  ;;  %v2064_v55 = vpop.f32.mrf.mxu0 }
 0x2d3   : > { %v2568_v22 = vpop.f32.mrf.mxu3  ;;  %v2400_v8 = vadd.f32 %v2399_v18, %v2231_v57  ;;  %v2233_v25 = vpop.f32.mrf.mxu1  ;;  %v2065_v46 = vadd.f32 %v2064_v55, %v7033_v5  ;;  %v2226_v57 = vadd.f32 %v2225_v51, %v2057_v58  ;;  %v7036_v18 = vld [vmem:[#allocation78_spill] sm:$0xff] }
 0x2d5   : > { %v2569_v45 = vadd.f32 %v2568_v22, %v2400_v8  ;;  %2619 = vmatmul.bf16.gmra.mxu0 %v7031_v16  ;;  %v2234_v20 = vadd.f32 %v2233_v25, %v2065_v46  ;;  %v2395_v54 = vadd.f32 %v2394_v31, %v2226_v57  ;;  %v2554_v8 = vadd.f32 %v6271_v49, %v2385_v34  ;;  %v7042_v46 = vld [vmem:[#allocation59_spill] sm:$0xff] }
 0x2d6   : > { %2788 = vmatmul.bf16.gmra.mxu1 %v7032_v27  ;;  %v7038_v31 = vmax.f32 %v6265_v43, %v6236_v32 }
 0x2d7   : > { %v3366_v11 = vmax.f32 %v2569_v45, %v3358_v39  ;;  %2957 = vmatmul.bf16.gmra.mxu2 %v7034_v63  ;;  %v2564_v23 = vadd.f32 %v2563_v42, %v2395_v54  ;;  %v3346_v39 = vmax.f32 %v2554_v8, %v6243_v48  ;;  %v7037_v45 = vld [vmem:[#allocation63_spill] sm:$0xff]  ;;  %v7040_v42 = vld [vmem:[#allocation57_spill] sm:$0xff]  ;;  %v7041_v48 = vld [vmem:[#allocation58_spill] sm:$0xff] }
 0x2d8   : > { %3126 = vmatmul.bf16.gmra.mxu3 %v7035_v4  ;;  %v3360_v58 = vmax.f32 %v2562_v41, %v7038_v31  ;;  %v7043_v54 = vld [vmem:[#allocation35_spill] sm:$0xff]  ;;  %v7044_v41 = vld [vmem:[#allocation66_spill] sm:$0xff] }
 0x2d9   : > { %v3378_v50 = vpack.c.bf16 %v3366_v11, %v3364_v37  ;;  %v3362_v49 = vmax.f32 %v2564_v23, %v3346_v39  ;;  %v7045_v23 = vld [vmem:[#allocation67_spill] sm:$0xff] }
 0x2da   : > { %v2402_v12 = vpop.f32.mrf.mxu2  ;;  %v2066_v7 = vpop.f32.mrf.mxu0 }
 0x2db   : > { %v2571_v22 = vpop.f32.mrf.mxu3  ;;  %v2235_v56 = vpop.f32.mrf.mxu1  ;;  %v2067_v36 = vadd.f32 %v2066_v7, %v7036_v18  ;;  %v2403_v55 = vadd.f32 %v2402_v12, %v2234_v20 }
 0x2dd   : > { %v2236_v61 = vadd.f32 %v2235_v56, %v2067_v36  ;;  %v2572_v59 = vadd.f32 %v2571_v22, %v2403_v55 }
 0x2df   : > { %v3368_v37 = vmax.f32 %v2572_v59, %v3360_v58 }
 0x2e2   : > { %v2404_v24 = vpop.f32.mrf.mxu2  ;;  %v2585_v25 = vpop.f32.mrf.mxu0 }
 0x2e3   : > { %v2573_v17 = vpop.f32.mrf.mxu3  ;;  %v2405_v51 = vadd.f32 %v2404_v24, %v2236_v61  ;;  %v2754_v35 = vpop.f32.mrf.mxu1  ;;  %v2586_v62 = vadd.f32 %v2585_v25, %v7037_v45  ;;  %v7046_v61 = vld [vmem:[#allocation68_spill] sm:$0xff] }
 0x2e5   : > { %v2574_v16 = vadd.f32 %v2573_v17, %v2405_v51  ;;  %v2755_v27 = vadd.f32 %v2754_v35, %v2586_v62  ;;  %2624 = vmatmul.bf16.gmra.mxu0 %v7039_v52  ;;  %v7048_v51 = vld [vmem:[#allocation38_spill] sm:$0xff] }
 0x2e6   : > { %2793 = vmatmul.bf16.gmra.mxu1 %v7040_v42 }
 0x2e7   : > { %v3370_v11 = vmax.f32 %v2574_v16, %v3362_v49  ;;  %2962 = vmatmul.bf16.gmra.mxu2 %v7041_v48  ;;  %v7051_v48 = vld [vmem:[#allocation75_spill] sm:$0xff] }
 0x2e8   : > { %3131 = vmatmul.bf16.gmra.mxu3 %v7042_v46  ;;  %v7052_v46 = vld [vmem:[#allocation76_spill] sm:$0xff] }
 0x2e9   : > { %v3380_v63 = vpack.c.bf16 %v3370_v11, %v3368_v37  ;;  %v7050_v11 = vld [vmem:[#allocation74_spill] sm:$0xff] }
 0x2ea   : > { %v2923_v4 = vpop.f32.mrf.mxu2  ;;  %v2587_v12 = vpop.f32.mrf.mxu0 }
 0x2eb   : > { %v3092_v6 = vpop.f32.mrf.mxu3  ;;  %v2924_v33 = vadd.f32 %v2923_v4, %v2755_v27  ;;  %v2756_v32 = vpop.f32.mrf.mxu1  ;;  %3407 = vmatpush.bf16.msra.mxu0 %v3380_v63  ;;  %v2588_v43 = vadd.f32 %v2587_v12, %v5569_v21  ;;  %v7047_v21 = vld [vmem:[#allocation69_spill] sm:$0xff] }
 0x2ec   : > { %v7049_v27 = vld [vmem:[#allocation81_spill] sm:$0xff] }
 0x2ed   : > { %v6327_v22 = vadd.f32 %v3092_v6, %v2924_v33  ;;  %v2757_v34 = vadd.f32 %v2756_v32, %v2588_v43  ;;  %v7053_v63 = vld [vmem:[#allocation77_spill] sm:$0xff]  ;;  %v7054_v43 = vld [vmem:[#allocation80_spill] sm:$0xff] }
 0x2ef   : > { %3408 = vmatpush.bf16.msra.mxu0 %v3378_v50 }
 0x2f2   : > { %v2925_v57 = vpop.f32.mrf.mxu2  ;;  %v2590_v56 = vpop.f32.mrf.mxu0 }
 0x2f3   : > { %v3094_v20 = vpop.f32.mrf.mxu3  ;;  %v2926_v7 = vadd.f32 %v2925_v57, %v2757_v34  ;;  %v2759_v3 = vpop.f32.mrf.mxu1  ;;  %v2591_v36 = vadd.f32 %v2590_v56, %v7043_v54 }
 0x2f5   : > { %v6330_v8 = vadd.f32 %v3094_v20, %v2926_v7  ;;  %v2760_v55 = vadd.f32 %v2759_v3, %v2591_v36  ;;  %2629 = vmatmul.bf16.gmra.mxu0 %v7044_v41 }
 0x2f6   : > { %2798 = vmatmul.bf16.gmra.mxu1 %v7045_v23 }
 0x2f7   : > { %2967 = vmatmul.bf16.gmra.mxu2 %v7046_v61 }
 0x2f8   : > { %3136 = vmatmul.bf16.gmra.mxu3 %v7047_v21 }
 0x2fa   : > { %v2928_v24 = vpop.f32.mrf.mxu2  ;;  %v2592_v39 = vpop.f32.mrf.mxu0 }
 0x2fb   : > { %v3097_v50 = vpop.f32.mrf.mxu3  ;;  %v2929_v17 = vadd.f32 %v2928_v24, %v2760_v55  ;;  %v2761_v59 = vpop.f32.mrf.mxu1  ;;  %v2593_v25 = vadd.f32 %v2592_v39, %v7048_v51 }
 0x2fd   : > { %v6337_v35 = vadd.f32 %v3097_v50, %v2929_v17  ;;  %v2762_v45 = vadd.f32 %v2761_v59, %v2593_v25  ;;  %v7055_v59 = vld [vmem:[#allocation37_spill] sm:$0xff] }
 0x302   : > { %v2930_v62 = vpop.f32.mrf.mxu2  ;;  %v2595_v49 = vpop.f32.mrf.mxu0 }
 0x303   : > { %v3099_v31 = vpop.f32.mrf.mxu3  ;;  %v2931_v58 = vadd.f32 %v2930_v62, %v2762_v45  ;;  %v2764_v16 = vpop.f32.mrf.mxu1  ;;  %v2596_v52 = vadd.f32 %v2595_v49, %v7049_v27  ;;  %v7058_v27 = vld [vmem:[#allocation84_spill] sm:$0xff] }
 0x305   : > { %v6340_v42 = vadd.f32 %v3099_v31, %v2931_v58  ;;  %v2765_v37 = vadd.f32 %v2764_v16, %v2596_v52  ;;  %2634 = vmatmul.bf16.gmra.mxu0 %v7050_v11  ;;  %v7056_v58 = vld [vmem:[#allocation82_spill] sm:$0xff]  ;;  %v7057_v16 = vld [vmem:[#allocation83_spill] sm:$0xff] }
 0x306   : > { %2803 = vmatmul.bf16.gmra.mxu1 %v7051_v48  ;;  %v7060_v11 = vld [vmem:[#allocation86_spill] sm:$0xff] }
 0x307   : > { %2972 = vmatmul.bf16.gmra.mxu2 %v7052_v46 }
 0x308   : > { %3141 = vmatmul.bf16.gmra.mxu3 %v7053_v63 }
 0x30a   : > { %v2933_v4 = vpop.f32.mrf.mxu2  ;;  %v2597_v12 = vpop.f32.mrf.mxu0 }
 0x30b   : > { %v3102_v6 = vpop.f32.mrf.mxu3  ;;  %v2934_v33 = vadd.f32 %v2933_v4, %v2765_v37  ;;  %v2766_v32 = vpop.f32.mrf.mxu1  ;;  %v2598_v34 = vadd.f32 %v2597_v12, %v7054_v43  ;;  %v7059_v37 = vld [vmem:[#allocation85_spill] sm:$0xff] }
 0x30d   : > { %v3103_v57 = vadd.f32 %v3102_v6, %v2934_v33  ;;  %v2767_v20 = vadd.f32 %v2766_v32, %v2598_v34  ;;  %v7061_v6 = vld [vmem:[#allocation87_spill] sm:$0xff] }
 0x30f   : > { %v3253_v7 = vmax.f32 %v6327_v22, %v3103_v57 }
 0x312   : > { %v2935_v56 = vpop.f32.mrf.mxu2  ;;  %v2600_v36 = vpop.f32.mrf.mxu0 }
 0x313   : > { %v3104_v3 = vpop.f32.mrf.mxu3  ;;  %v2936_v54 = vadd.f32 %v2935_v56, %v2767_v20  ;;  %v2769_v55 = vpop.f32.mrf.mxu1  ;;  %v2601_v41 = vadd.f32 %v2600_v36, %v5405_v26 }
 0x315   : > { %v3105_v23 = vadd.f32 %v3104_v3, %v2936_v54  ;;  %v2770_v61 = vadd.f32 %v2769_v55, %v2601_v41  ;;  %2639 = vmatmul.bf16.gmra.mxu0 %v5575_v0  ;;  %v7062_v55 = vld [vmem:[#allocation88_spill] sm:$0xff]  ;;  %v7063_v41 = vld [vmem:[#allocation89_spill] sm:$0xff] }
 0x316   : > { %2808 = vmatmul.bf16.gmra.mxu1 %v5577_v30 }
 0x317   : > { %v3255_v21 = vmax.f32 %v6330_v8, %v3105_v23  ;;  %2977 = vmatmul.bf16.gmra.mxu2 %v5579_v13 }
 0x318   : > { %3146 = vmatmul.bf16.gmra.mxu3 %v5581_v2 }
 0x31a   : > { %v2938_v22 = vpop.f32.mrf.mxu2  ;;  %v2602_v17 = vpop.f32.mrf.mxu0 }
 0x31b   : > { %v3107_v24 = vpop.f32.mrf.mxu3  ;;  %v2939_v50 = vadd.f32 %v2938_v22, %v2770_v61  ;;  %v2771_v39 = vpop.f32.mrf.mxu1  ;;  %v2603_v51 = vadd.f32 %v2602_v17, %v7055_v59  ;;  %v7064_v61 = vld [vmem:[#allocation90_spill] sm:$0xff]  ;;  %v7065_v22 = vld [vmem:[#allocation91_spill] sm:$0xff]  ;;  %v7066_v59 = vld [vmem:[#allocation29_spill] sm:$0xff] }
 0x31d   : > { %v3108_v26 = vadd.f32 %v3107_v24, %v2939_v50  ;;  %v2772_v25 = vadd.f32 %v2771_v39, %v2603_v51 }
 0x31f   : > { %v3257_v45 = vmax.f32 %v6337_v35, %v3108_v26 }
 0x322   : > { %v2940_v0 = vpop.f32.mrf.mxu2  ;;  %v2605_v31 = vpop.f32.mrf.mxu0 }
 0x323   : > { %v3109_v62 = vpop.f32.mrf.mxu3  ;;  %v2941_v30 = vadd.f32 %v2940_v0, %v2772_v25  ;;  %v2774_v8 = vpop.f32.mrf.mxu1  ;;  %v2606_v13 = vadd.f32 %v2605_v31, %v7056_v58 }
 0x325   : > { %v3110_v49 = vadd.f32 %v3109_v62, %v2941_v30  ;;  %v2775_v2 = vadd.f32 %v2774_v8, %v2606_v13  ;;  %2644 = vmatmul.bf16.gmra.mxu0 %v7057_v16  ;;  %v7067_v8 = vld [vmem:[#allocation92_spill] sm:$0xff]  ;;  %v7069_v16 = vld [vmem:[#allocation94_spill] sm:$0xff] }
 0x326   : > { %2813 = vmatmul.bf16.gmra.mxu1 %v7058_v27 }
 0x327   : > { %v3259_v52 = vmax.f32 %v6340_v42, %v3110_v49  ;;  %2982 = vmatmul.bf16.gmra.mxu2 %v7059_v37  ;;  %v7070_v37 = vld [vmem:[#allocation95_spill] sm:$0xff] }
 0x328   : > { %3151 = vmatmul.bf16.gmra.mxu3 %v7060_v11  ;;  %v7071_v11 = vld [vmem:[#allocation96_spill] sm:$0xff] }
 0x32a   : > { %v2943_v35 = vpop.f32.mrf.mxu2  ;;  %v2607_v63 = vpop.f32.mrf.mxu0 }
 0x32b   : > { %v3112_v48 = vpop.f32.mrf.mxu3  ;;  %v2944_v46 = vadd.f32 %v2943_v35, %v2775_v2  ;;  %v2776_v4 = vpop.f32.mrf.mxu1  ;;  %v2608_v33 = vadd.f32 %v2607_v63, %v7061_v6  ;;  %v7068_v2 = vld [vmem:[#allocation93_spill] sm:$0xff] }
 0x32d   : > { %v3113_v12 = vadd.f32 %v3112_v48, %v2944_v46  ;;  %v2777_v32 = vadd.f32 %v2776_v4, %v2608_v33  ;;  %v7072_v4 = vld [vmem:[#allocation97_spill] sm:$0xff] }
 0x32f   : > { %v6363_v43 = vmax.f32 %v3113_v12, %v3253_v7 }
 0x332   : > { %v2945_v34 = vpop.f32.mrf.mxu2  ;;  %v2610_v56 = vpop.f32.mrf.mxu0 }
 0x333   : > { %v3114_v57 = vpop.f32.mrf.mxu3  ;;  %v2946_v20 = vadd.f32 %v2945_v34, %v2777_v32  ;;  %v2779_v42 = vpop.f32.mrf.mxu1  ;;  %v2611_v3 = vadd.f32 %v2610_v56, %v5373_v53 }
 0x335   : > { %v3115_v54 = vadd.f32 %v3114_v57, %v2946_v20  ;;  %v2780_v36 = vadd.f32 %v2779_v42, %v2611_v3  ;;  %2649 = vmatmul.bf16.gmra.mxu0 %v7062_v55 }
 0x336   : > { %2818 = vmatmul.bf16.gmra.mxu1 %v7063_v41  ;;  %v7074_v41 = vld [vmem:[#allocation99_spill] sm:$0xff] }
 0x337   : > { %v6368_v23 = vmax.f32 %v3115_v54, %v3255_v21  ;;  %2987 = vmatmul.bf16.gmra.mxu2 %v7064_v61  ;;  %v7075_v61 = vld [vmem:[#allocation100_spill] sm:$0xff] }
 0x338   : > { %3156 = vmatmul.bf16.gmra.mxu3 %v7065_v22 }
 0x33a   : > { %v2948_v7 = vpop.f32.mrf.mxu2  ;;  %v2612_v17 = vpop.f32.mrf.mxu0 }
 0x33b   : > { %v3117_v24 = vpop.f32.mrf.mxu3  ;;  %v2949_v50 = vadd.f32 %v2948_v7, %v2780_v36  ;;  %v2781_v39 = vpop.f32.mrf.mxu1  ;;  %v2613_v51 = vadd.f32 %v2612_v17, %v7066_v59  ;;  %v7073_v36 = vld [vmem:[#allocation98_spill] sm:$0xff]  ;;  %v7076_v17 = vld [vmem:[#allocation44_spill] sm:$0xff] }
 0x33d   : > { %v3118_v53 = vadd.f32 %v3117_v24, %v2949_v50  ;;  %v2782_v26 = vadd.f32 %v2781_v39, %v2613_v51 }
 0x33f   : > { %v6373_v25 = vmax.f32 %v3118_v53, %v3257_v45 }
 0x342   : > { %v2950_v0 = vpop.f32.mrf.mxu2  ;;  %v2615_v21 = vpop.f32.mrf.mxu0 }
 0x343   : > { %v3119_v62 = vpop.f32.mrf.mxu3  ;;  %v2951_v30 = vadd.f32 %v2950_v0, %v2782_v26  ;;  %v2784_v31 = vpop.f32.mrf.mxu1  ;;  %v2616_v58 = vadd.f32 %v2615_v21, %v7067_v8  ;;  %v7078_v8 = vld [vmem:[#allocation102_spill] sm:$0xff] }
 0x345   : > { %v3120_v13 = vadd.f32 %v3119_v62, %v2951_v30  ;;  %v2785_v49 = vadd.f32 %v2784_v31, %v2616_v58  ;;  %2654 = vmatmul.bf16.gmra.mxu0 %v7068_v2  ;;  %v7077_v62 = vld [vmem:[#allocation101_spill] sm:$0xff]  ;;  %v7079_v58 = vld [vmem:[#allocation103_spill] sm:$0xff] }
 0x346   : > { %2823 = vmatmul.bf16.gmra.mxu1 %v7069_v16  ;;  %v7081_v2 = vld [vmem:[#allocation105_spill] sm:$0xff] }
 0x347   : > { %v6378_v27 = vmax.f32 %v3120_v13, %v3259_v52  ;;  %2992 = vmatmul.bf16.gmra.mxu2 %v7070_v37 }
 0x348   : > { %3161 = vmatmul.bf16.gmra.mxu3 %v7071_v11 }
 0x34a   : > { %v2953_v45 = vpop.f32.mrf.mxu2  ;;  %v2617_v46 = vpop.f32.mrf.mxu0 }
 0x34b   : > { %v3122_v35 = vpop.f32.mrf.mxu3  ;;  %v2954_v48 = vadd.f32 %v2953_v45, %v2785_v49  ;;  %v2786_v63 = vpop.f32.mrf.mxu1  ;;  %v2618_v6 = vadd.f32 %v2617_v46, %v7072_v4  ;;  %v7080_v49 = vld [vmem:[#allocation104_spill] sm:$0xff] }
 0x34d   : > { %v3123_v33 = vadd.f32 %v3122_v35, %v2954_v48  ;;  %v2787_v12 = vadd.f32 %v2786_v63, %v2618_v6 }
 0x34f   : > { %v3269_v32 = vmax.f32 %v3123_v33, %v6363_v43 }
 0x352   : > { %v2955_v34 = vpop.f32.mrf.mxu2  ;;  %v2620_v52 = vpop.f32.mrf.mxu0 }
 0x353   : > { %v3124_v57 = vpop.f32.mrf.mxu3  ;;  %v2956_v20 = vadd.f32 %v2955_v34, %v2787_v12  ;;  %v2789_v56 = vpop.f32.mrf.mxu1  ;;  %v2621_v42 = vadd.f32 %v2620_v52, %v5440_v60  ;;  %v7082_v52 = vld [vmem:[#allocation106_spill] sm:$0xff] }
 0x355   : > { %v3125_v3 = vadd.f32 %v3124_v57, %v2956_v20  ;;  %v2790_v54 = vadd.f32 %v2789_v56, %v2621_v42  ;;  %2659 = vmatmul.bf16.gmra.mxu0 %v5687_v38  ;;  %v7083_v56 = vld [vmem:[#allocation107_spill] sm:$0xff] }
 0x356   : > { %2828 = vmatmul.bf16.gmra.mxu1 %v7073_v36 }
 0x357   : > { %v3271_v55 = vmax.f32 %v3125_v3, %v6368_v23  ;;  %2997 = vmatmul.bf16.gmra.mxu2 %v7074_v41  ;;  %v7085_v3 = vld [vmem:[#allocation109_spill] sm:$0xff] }
 0x358   : > { %3166 = vmatmul.bf16.gmra.mxu3 %v7075_v61 }
 0x35a   : > { %v2958_v43 = vpop.f32.mrf.mxu2  ;;  %v2622_v24 = vpop.f32.mrf.mxu0 }
 0x35b   : > { %v3127_v22 = vpop.f32.mrf.mxu3  ;;  %v2959_v7 = vadd.f32 %v2958_v43, %v2790_v54  ;;  %v2791_v50 = vpop.f32.mrf.mxu1  ;;  %v2623_v39 = vadd.f32 %v2622_v24, %v7076_v17  ;;  %v7086_v43 = vld [vmem:[#allocation46_spill] sm:$0xff] }
 0x35d   : > { %v3128_v60 = vadd.f32 %v3127_v22, %v2959_v7  ;;  %v2792_v59 = vadd.f32 %v2791_v50, %v2623_v39 }
 0x35f   : > { %v3273_v51 = vmax.f32 %v3128_v60, %v6373_v25 }
 0x362   : > { %v2960_v38 = vpop.f32.mrf.mxu2  ;;  %v2625_v0 = vpop.f32.mrf.mxu0 }
 0x363   : > { %v3129_v53 = vpop.f32.mrf.mxu3  ;;  %v2961_v26 = vadd.f32 %v2960_v38, %v2792_v59  ;;  %v2794_v23 = vpop.f32.mrf.mxu1  ;;  %v2626_v30 = vadd.f32 %v2625_v0, %v7077_v62  ;;  %v7087_v59 = vld [vmem:[#allocation110_spill] sm:$0xff]  ;;  %v7088_v0 = vld [vmem:[#allocation111_spill] sm:$0xff] }
 0x365   : > { %v3130_v21 = vadd.f32 %v3129_v53, %v2961_v26  ;;  %v2795_v31 = vadd.f32 %v2794_v23, %v2626_v30  ;;  %2664 = vmatmul.bf16.gmra.mxu0 %v7078_v8  ;;  %v7089_v23 = vld [vmem:[#allocation112_spill] sm:$0xff]  ;;  %v7090_v30 = vld [vmem:[#allocation113_spill] sm:$0xff] }
 0x366   : > { %2833 = vmatmul.bf16.gmra.mxu1 %v7079_v58 }
 0x367   : > { %v3275_v13 = vmax.f32 %v3130_v21, %v6378_v27  ;;  %3002 = vmatmul.bf16.gmra.mxu2 %v7080_v49  ;;  %v7091_v21 = vld [vmem:[#allocation114_spill] sm:$0xff] }
 0x368   : > { %3171 = vmatmul.bf16.gmra.mxu3 %v7081_v2  ;;  %v7092_v2 = vld [vmem:[#allocation115_spill] sm:$0xff] }
 0x36a   : > { %v2963_v25 = vpop.f32.mrf.mxu2  ;;  %v2627_v11 = vpop.f32.mrf.mxu0 }
 0x36b   : > { %v3132_v16 = vpop.f32.mrf.mxu3  ;;  %v2964_v37 = vadd.f32 %v2963_v25, %v2795_v31  ;;  %v2796_v45 = vpop.f32.mrf.mxu1  ;;  %v2628_v35 = vadd.f32 %v2627_v11, %v5735_v15  ;;  %v7084_v15 = vld [vmem:[#allocation108_spill] sm:$0xff] }
 0x36d   : > { %v3133_v48 = vadd.f32 %v3132_v16, %v2964_v37  ;;  %v2797_v46 = vadd.f32 %v2796_v45, %v2628_v35 }
 0x36f   : > { %v6399_v63 = vmax.f32 %v3133_v48, %v3269_v32 }
 0x372   : > { %v2965_v4 = vpop.f32.mrf.mxu2  ;;  %v2630_v12 = vpop.f32.mrf.mxu0 }
 0x373   : > { %v3134_v6 = vpop.f32.mrf.mxu3  ;;  %v2966_v33 = vadd.f32 %v2965_v4, %v2797_v46  ;;  %v2799_v27 = vpop.f32.mrf.mxu1  ;;  %v2631_v34 = vadd.f32 %v2630_v12, %v5395_v9  ;;  %v7093_v12 = vld [vmem:[#allocation116_spill] sm:$0xff] }
 0x375   : > { %v3135_v57 = vadd.f32 %v3134_v6, %v2966_v33  ;;  %v2800_v20 = vadd.f32 %v2799_v27, %v2631_v34  ;;  %2669 = vmatmul.bf16.gmra.mxu0 %v7082_v52  ;;  %v7094_v34 = vld [vmem:[#allocation117_spill] sm:$0xff] }
 0x376   : > { %2838 = vmatmul.bf16.gmra.mxu1 %v7083_v56 }
 0x377   : > { %v6404_v42 = vmax.f32 %v3135_v57, %v3271_v55  ;;  %3007 = vmatmul.bf16.gmra.mxu2 %v7084_v15  ;;  %v7095_v57 = vld [vmem:[#allocation118_spill] sm:$0xff] }
 0x378   : > { %3176 = vmatmul.bf16.gmra.mxu3 %v7085_v3  ;;  %v7096_v3 = vld [vmem:[#allocation34_spill] sm:$0xff] }
 0x37a   : > { %v2968_v32 = vpop.f32.mrf.mxu2  ;;  %v2632_v41 = vpop.f32.mrf.mxu0 }
 0x37b   : > { %v3137_v54 = vpop.f32.mrf.mxu3  ;;  %v2969_v36 = vadd.f32 %v2968_v32, %v2800_v20  ;;  %v2801_v61 = vpop.f32.mrf.mxu1  ;;  %v2633_v22 = vadd.f32 %v2632_v41, %v7086_v43 }
 0x37d   : > { %v3138_v9 = vadd.f32 %v3137_v54, %v2969_v36  ;;  %v2802_v7 = vadd.f32 %v2801_v61, %v2633_v22 }
 0x37f   : > { %v6409_v24 = vmax.f32 %v3138_v9, %v3273_v51 }
 0x382   : > { %v2970_v50 = vpop.f32.mrf.mxu2  ;;  %v2635_v55 = vpop.f32.mrf.mxu0 }
 0x383   : > { %v3139_v17 = vpop.f32.mrf.mxu3  ;;  %v2971_v39 = vadd.f32 %v2970_v50, %v2802_v7  ;;  %v2804_v60 = vpop.f32.mrf.mxu1  ;;  %v2636_v38 = vadd.f32 %v2635_v55, %v7087_v59  ;;  %v3372_v7 = vld [vmem:[%s6638_s6] sm:$0xff] }
 0x384   : > { %3384 = vperm.xlu1 %4742, %v3372_v7  }
 0x385   : > { %v3140_v53 = vadd.f32 %v3139_v17, %v2971_v39  ;;  %v2805_v26 = vadd.f32 %v2804_v60, %v2636_v38  ;;  %2674 = vmatmul.bf16.gmra.mxu0 %v7088_v0  ;;  %v7097_v17 = vld [vmem:[#allocation119_spill] sm:$0xff]  ;;  %v7098_v39 = vld [vmem:[#allocation120_spill] sm:$0xff]  ;;  %v7100_v60 = vld [vmem:[#allocation122_spill] sm:$0xff] }
 0x386   : > { %2843 = vmatmul.bf16.gmra.mxu1 %v7089_v23  ;;  %v7101_v23 = vld [vmem:[#allocation123_spill] sm:$0xff] }
 0x387   : > { %v6414_v62 = vmax.f32 %v3140_v53, %v3275_v13  ;;  %3012 = vmatmul.bf16.gmra.mxu2 %v7090_v30 }
 0x388   : > { %3181 = vmatmul.bf16.gmra.mxu3 %v7091_v21 }
 0x38a   : > { %v2973_v51 = vpop.f32.mrf.mxu2  ;;  %v2637_v58 = vpop.f32.mrf.mxu0 }
 0x38b   : > { %v3142_v31 = vpop.f32.mrf.mxu3  ;;  %v2974_v8 = vadd.f32 %v2973_v51, %v2805_v26  ;;  %v2806_v49 = vpop.f32.mrf.mxu1  ;;  %v2638_v25 = vadd.f32 %v2637_v58, %v7092_v2 }
 0x38d   : > { %v3143_v16 = vadd.f32 %v3142_v31, %v2974_v8  ;;  %v2807_v37 = vadd.f32 %v2806_v49, %v2638_v25 }
 0x38f   : > { %v3285_v11 = vmax.f32 %v3143_v16, %v6399_v63 }
 0x392   : > { %v2975_v45 = vpop.f32.mrf.mxu2  ;;  %v2640_v13 = vpop.f32.mrf.mxu0 }
 0x393   : > { %v3144_v35 = vpop.f32.mrf.mxu3  ;;  %v2976_v48 = vadd.f32 %v2975_v45, %v2807_v37  ;;  %v2809_v46 = vpop.f32.mrf.mxu1  ;;  %v2641_v4 = vadd.f32 %v2640_v13, %v5447_v1 }
 0x395   : > { %v3145_v6 = vadd.f32 %v3144_v35, %v2976_v48  ;;  %v2810_v33 = vadd.f32 %v2809_v46, %v2641_v4  ;;  %2679 = vmatmul.bf16.gmra.mxu0 %v5799_v28  ;;  %v7102_v35 = vld [vmem:[#allocation124_spill] sm:$0xff]  ;;  %v7103_v48 = vld [vmem:[#allocation125_spill] sm:$0xff]  ;;  %v7104_v46 = vld [vmem:[#allocation126_spill] sm:$0xff] }
 0x396   : > { %2848 = vmatmul.bf16.gmra.mxu1 %v7093_v12 }
 0x397   : > { %v3287_v27 = vmax.f32 %v3145_v6, %v6404_v42  ;;  %3017 = vmatmul.bf16.gmra.mxu2 %v7094_v34 }
 0x398   : > { %3186 = vmatmul.bf16.gmra.mxu3 %v7095_v57  ;;  %v7106_v57 = vld [vmem:[#allocation52_spill] sm:$0xff] }
 0x39a   : > { %v2978_v63 = vpop.f32.mrf.mxu2  ;;  %v2642_v56 = vpop.f32.mrf.mxu0 }
 0x39b   : > { %v3147_v20 = vpop.f32.mrf.mxu3  ;;  %v2979_v52 = vadd.f32 %v2978_v63, %v2810_v33  ;;  %v2811_v15 = vpop.f32.mrf.mxu1  ;;  %v2643_v32 = vadd.f32 %v2642_v56, %v7096_v3 }
 0x39d   : > { %v3148_v1 = vadd.f32 %v3147_v20, %v2979_v52  ;;  %v2812_v54 = vadd.f32 %v2811_v15, %v2643_v32 }
 0x39f   : > { %v3289_v36 = vmax.f32 %v3148_v1, %v6409_v24  ;;  %v7099_v24 = vld [vmem:[#allocation121_spill] sm:$0xff]  ;;  %v7107_v1 = vld [vmem:[#allocation128_spill] sm:$0xff] }
 0x3a2   : > { %v2980_v28 = vpop.f32.mrf.mxu2  ;;  %v2645_v43 = vpop.f32.mrf.mxu0 }
 0x3a3   : > { %v3149_v41 = vpop.f32.mrf.mxu3  ;;  %v2981_v61 = vadd.f32 %v2980_v28, %v2812_v54  ;;  %v2814_v42 = vpop.f32.mrf.mxu1  ;;  %v2646_v22 = vadd.f32 %v2645_v43, %v5825_v14  ;;  %v3374_v14 = vld [vmem:[%s6638_s6 + $0x10] sm:$0xff]  ;;  %v7109_v43 = vld [vmem:[#allocation130_spill] sm:$0xff] }
 0x3a4   : > { %3438 = vperm.xlu0 %4741, %v3374_v14  }
 0x3a5   : > { %v3150_v9 = vadd.f32 %v3149_v41, %v2981_v61  ;;  %v2815_v50 = vadd.f32 %v2814_v42, %v2646_v22  ;;  %2684 = vmatmul.bf16.gmra.mxu0 %v7097_v17  ;;  %v7108_v61 = vld [vmem:[#allocation129_spill] sm:$0xff]  ;;  %v7110_v22 = vld [vmem:[#allocation131_spill] sm:$0xff] }
 0x3a6   : > { %2853 = vmatmul.bf16.gmra.mxu1 %v7098_v39 }
 0x3a7   : > { %v3291_v55 = vmax.f32 %v3150_v9, %v6414_v62  ;;  %3022 = vmatmul.bf16.gmra.mxu2 %v7099_v24  ;;  %v3375_v62 = vld [vmem:[%s6638_s6 + $0x18] sm:$0xff] }
 0x3a8   : > { %3191 = vmatmul.bf16.gmra.mxu3 %v7100_v60  ;;  %3478 = vperm.xlu1 %4742, %v3375_v62   ;;  %v7111_v9 = vld [vmem:[#allocation132_spill] sm:$0xff]  ;;  %v7112_v60 = vld [vmem:[#allocation133_spill] sm:$0xff] }
 0x3aa   : > { %v2983_v59 = vpop.f32.mrf.mxu2  ;;  %v2647_v26 = vpop.f32.mrf.mxu0 }
 0x3ab   : > { %v3152_v38 = vpop.f32.mrf.mxu3  ;;  %v2984_v53 = vadd.f32 %v2983_v59, %v2815_v50  ;;  %v2816_v0 = vpop.f32.mrf.mxu1  ;;  %v2648_v30 = vadd.f32 %v2647_v26, %v7101_v23 }
 0x3ad   : > { %v3153_v21 = vadd.f32 %v3152_v38, %v2984_v53  ;;  %v2817_v51 = vadd.f32 %v2816_v0, %v2648_v30 }
 0x3af   : > { %v6444_v31 = vmax.f32 %v3153_v21, %v3285_v11  ;;  %v7105_v11 = vld [vmem:[#allocation127_spill] sm:$0xff]  ;;  %v7113_v21 = vld [vmem:[#allocation36_spill] sm:$0xff] }
 0x3b2   : > { %v2985_v8 = vpop.f32.mrf.mxu2  ;;  %v2650_v2 = vpop.f32.mrf.mxu0 }
 0x3b3   : > { %v3154_v58 = vpop.f32.mrf.mxu3  ;;  %v2986_v49 = vadd.f32 %v2985_v8, %v2817_v51  ;;  %v2819_v25 = vpop.f32.mrf.mxu1  ;;  %v2651_v16 = vadd.f32 %v2650_v2, %v5470_v40 }
 0x3b5   : > { %v3155_v37 = vadd.f32 %v3154_v58, %v2986_v49  ;;  %v2820_v45 = vadd.f32 %v2819_v25, %v2651_v16  ;;  %2689 = vmatmul.bf16.gmra.mxu0 %v7102_v35  ;;  %v7114_v58 = vld [vmem:[#allocation134_spill] sm:$0xff]  ;;  %v7115_v49 = vld [vmem:[#allocation135_spill] sm:$0xff]  ;;  %v7116_v25 = vld [vmem:[#allocation136_spill] sm:$0xff] }
 0x3b6   : > { %2858 = vmatmul.bf16.gmra.mxu1 %v7103_v48  ;;  %v7117_v16 = vld [vmem:[#allocation137_spill] sm:$0xff] }
 0x3b7   : > { %v6449_v13 = vmax.f32 %v3155_v37, %v3287_v27  ;;  %3027 = vmatmul.bf16.gmra.mxu2 %v7104_v46  ;;  %v7118_v46 = vld [vmem:[#allocation55_spill] sm:$0xff] }
 0x3b8   : > { %3196 = vmatmul.bf16.gmra.mxu3 %v7105_v11 }
 0x3ba   : > { %v2988_v4 = vpop.f32.mrf.mxu2  ;;  %v2652_v12 = vpop.f32.mrf.mxu0 }
 0x3bb   : > { %v3157_v6 = vpop.f32.mrf.mxu3  ;;  %v2989_v33 = vadd.f32 %v2988_v4, %v2820_v45  ;;  %v2821_v34 = vpop.f32.mrf.mxu1  ;;  %v2653_v63 = vadd.f32 %v2652_v12, %v7106_v57 }
 0x3bd   : > { %v3158_v40 = vadd.f32 %v3157_v6, %v2989_v33  ;;  %v2822_v20 = vadd.f32 %v2821_v34, %v2653_v63 }
 0x3bf   : > { %v6454_v52 = vmax.f32 %v3158_v40, %v3289_v36  ;;  %v3373_v36 = vld [vmem:[%s6638_s6 + $0x8] sm:$0xff] }
 0x3c0   : > { %3389 = vperm.xlu2 %4743, %v3373_v36   ;;  %v7119_v40 = vld [vmem:[#allocation138_spill] sm:$0xff] }
 0x3c2   : > { %v2990_v56 = vpop.f32.mrf.mxu2  ;;  %v2655_v27 = vpop.f32.mrf.mxu0 }
 0x3c3   : > { %v3159_v15 = vpop.f32.mrf.mxu3  ;;  %v2991_v3 = vadd.f32 %v2990_v56, %v2822_v20  ;;  %v2824_v32 = vpop.f32.mrf.mxu1  ;;  %v2656_v54 = vadd.f32 %v2655_v27, %v7107_v1  ;;  %v7121_v27 = vld [vmem:[#allocation140_spill] sm:$0xff]  ;;  %v7122_v1 = vld [vmem:[#allocation141_spill] sm:$0xff] }
 0x3c5   : > { %v3160_v28 = vadd.f32 %v3159_v15, %v2991_v3  ;;  %v2825_v41 = vadd.f32 %v2824_v32, %v2656_v54  ;;  %2694 = vmatmul.bf16.gmra.mxu0 %v7108_v61  ;;  %v7120_v3 = vld [vmem:[#allocation139_spill] sm:$0xff]  ;;  %v7123_v54 = vld [vmem:[#allocation142_spill] sm:$0xff] }
 0x3c6   : > { %2863 = vmatmul.bf16.gmra.mxu1 %v7109_v43 }
 0x3c7   : > { %v6459_v42 = vmax.f32 %v3160_v28, %v3291_v55  ;;  %3032 = vmatmul.bf16.gmra.mxu2 %v7110_v22  ;;  %v7124_v22 = vld [vmem:[#allocation143_spill] sm:$0xff] }
 0x3c8   : > { %3201 = vmatmul.bf16.gmra.mxu3 %v7111_v9 }
 0x3ca   : > { %v2993_v7 = vpop.f32.mrf.mxu2  ;;  %v2657_v39 = vpop.f32.mrf.mxu0 }
 0x3cb   : > { %v3162_v50 = vpop.f32.mrf.mxu3  ;;  %v2994_v17 = vadd.f32 %v2993_v7, %v2825_v41  ;;  %v2826_v24 = vpop.f32.mrf.mxu1  ;;  %v2658_v14 = vadd.f32 %v2657_v39, %v7112_v60 }
 0x3cd   : > { %v3163_v59 = vadd.f32 %v3162_v50, %v2994_v17  ;;  %v2827_v38 = vadd.f32 %v2826_v24, %v2658_v14  ;;  %v7125_v14 = vld [vmem:[#allocation54_spill] sm:$0xff] }
 0x3cf   : > { %v3293_v55 = vmax.f32 %v3163_v59, %v6444_v31 }
 0x3d2   : > { %v2995_v53 = vpop.f32.mrf.mxu2  ;;  %v2660_v23 = vpop.f32.mrf.mxu0 }
 0x3d3   : > { %v3164_v26 = vpop.f32.mrf.mxu3  ;;  %v2996_v0 = vadd.f32 %v2995_v53, %v2827_v38  ;;  %v2829_v30 = vpop.f32.mrf.mxu1  ;;  %v2661_v62 = vadd.f32 %v2660_v23, %v7113_v21  ;;  %v7129_v21 = vld [vmem:[#allocation147_spill] sm:$0xff] }
 0x3d5   : > { %v3165_v51 = vadd.f32 %v3164_v26, %v2996_v0  ;;  %v2830_v8 = vadd.f32 %v2829_v30, %v2661_v62  ;;  %2699 = vmatmul.bf16.gmra.mxu0 %v7114_v58  ;;  %v7126_v26 = vld [vmem:[#allocation144_spill] sm:$0xff]  ;;  %v7127_v0 = vld [vmem:[#allocation145_spill] sm:$0xff]  ;;  %v7128_v30 = vld [vmem:[#allocation146_spill] sm:$0xff] }
 0x3d6   : > { %2868 = vmatmul.bf16.gmra.mxu1 %v7115_v49  ;;  %v7130_v49 = vld [vmem:[#allocation43_spill] sm:$0xff] }
 0x3d7   : > { %v3295_v2 = vmax.f32 %v3165_v51, %v6449_v13  ;;  %3037 = vmatmul.bf16.gmra.mxu2 %v7116_v25 }
 0x3d8   : > { %3206 = vmatmul.bf16.gmra.mxu3 %v7117_v16 }
 0x3da   : > { %v2998_v31 = vpop.f32.mrf.mxu2  ;;  %v2662_v35 = vpop.f32.mrf.mxu0 }
 0x3db   : > { %v3167_v37 = vpop.f32.mrf.mxu3  ;;  %v2999_v45 = vadd.f32 %v2998_v31, %v2830_v8  ;;  %v2831_v48 = vpop.f32.mrf.mxu1  ;;  %v2663_v11 = vadd.f32 %v2662_v35, %v7118_v46 }
 0x3dd   : > { %v3168_v4 = vadd.f32 %v3167_v37, %v2999_v45  ;;  %v2832_v6 = vadd.f32 %v2831_v48, %v2663_v11  ;;  %v7131_v11 = vld [vmem:[#allocation148_spill] sm:$0xff] }
 0x3df   : > { %v3297_v33 = vmax.f32 %v3168_v4, %v6454_v52 }
 0x3e2   : > { %v3000_v12 = vpop.f32.mrf.mxu2  ;;  %v2665_v63 = vpop.f32.mrf.mxu0 }
 0x3e3   : > { %v3169_v34 = vpop.f32.mrf.mxu3  ;;  %v3001_v57 = vadd.f32 %v3000_v12, %v2832_v6  ;;  %v2834_v13 = vpop.f32.mrf.mxu1  ;;  %v2666_v20 = vadd.f32 %v2665_v63, %v7119_v40  ;;  %v7135_v40 = vld [vmem:[#allocation152_spill] sm:$0xff] }
 0x3e5   : > { %v3170_v56 = vadd.f32 %v3169_v34, %v3001_v57  ;;  %v2835_v15 = vadd.f32 %v2834_v13, %v2666_v20  ;;  %2704 = vmatmul.bf16.gmra.mxu0 %v7120_v3  ;;  %v7132_v34 = vld [vmem:[#allocation149_spill] sm:$0xff]  ;;  %v7133_v57 = vld [vmem:[#allocation150_spill] sm:$0xff]  ;;  %v7134_v13 = vld [vmem:[#allocation151_spill] sm:$0xff] }
 0x3e6   : > { %2873 = vmatmul.bf16.gmra.mxu1 %v7121_v27  ;;  %v7136_v27 = vld [vmem:[#allocation153_spill] sm:$0xff] }
 0x3e7   : > { %v3299_v32 = vmax.f32 %v3170_v56, %v6459_v42  ;;  %3042 = vmatmul.bf16.gmra.mxu2 %v7122_v1 }
 0x3e8   : > { %3211 = vmatmul.bf16.gmra.mxu3 %v7123_v54 }
 0x3ea   : > { %v3003_v52 = vpop.f32.mrf.mxu2  ;;  %v2667_v61 = vpop.f32.mrf.mxu0 }
 0x3eb   : > { %v3172_v28 = vpop.f32.mrf.mxu3  ;;  %v3004_v41 = vadd.f32 %v3003_v52, %v2835_v15  ;;  %v2836_v43 = vpop.f32.mrf.mxu1  ;;  %v2668_v9 = vadd.f32 %v2667_v61, %v7124_v22 }
 0x3ed   : > { %v3173_v36 = vadd.f32 %v3172_v28, %v3004_v41  ;;  %v2837_v7 = vadd.f32 %v2836_v43, %v2668_v9  ;;  %v7137_v9 = vld [vmem:[#allocation62_spill] sm:$0xff] }
 0x3ef   : > { %v6483_v50 = vmax.f32 %v3173_v36, %v3293_v55 }
 0x3f2   : > { %v3005_v17 = vpop.f32.mrf.mxu2  ;;  %v2670_v60 = vpop.f32.mrf.mxu0 }
 0x3f3   : > { %v3174_v39 = vpop.f32.mrf.mxu3  ;;  %v3006_v24 = vadd.f32 %v3005_v17, %v2837_v7  ;;  %v2839_v42 = vpop.f32.mrf.mxu1  ;;  %v2671_v59 = vadd.f32 %v2670_v60, %v7125_v14  ;;  %v7141_v14 = vld [vmem:[#allocation157_spill] sm:$0xff] }
 0x3f5   : > { %v3175_v38 = vadd.f32 %v3174_v39, %v3006_v24  ;;  %v2840_v53 = vadd.f32 %v2839_v42, %v2671_v59  ;;  %2709 = vmatmul.bf16.gmra.mxu0 %v7126_v26  ;;  %v7138_v39 = vld [vmem:[#allocation154_spill] sm:$0xff]  ;;  %v7139_v24 = vld [vmem:[#allocation155_spill] sm:$0xff]  ;;  %v7140_v42 = vld [vmem:[#allocation156_spill] sm:$0xff] }
 0x3f6   : > { %2878 = vmatmul.bf16.gmra.mxu1 %v7127_v0  ;;  %v7142_v0 = vld [vmem:[#allocation61_spill] sm:$0xff] }
 0x3f7   : > { %v6488_v23 = vmax.f32 %v3175_v38, %v3295_v2  ;;  %3047 = vmatmul.bf16.gmra.mxu2 %v7128_v30 }
 0x3f8   : > { %3216 = vmatmul.bf16.gmra.mxu3 %v7129_v21 }
 0x3fa   : > { %v3008_v55 = vpop.f32.mrf.mxu2  ;;  %v2672_v8 = vpop.f32.mrf.mxu0 }
 0x3fb   : > { %v3177_v62 = vpop.f32.mrf.mxu3  ;;  %v3009_v51 = vadd.f32 %v3008_v55, %v2840_v53  ;;  %v2841_v58 = vpop.f32.mrf.mxu1  ;;  %v2673_v25 = vadd.f32 %v2672_v8, %v7130_v49 }
 0x3fd   : > { %v3178_v16 = vadd.f32 %v3177_v62, %v3009_v51  ;;  %v2842_v31 = vadd.f32 %v2841_v58, %v2673_v25  ;;  %v7143_v25 = vld [vmem:[#allocation158_spill] sm:$0xff] }
 0x3ff   : > { %v6493_v37 = vmax.f32 %v3178_v16, %v3297_v33 }
 0x402   : > { %v3010_v45 = vpop.f32.mrf.mxu2  ;;  %v2675_v2 = vpop.f32.mrf.mxu0 }
 0x403   : > { %v3179_v35 = vpop.f32.mrf.mxu3  ;;  %v3011_v48 = vadd.f32 %v3010_v45, %v2842_v31  ;;  %v2844_v46 = vpop.f32.mrf.mxu1  ;;  %v2676_v4 = vadd.f32 %v2675_v2, %v7131_v11  ;;  %v7147_v11 = vld [vmem:[#allocation162_spill] sm:$0xff] }
 0x405   : > { %v3180_v6 = vadd.f32 %v3179_v35, %v3011_v48  ;;  %v2845_v12 = vadd.f32 %v2844_v46, %v2676_v4  ;;  %2714 = vmatmul.bf16.gmra.mxu0 %v7132_v34  ;;  %v7144_v35 = vld [vmem:[#allocation159_spill] sm:$0xff]  ;;  %v7145_v48 = vld [vmem:[#allocation160_spill] sm:$0xff]  ;;  %v7146_v46 = vld [vmem:[#allocation161_spill] sm:$0xff] }
 0x406   : > { %2883 = vmatmul.bf16.gmra.mxu1 %v7133_v57 }
 0x407   : > { %v6498_v63 = vmax.f32 %v3180_v6, %v3299_v32  ;;  %3052 = vmatmul.bf16.gmra.mxu2 %v7134_v13  ;;  %v7148_v13 = vld [vmem:[#allocation163_spill] sm:$0xff] }
 0x408   : > { %3221 = vmatmul.bf16.gmra.mxu3 %v7135_v40 }
 0x40a   : > { %v3013_v33 = vpop.f32.mrf.mxu2  ;;  %v2677_v15 = vpop.f32.mrf.mxu0 }
 0x40b   : > { %v3182_v20 = vpop.f32.mrf.mxu3  ;;  %v3014_v56 = vadd.f32 %v3013_v33, %v2845_v12  ;;  %v2846_v3 = vpop.f32.mrf.mxu1  ;;  %v2678_v1 = vadd.f32 %v2677_v15, %v7136_v27 }
 0x40d   : > { %v3183_v54 = vadd.f32 %v3182_v20, %v3014_v56  ;;  %v2847_v52 = vadd.f32 %v2846_v3, %v2678_v1  ;;  %v7149_v1 = vld [vmem:[#allocation45_spill] sm:$0xff] }
 0x40f   : > { %v3301_v28 = vmax.f32 %v3183_v54, %v6483_v50 }
 0x412   : > { %v3015_v41 = vpop.f32.mrf.mxu2  ;;  %v2680_v32 = vpop.f32.mrf.mxu0 }
 0x413   : > { %v3184_v61 = vpop.f32.mrf.mxu3  ;;  %v3016_v43 = vadd.f32 %v3015_v41, %v2847_v52  ;;  %v2849_v22 = vpop.f32.mrf.mxu1  ;;  %v2681_v36 = vadd.f32 %v2680_v32, %v7137_v9 }
 0x415   : > { %v3185_v7 = vadd.f32 %v3184_v61, %v3016_v43  ;;  %v2850_v17 = vadd.f32 %v2849_v22, %v2681_v36  ;;  %2719 = vmatmul.bf16.gmra.mxu0 %v7138_v39  ;;  %v7150_v61 = vld [vmem:[#allocation164_spill] sm:$0xff]  ;;  %v7151_v43 = vld [vmem:[#allocation165_spill] sm:$0xff]  ;;  %v7152_v22 = vld [vmem:[#allocation166_spill] sm:$0xff] }
 0x416   : > { %2888 = vmatmul.bf16.gmra.mxu1 %v7139_v24 }
 0x417   : > { %v3303_v60 = vmax.f32 %v3185_v7, %v6488_v23  ;;  %3057 = vmatmul.bf16.gmra.mxu2 %v7140_v42  ;;  %v7154_v42 = vld [vmem:[#allocation65_spill] sm:$0xff] }
 0x418   : > { %3226 = vmatmul.bf16.gmra.mxu3 %v7141_v14 }
 0x41a   : > { %v3018_v50 = vpop.f32.mrf.mxu2  ;;  %v2682_v53 = vpop.f32.mrf.mxu0 }
 0x41b   : > { %v3187_v59 = vpop.f32.mrf.mxu3  ;;  %v3019_v38 = vadd.f32 %v3018_v50, %v2850_v17  ;;  %v2851_v26 = vpop.f32.mrf.mxu1  ;;  %v2683_v30 = vadd.f32 %v2682_v53, %v7142_v0 }
 0x41d   : > { %v3188_v21 = vadd.f32 %v3187_v59, %v3019_v38  ;;  %v2852_v55 = vadd.f32 %v2851_v26, %v2683_v30 }
 0x41f   : > { %v3305_v62 = vmax.f32 %v3188_v21, %v6493_v37 }
 0x422   : > { %v3020_v51 = vpop.f32.mrf.mxu2  ;;  %v2685_v49 = vpop.f32.mrf.mxu0 }
 0x423   : > { %v3189_v8 = vpop.f32.mrf.mxu3  ;;  %v3021_v58 = vadd.f32 %v3020_v51, %v2852_v55  ;;  %v2854_v23 = vpop.f32.mrf.mxu1  ;;  %v2686_v16 = vadd.f32 %v2685_v49, %v7143_v25  ;;  %v7155_v51 = vld [vmem:[#allocation168_spill] sm:$0xff]  ;;  %v7157_v49 = vld [vmem:[#allocation170_spill] sm:$0xff] }
 0x425   : > { %v3190_v31 = vadd.f32 %v3189_v8, %v3021_v58  ;;  %v2855_v45 = vadd.f32 %v2854_v23, %v2686_v16  ;;  %2724 = vmatmul.bf16.gmra.mxu0 %v7144_v35  ;;  %v7156_v8 = vld [vmem:[#allocation169_spill] sm:$0xff]  ;;  %v7159_v35 = vld [vmem:[#allocation172_spill] sm:$0xff] }
 0x426   : > { %2893 = vmatmul.bf16.gmra.mxu1 %v7145_v48 }
 0x427   : > { %v3307_v2 = vmax.f32 %v3190_v31, %v6498_v63  ;;  %3062 = vmatmul.bf16.gmra.mxu2 %v7146_v46 }
 0x428   : > { %3231 = vmatmul.bf16.gmra.mxu3 %v7147_v11 }
 0x42a   : > { %v3023_v37 = vpop.f32.mrf.mxu2  ;;  %v2687_v12 = vpop.f32.mrf.mxu0 }
 0x42b   : > { %v3192_v4 = vpop.f32.mrf.mxu3  ;;  %v3024_v6 = vadd.f32 %v3023_v37, %v2855_v45  ;;  %v2856_v34 = vpop.f32.mrf.mxu1  ;;  %v2688_v40 = vadd.f32 %v2687_v12, %v7148_v13 }
 0x42d   : > { %v3193_v57 = vadd.f32 %v3192_v4, %v3024_v6  ;;  %v2857_v20 = vadd.f32 %v2856_v34, %v2688_v40  ;;  %v7160_v34 = vld [vmem:[#allocation64_spill] sm:$0xff] }
 0x42f   : > { %v6519_v33 = vmax.f32 %v3193_v57, %v3301_v28  ;;  %v7153_v28 = vld [vmem:[#allocation167_spill] sm:$0xff] }
 0x432   : > { %v3025_v56 = vpop.f32.mrf.mxu2  ;;  %v2690_v27 = vpop.f32.mrf.mxu0 }
 0x433   : > { %v3194_v15 = vpop.f32.mrf.mxu3  ;;  %v3026_v3 = vadd.f32 %v3025_v56, %v2857_v20  ;;  %v2859_v63 = vpop.f32.mrf.mxu1  ;;  %v2691_v54 = vadd.f32 %v2690_v27, %v7149_v1  ;;  %v7161_v20 = vld [vmem:[#allocation173_spill] sm:$0xff]  ;;  %v7162_v56 = vld [vmem:[#allocation174_spill] sm:$0xff]  ;;  %v7164_v27 = vld [vmem:[#allocation176_spill] sm:$0xff] }
 0x435   : > { %v3195_v52 = vadd.f32 %v3194_v15, %v3026_v3  ;;  %v2860_v41 = vadd.f32 %v2859_v63, %v2691_v54  ;;  %2729 = vmatmul.bf16.gmra.mxu0 %v7150_v61  ;;  %v7163_v3 = vld [vmem:[#allocation175_spill] sm:$0xff] }
 0x436   : > { %2898 = vmatmul.bf16.gmra.mxu1 %v7151_v43 }
 0x437   : > { %v6524_v32 = vmax.f32 %v3195_v52, %v3303_v60  ;;  %3067 = vmatmul.bf16.gmra.mxu2 %v7152_v22 }
 0x438   : > { %3236 = vmatmul.bf16.gmra.mxu3 %v7153_v28 }
 0x43a   : > { %v3028_v9 = vpop.f32.mrf.mxu2  ;;  %v2692_v17 = vpop.f32.mrf.mxu0 }
 0x43b   : > { %v3197_v36 = vpop.f32.mrf.mxu3  ;;  %v3029_v7 = vadd.f32 %v3028_v9, %v2860_v41  ;;  %v2861_v39 = vpop.f32.mrf.mxu1  ;;  %v2693_v14 = vadd.f32 %v2692_v17, %v7154_v42  ;;  %v7165_v41 = vld [vmem:[#allocation51_spill] sm:$0xff] }
 0x43d   : > { %v3198_v24 = vadd.f32 %v3197_v36, %v3029_v7  ;;  %v2862_v59 = vadd.f32 %v2861_v39, %v2693_v14  ;;  %v6548_v7 = vld [vmem:[#allocation7] sm:$0xff] }
 0x43f   : > { %v6529_v50 = vmax.f32 %v3198_v24, %v3305_v62  ;;  %v7158_v62 = vld [vmem:[#allocation171_spill] sm:$0xff]  ;;  %v7166_v24 = vld [vmem:[#allocation177_spill] sm:$0xff] }
 0x442   : > { %v3030_v38 = vpop.f32.mrf.mxu2  ;;  %v2695_v60 = vpop.f32.mrf.mxu0 }
 0x443   : > { %v3199_v53 = vpop.f32.mrf.mxu3  ;;  %v3031_v26 = vadd.f32 %v3030_v38, %v2862_v59  ;;  %v2864_v0 = vpop.f32.mrf.mxu1  ;;  %v2696_v30 = vadd.f32 %v2695_v60, %v6161_v47 }
 0x445   : > { %v3200_v21 = vadd.f32 %v3199_v53, %v3031_v26  ;;  %v2865_v55 = vadd.f32 %v2864_v0, %v2696_v30  ;;  %2734 = vmatmul.bf16.gmra.mxu0 %v7155_v51  ;;  %v7167_v30 = vld [vmem:[#allocation178_spill] sm:$0xff] }
 0x446   : > { %2903 = vmatmul.bf16.gmra.mxu1 %v7156_v8 }
 0x447   : > { %v6534_v58 = vmax.f32 %v3200_v21, %v3307_v2  ;;  %3072 = vmatmul.bf16.gmra.mxu2 %v7157_v49 }
 0x448   : > { %3241 = vmatmul.bf16.gmra.mxu3 %v7158_v62 }
 0x44a   : > { %v3033_v23 = vpop.f32.mrf.mxu2  ;;  %v2697_v31 = vpop.f32.mrf.mxu0 }
 0x44b   : > { %v3202_v25 = vpop.f32.mrf.mxu3  ;;  %v3034_v16 = vadd.f32 %v3033_v23, %v2865_v55  ;;  %v2866_v45 = vpop.f32.mrf.mxu1  ;;  %v2698_v48 = vadd.f32 %v2697_v31, %v7159_v35  ;;  %v7168_v31 = vld [vmem:[#allocation71_spill] sm:$0xff] }
 0x44d   : > { %v3203_v47 = vadd.f32 %v3202_v25, %v3034_v16  ;;  %v2867_v46 = vadd.f32 %v2866_v45, %v2698_v48 }
 0x44f   : > { %v3349_v11 = vmax.f32 %v3203_v47, %v6519_v33 }
 0x452   : > { %v3035_v37 = vpop.f32.mrf.mxu2  ;;  %v2700_v2 = vpop.f32.mrf.mxu0 }
 0x453   : > { %v3204_v4 = vpop.f32.mrf.mxu3  ;;  %v3036_v6 = vadd.f32 %v3035_v37, %v2867_v46  ;;  %v2869_v12 = vpop.f32.mrf.mxu1  ;;  %v2701_v57 = vadd.f32 %v2700_v2, %v7160_v34  ;;  %v7169_v2 = vld [vmem:[#allocation70_spill] sm:$0xff] }
 0x455   : > { %v3205_v13 = vadd.f32 %v3204_v4, %v3036_v6  ;;  %v2870_v40 = vadd.f32 %v2869_v12, %v2701_v57  ;;  %2739 = vmatmul.bf16.gmra.mxu0 %v7161_v20 }
 0x456   : > { %2908 = vmatmul.bf16.gmra.mxu1 %v7162_v56 }
 0x457   : > { %v3351_v15 = vmax.f32 %v3205_v13, %v6524_v32  ;;  %3077 = vmatmul.bf16.gmra.mxu2 %v7163_v3 }
 0x458   : > { %3246 = vmatmul.bf16.gmra.mxu3 %v7164_v27  ;;  %v7170_v27 = vld [vmem:[#allocation16_spill] sm:$0xff] }
 0x45a   : > { %v3038_v33 = vpop.f32.mrf.mxu2  ;;  %v2702_v54 = vpop.f32.mrf.mxu0 }
 0x45b   : > { %v3207_v63 = vpop.f32.mrf.mxu3  ;;  %v3039_v1 = vadd.f32 %v3038_v33, %v2870_v40  ;;  %v2871_v52 = vpop.f32.mrf.mxu1  ;;  %v2703_v61 = vadd.f32 %v2702_v54, %v7165_v41 }
 0x45d   : > { %v3208_v43 = vadd.f32 %v3207_v63, %v3039_v1  ;;  %v2872_v22 = vadd.f32 %v2871_v52, %v2703_v61 }
 0x45f   : > { %v3353_v28 = vmax.f32 %v3208_v43, %v6529_v50 }
 0x462   : > { %v3040_v9 = vpop.f32.mrf.mxu2  ;;  %v2705_v17 = vpop.f32.mrf.mxu0 }
 0x463   : > { %v3209_v36 = vpop.f32.mrf.mxu3  ;;  %v3041_v32 = vadd.f32 %v3040_v9, %v2872_v22  ;;  %v2874_v39 = vpop.f32.mrf.mxu1  ;;  %v2706_v42 = vadd.f32 %v2705_v17, %v7166_v24  ;;  %v7171_v22 = vld [vmem:[#allocation17_spill] sm:$0xff] }
 0x465   : > { %v3210_v14 = vadd.f32 %v3209_v36, %v3041_v32  ;;  %v2875_v59 = vadd.f32 %v2874_v39, %v2706_v42  ;;  %4442 = vmatmul.msk.bf16.vlgmr.msra.gmra.mxu0 %vm3397_vm0, %v6548_v7 }
 0x467   : > { %v3355_v38 = vmax.f32 %v3210_v14, %v6534_v58 }
 0x46a   : > { %v3043_v53 = vpop.f32.mrf.mxu2  ;;  %v2707_v60 = vpop.f32.mrf.mxu0 }
 0x46b   : > { %v3212_v26 = vpop.f32.mrf.mxu3  ;;  %v3044_v50 = vadd.f32 %v3043_v53, %v2875_v59  ;;  %v2876_v0 = vpop.f32.mrf.mxu1  ;;  %v2708_v21 = vadd.f32 %v2707_v60, %v7167_v30  ;;  %v7172_v59 = vld [vmem:[#allocation53_spill] sm:$0xff] }
 0x46d   : > { %v3213_v55 = vadd.f32 %v3212_v26, %v3044_v50  ;;  %v2877_v51 = vadd.f32 %v2876_v0, %v2708_v21 }
 0x46f   : > { %v6555_v8 = vmax.f32 %v3213_v55, %v3349_v11 }
 0x472   : > { %v3045_v49 = vpop.f32.mrf.mxu2  ;;  %v2710_v25 = vpop.f32.mrf.mxu0 }
 0x473   : > { %v3214_v62 = vpop.f32.mrf.mxu3  ;;  %v3046_v23 = vadd.f32 %v3045_v49, %v2877_v51  ;;  %v2879_v16 = vpop.f32.mrf.mxu1  ;;  %v2711_v45 = vadd.f32 %v2710_v25, %v7168_v31 }
 0x475   : > { %v3215_v35 = vadd.f32 %v3214_v62, %v3046_v23  ;;  %v2880_v58 = vadd.f32 %v2879_v16, %v2711_v45 }
 0x477   : > { %v6558_v48 = vmax.f32 %v3215_v35, %v3351_v15 }
 0x47a   : > { %v3048_v47 = vpop.f32.mrf.mxu2  ;;  %v2712_v4 = vpop.f32.mrf.mxu0 }
 0x47b   : > { %v3217_v46 = vpop.f32.mrf.mxu3  ;;  %v3049_v37 = vadd.f32 %v3048_v47, %v2880_v58  ;;  %v2881_v6 = vpop.f32.mrf.mxu1  ;;  %v2713_v12 = vadd.f32 %v2712_v4, %v7169_v2 }
 0x47d   : > { %v3218_v11 = vadd.f32 %v3217_v46, %v3049_v37  ;;  %v2882_v34 = vadd.f32 %v2881_v6, %v2713_v12 }
 0x47f   : > { %v6561_v57 = vmax.f32 %v3218_v11, %v3353_v28 }
 0x482   : > { %v3050_v13 = vpop.f32.mrf.mxu2  ;;  %v2715_v56 = vpop.f32.mrf.mxu0 }
 0x483   : > { %v3219_v40 = vpop.f32.mrf.mxu3  ;;  %v3051_v20 = vadd.f32 %v3050_v13, %v2882_v34  ;;  %v2884_v3 = vpop.f32.mrf.mxu1  ;;  %v2716_v33 = vadd.f32 %v2715_v56, %v7170_v27  ;;  %v7174_v56 = vld [vmem:[#allocation19_spill] sm:$0xff]  ;;  %v7175_v27 = vld [vmem:[#allocation20_spill] sm:$0xff] }
 0x485   : > { %v3220_v15 = vadd.f32 %v3219_v40, %v3051_v20  ;;  %v2885_v63 = vadd.f32 %v2884_v3, %v2716_v33  ;;  %v7173_v40 = vld [vmem:[#allocation18_spill] sm:$0xff] }
 0x487   : > { %v6564_v1 = vmax.f32 %v3220_v15, %v3355_v38 }
 0x48a   : > { %v3053_v54 = vpop.f32.mrf.mxu2  ;;  %v2717_v61 = vpop.f32.mrf.mxu0 }
 0x48b   : > { %v3222_v52 = vpop.f32.mrf.mxu3  ;;  %v3054_v41 = vadd.f32 %v3053_v54, %v2885_v63  ;;  %v2886_v43 = vpop.f32.mrf.mxu1  ;;  %v2718_v9 = vadd.f32 %v2717_v61, %v7171_v22 }
 0x48d   : > { %v6567_v28 = vadd.f32 %v3222_v52, %v3054_v41  ;;  %v2887_v36 = vadd.f32 %v2886_v43, %v2718_v9 }
 0x48f   : > { %v3341_v32 = vmax.f32 %v6567_v28, %v6555_v8 }
 0x492   : > { %v3055_v17 = vpop.f32.mrf.mxu2  ;;  %v2720_v42 = vpop.f32.mrf.mxu0 }
 0x493   : > { %v3224_v39 = vpop.f32.mrf.mxu3  ;;  %v3056_v24 = vadd.f32 %v3055_v17, %v2887_v36  ;;  %v2889_v14 = vpop.f32.mrf.mxu1  ;;  %v2721_v38 = vadd.f32 %v2720_v42, %v7172_v59 }
 0x495   : > { %v3225_v53 = vadd.f32 %v3224_v39, %v3056_v24  ;;  %v2890_v26 = vadd.f32 %v2889_v14, %v2721_v38 }
 0x497   : > { %v3343_v50 = vmax.f32 %v3225_v53, %v6558_v48 }
 0x49a   : > { %v3058_v60 = vpop.f32.mrf.mxu2  ;;  %v2722_v21 = vpop.f32.mrf.mxu0 }
 0x49b   : > { %v3227_v0 = vpop.f32.mrf.mxu3  ;;  %v3059_v30 = vadd.f32 %v3058_v60, %v2890_v26  ;;  %v2891_v55 = vpop.f32.mrf.mxu1  ;;  %v2723_v26 = vadd.f32 %v2722_v21, %v7027_v44 }
 0x49d   : > { %v6573_v51 = vadd.f32 %v3227_v0, %v3059_v30 }
 0x49f   : > { %v3345_v8 = vmax.f32 %v6573_v51, %v6561_v57 }
 0x4a2   : > { %v3060_v49 = vpop.f32.mrf.mxu2  ;;  %v2725_v23 = vpop.f32.mrf.mxu0 }
 0x4a3   : > { %v6577_v62 = vpop.f32.mrf.mxu3  ;;  %v2894_v25 = vpop.f32.mrf.mxu1  ;;  %v2726_v20 = vadd.f32 %v2725_v23, %v7173_v40 }
 0x4a5   : > { %v2895_v54 = vadd.f32 %v2894_v25, %v2726_v20 }
 0x4aa   : > { %v3063_v16 = vpop.f32.mrf.mxu2  ;;  %v2727_v45 = vpop.f32.mrf.mxu0 }
 0x4ab   : > { %v3232_v31 = vpop.f32.mrf.mxu3  ;;  %v2896_v35 = vpop.f32.mrf.mxu1  ;;  %v2728_v3 = vadd.f32 %v2727_v45, %v7174_v56  ;;  %v3064_v43 = vadd.f32 %v3063_v16, %v2895_v54 }
 0x4ad   : > { %v2897_v52 = vadd.f32 %v2896_v35, %v2728_v3  ;;  %v3233_v17 = vadd.f32 %v3232_v31, %v3064_v43  ;;  %v2892_v31 = vadd.f32 %v2891_v55, %v2723_v26 }
 0x4af   : > { %v3357_v60 = vmax.f32 %v3233_v17, %v3341_v32 }
 0x4b2   : > { %v3065_v58 = vpop.f32.mrf.mxu2  ;;  %v2730_v47 = vpop.f32.mrf.mxu0 }
 0x4b3   : > { %v3234_v48 = vpop.f32.mrf.mxu3  ;;  %v2899_v46 = vpop.f32.mrf.mxu1  ;;  %v3066_v22 = vadd.f32 %v3065_v58, %v2897_v52  ;;  %v2731_v25 = vadd.f32 %v2730_v47, %v7029_v10 }
 0x4b5   : > { %v3235_v39 = vadd.f32 %v3234_v48, %v3066_v22  ;;  %v2900_v40 = vadd.f32 %v2899_v46, %v2731_v25  ;;  %v3433_v22 = vld [vmem:[#allocation8] sm:$0xf] }
 0x4b7   : > { %v3359_v0 = vmax.f32 %v3235_v39, %v3343_v50 }
 0x4ba   : > { %v3068_v37 = vpop.f32.mrf.mxu2  ;;  %v2732_v6 = vpop.f32.mrf.mxu0 }
 0x4bb   : > { %v3237_v4 = vpop.f32.mrf.mxu3  ;;  %v2901_v2 = vpop.f32.mrf.mxu1  ;;  %v2733_v16 = vadd.f32 %v2732_v6, %v7030_v29  ;;  %v3069_v32 = vadd.f32 %v3068_v37, %v2900_v40 }
 0x4bd   : > { %v2902_v20 = vadd.f32 %v2901_v2, %v2733_v16  ;;  %v3238_v6 = vadd.f32 %v3237_v4, %v3069_v32 }
 0x4bf   : > { %v3361_v37 = vmax.f32 %v3238_v6, %v3345_v8 }
 0x4c2   : > { %v3070_v12 = vpop.f32.mrf.mxu2  ;;  %v2735_v34 = vpop.f32.mrf.mxu0 }
 0x4c3   : > { %v3239_v11 = vpop.f32.mrf.mxu3  ;;  %v2904_v13 = vpop.f32.mrf.mxu1  ;;  %v2736_v33 = vadd.f32 %v2735_v34, %v7175_v27  ;;  %v3071_v50 = vadd.f32 %v3070_v12, %v2902_v20 }
 0x4c5   : > { %v2905_v9 = vadd.f32 %v2904_v13, %v2736_v33  ;;  %v3061_v13 = vadd.f32 %v3060_v49, %v2892_v31  ;;  %v3240_v55 = vadd.f32 %v3239_v11, %v3071_v50  ;;  %v3390_v11 = vpop.permute.xlu2 %3389 }
 0x4c7   : > { %v3230_v10 = vadd.f32 %v6577_v62, %v3061_v13 }
 0x4c9   : > { %v3347_v27 = vmax.f32 %v3230_v10, %v6564_v1 }
 0x4ca   : > { %v3073_v15 = vpop.f32.mrf.mxu2  ;;  %v2737_v41 = vpop.f32.mrf.mxu0 }
 0x4cb   : > { %v3242_v63 = vpop.f32.mrf.mxu3  ;;  %v2906_v61 = vpop.f32.mrf.mxu1  ;;  %v2738_v28 = vadd.f32 %v2737_v41, %v6296_v19  ;;  %v3074_v36 = vadd.f32 %v3073_v15, %v2905_v9  ;;  %v3363_v12 = vmax.f32 %v3240_v55, %v3347_v27 }
 0x4cc   : > { %v3439_v9 = vpop.permute.xlu0 %3438 }
 0x4cd   : > { %v2907_v24 = vadd.f32 %v2906_v61, %v2738_v28  ;;  %v3243_v59 = vadd.f32 %v3242_v63, %v3074_v36  ;;  %v3385_v63 = vpop.permute.xlu1 %3384 }
 0x4cf   : > { %v3365_v19 = vmax.f32 %v3243_v59, %v3357_v60 }
 0x4d2   : > { %v3075_v42 = vpop.f32.mrf.mxu2  ;;  %v2740_v53 = vpop.f32.mrf.mxu0 }
 0x4d3   : > { %v3244_v14 = vpop.f32.mrf.mxu3  ;;  %v3076_v38 = vadd.f32 %v3075_v42, %v2907_v24  ;;  %v2909_v23 = vpop.f32.mrf.mxu1  ;;  %v2741_v35 = vadd.f32 %v2740_v53, %v7033_v5 }
 0x4d5   : > { %v3245_v30 = vadd.f32 %v3244_v14, %v3076_v38  ;;  %v2910_v21 = vadd.f32 %v2909_v23, %v2741_v35  ;;  %v3479_v31 = vpop.permute.xlu1 %3478 }
 0x4d7   : > { %v3367_v45 = vmax.f32 %v3245_v30, %v3359_v0 }
 0x4d9   : > { %v3379_v58 = vpack.c.bf16 %v3367_v45, %v3365_v19  ;;  %v3524_v45 = vlaneseq }
 0x4da   : > { %v3078_v48 = vpop.f32.mrf.mxu2  ;;  %v2742_v44 = vpop.f32.mrf.mxu0 }
 0x4db   : > { %v3247_v34 = vpop.f32.mrf.mxu3  ;;  %v2743_v56 = vadd.f32 %v2742_v44, %v7036_v18  ;;  %v3079_v29 = vadd.f32 %v3078_v48, %v2910_v21  ;;  %v2911_v47 = vpop.f32.mrf.mxu1  ;;  %vm3526_vm5 = vcmp.lt.s32.totalorder %v3524_v45, 256 }
 0x4dd   : > { %v2912_v3 = vadd.f32 %v2911_v47, %v2743_v56  ;;  %v3248_v33 = vadd.f32 %v3247_v34, %v3079_v29 }
 0x4df   : > { %v3369_v15 = vmax.f32 %v3248_v33, %v3361_v37 }
 0x4e2   : > { %v3080_v5 = vpop.f32.mrf.mxu2  ;;  %v3410_v46 = vpop.f32.mrf.mxu0 }
 0x4e3   : > { %v3081_v49 = vadd.f32 %v3080_v5, %v2912_v3  ;;  %v3249_v2 = vpop.f32.mrf.mxu3  ;;  %v3411_v4 = vadd.f32 %v3410_v46, %v3385_v63 }
 0x4e5   : > { %v3250_v18 = vadd.f32 %v3249_v2, %v3081_v49  ;;  %v3429_v1 = vmax.f32 %v3411_v4, 0.0 }
 0x4e7   : > { %v3371_v62 = vmax.f32 %v3250_v18, %v3363_v12 }
 0x4e9   : > { %v3381_v54 = vpack.c.bf16 %v3371_v62, %v3369_v15 }
 0x4ea   : > { %v3412_v52 = vpop.f32.mrf.mxu0 }
 0x4eb   : > { %3421 = vmatpush.bf16.msra.mxu1 %v3381_v54  ;;  %v3413_v41 = vadd.f32 %v3412_v52, %v3390_v11 }
 0x4ed   : > { %v3431_v61 = vmax.f32 %v3413_v41, 0.0 }
 0x4ef   : > { %3422 = vmatpush.bf16.msra.mxu1 %v3379_v58  ;;  %v3434_v43 = vpack.c.bf16 %v3431_v61, %v3429_v1 }
 0x4f1   : > { %3452 = vmatpush.bf16.msra.mxu2 %v3434_v43 }
 0x4f2   : > { %4443 = vmatmul.msk.bf16.vlgmr.msra.gmra.mxu1 %vm3397_vm0, %v6548_v7  ;;  %v3473_v7 = vld [vmem:[#allocation10] sm:$0x1] }
 0x4f4   : > { %4444 = vmatmul.msk.bf16.vlgmr.msra.gmra.mxu2 %vm3441_vm1, %v3433_v22 }
 0x56f   : > { %v3424_v57 = vpop.f32.mrf.mxu1 }
 0x570   : > { %v3425_v51 = vadd.f32 %v3424_v57, %v3385_v63 }
 0x572   : > { %v3430_v39 = vmax.f32 %v3425_v51, 0.0 }
 0x577   : > { %v3426_v8 = vpop.f32.mrf.mxu1  ;;  %v3454_v28 = vpop.f32.mrf.mxu2 }
 0x578   : > { %v3427_v36 = vadd.f32 %v3426_v8, %v3390_v11  ;;  %v3455_v17 = vadd.f32 %v3454_v28, %v3439_v9 }
 0x57a   : > { %v3432_v24 = vmax.f32 %v3427_v36, 0.0  ;;  %v3471_v42 = vmax.f32 %v3455_v17, 0.0 }
 0x57c   : > { %v3435_v14 = vpack.c.bf16 %v3432_v24, %v3430_v39  ;;  %v3474_v59 = vpack.c.bf16 %v3471_v42, %v3471_v42 }
 0x57e   : > { %3465 = vmatpush.bf16.msra.mxu3 %v3435_v14  ;;  %v3487_v38 = vsel %vm3485_vm2, %v3474_v59, 0 }
 0x57f   : > { %3499 = vmatpush.bf16.msrb.mxu0 %v3487_v38  ;;  %v3456_v53 = vpop.f32.mrf.mxu2 }
 0x581   : > { %4445 = vmatmul.msk.bf16.vlgmr.msra.gmra.mxu3 %vm3441_vm1, %v3433_v22 }
 0x582   : > { %4446 = vmatmul.msk.bf16.vlgmr.msrb.gmra.mxu0 %vm3481_vm3, %v3473_v7 }
 0x5ff   : > { %v3501_v26 = vpop.f32.mrf.mxu0 }
 0x600   : > { %v3502_v48 = vadd.f32 %v3501_v26, %v3479_v31 }
 0x604   : > { %v3467_v60 = vpop.f32.mrf.mxu3 }
 0x605   : > { %v3468_v0 = vadd.f32 %v3467_v60, %v3439_v9 }
 0x607   : > { %v3472_v30 = vmax.f32 %v3468_v0, 0.0  ;;  %v3503_v23 = vpop.f32.mrf.mxu0 }
 0x609   : > { %v3475_v25 = vpack.c.bf16 %v3472_v30, %v3472_v30 }
 0x60b   : > { %v3490_v16 = vsel %vm3485_vm2, %v3475_v25, 0 }
 0x60c   : > { %3512 = vmatpush.bf16.msrb.mxu1 %v3490_v16  ;;  %v3469_v19 = vpop.f32.mrf.mxu3 }
 0x60f   : > { %4447 = vmatmul.msk.bf16.vlgmr.msrb.gmra.mxu1 %vm3481_vm3, %v3473_v7 }
 0x68c   : > { %v3514_v35 = vpop.f32.mrf.mxu1 }
 0x68d   : > { %v3515_v58 = vadd.f32 %v3514_v35, %v3479_v31 }
 0x68f   : > { %v3520_v34 = vrot.slane %v3515_v58, 7 }
 0x691   : > { %v3522_v13 = vsel %vm3521_vm4, %v3502_v48, %v3520_v34 }
 0x692   : > { %3528 = vst.msk [vmem:[%s360_s15] sm:$0x3] %vm3526_vm5, %v3522_v13 }
 0x693   : > { %4921 = shalt.err (!%p4918_p10)
}
 0x694   : > { %4664 = dma.vmem_to_hbm [thread:$0]  (%p5105_p0), %s3543_s3, 32, %s3545_s30, %s3530_s28   ;;  %v3516_v40 = vpop.f32.mrf.mxu1 }
 0x695 PF: > { %p4696_p11 = scmp.ge.s32.totalorder %s4968_s27, 2  ;;  %s3556_s13 = sand.u32 1, %s4956_s24  }
 0x696   : > { %s3557_s16 = scalar_lea.sflag [#allocation4], %s3556_s13 }
 0x697   : > { %p4684_p12 = pnand %p4696_p11, %p5057_p6 }
 0x699   : > { %p4685_p13 = pneg %p4684_p12 }
 0x69b   : > { %4951 = dma.done.wait (%p4685_p13), %s3557_s16, 32  }
 0x69c   : > { %4953 = vsyncadd (%p4685_p13), %s3557_s16, 4294967264  ;;  %p22_p3 = scmp.ge.s32.totalorder %s5095_s21, 10   ;;  %s7176_s24 = smov %s4960_s25 }
 0x69d   : > { %s7177_s25 = smov %s4964_s26  ;;  %s7178_s26 = smov %s5111_s9 }
 0x69e   : > { %s7179_s27 = smov %s5095_s21  ;;  %24 = sbr.rel (!%p22_p3) target bundleno = 10 (0xa), region = 109 }
 0x6a3   :  { %3563 = vsyncpa [#allocation3], 1 }
 0x6a4   :  { %3565 = vsyncpa [#allocation3 + $0x1], 1 }
 0x6a5   :  { %3566 = vsyncpa [#allocation6], 1 }
 0x6a6   :  { %3567 = vsyncpa [#allocation9], 1 }
 0x6a7   :  { %3568 = vsyncpa [#allocation4], 1 }
 0x6a8   :  { %3570 = vsyncpa [#allocation4 + $0x1], 1 }

</bundles_post_ra>
